<compile_context>
chip_gen: v6e
topology: v6e:2x2x1
jax: 0.10.0
libtpu: 0.0.40
codegen_flags: <defaults>
</compile_context>

<pallas_src>
import functools

import jax
import jax.numpy as jnp
from jax.experimental import pallas as pl
from jax.experimental.pallas import tpu as pltpu


FC2_PAD = 128          # pad fc2's 10 outputs to a lane-dense 128-wide block
CONV1_K_PAD = 32       # pad conv1's im2col K from 25 to a sublane-friendly 32


def _round_up(x, m):
    return ((x + m - 1) // m) * m


# ----------------------------- Pallas kernels ------------------------------

def _gemm_bias_act_kernel(x_ref, w_ref, b_ref, o_ref, *, relu):
    # One M-tile of: out = act(x @ w + b).  bf16 operands, f32 MXU accumulation.
    acc = jnp.dot(x_ref[...], w_ref[...], preferred_element_type=jnp.float32)
    acc = acc + b_ref[...]
    if relu:
        acc = jnp.maximum(acc, 0.0)
    o_ref[...] = acc.astype(o_ref.dtype)


def gemm_bias_act(x, w, b, *, tile_m=512, relu=True, out_dtype=jnp.bfloat16):
    # M-tiled fused GEMM + bias (+ ReLU).  x:(M,K) bf16, w:(K,N) bf16, b:(1,N) f32.
    M, K = x.shape
    Kw, N = w.shape
    assert K == Kw
    tm = _round_up(min(tile_m, M), 8)
    Mp = _round_up(M, tm)
    if Mp != M:
        x = jnp.pad(x, ((0, Mp - M), (0, 0)))
    out = pl.pallas_call(
        functools.partial(_gemm_bias_act_kernel, relu=relu),
        out_shape=jax.ShapeDtypeStruct((Mp, N), out_dtype),
        grid=(Mp // tm,),
        in_specs=[
            pl.BlockSpec((tm, K), lambda i: (i, 0)),   # activations: tiled over M
            pl.BlockSpec((K, N), lambda i: (0, 0)),    # weights: resident
            pl.BlockSpec((1, N), lambda i: (0, 0)),    # bias: resident
        ],
        out_specs=pl.BlockSpec((tm, N), lambda i: (i, 0)),
        compiler_params=pltpu.CompilerParams(
            dimension_semantics=("parallel",),         # megacore split on v7x
            vmem_limit_bytes=32 * 1024 * 1024,         # safe on v5e/v6e/v7x
        ),
    )(x, w, b)
    return out[:M]


def _fc_fused_kernel(x_ref, w1_ref, b1_ref, w2_ref, b2_ref, o_ref):
    # out = (relu(x @ W1 + b1)) @ W2pad + b2pad, all on-chip; output is 128-lane dense.
    h = jnp.dot(x_ref[...], w1_ref[...], preferred_element_type=jnp.float32)
    h = jnp.maximum(h + b1_ref[...], 0.0)
    o = jnp.dot(h.astype(jnp.bfloat16), w2_ref[...],
                preferred_element_type=jnp.float32)
    o_ref[...] = (o + b2_ref[...]).astype(o_ref.dtype)


def fc_fused(x, w1, b1, w2, b2, *, tile_m=256):
    # x:(M,1024) bf16, w1:(1024,1024) bf16, w2:(1024,128) bf16, biases f32.
    M, K = x.shape
    H = w1.shape[1]
    P = w2.shape[1]
    tm = _round_up(min(tile_m, M), 8)
    Mp = _round_up(M, tm)
    if Mp != M:
        x = jnp.pad(x, ((0, Mp - M), (0, 0)))
    out = pl.pallas_call(
        _fc_fused_kernel,
        out_shape=jax.ShapeDtypeStruct((Mp, P), jnp.float32),
        grid=(Mp // tm,),
        in_specs=[
            pl.BlockSpec((tm, K), lambda i: (i, 0)),
            pl.BlockSpec((K, H), lambda i: (0, 0)),
            pl.BlockSpec((1, H), lambda i: (0, 0)),
            pl.BlockSpec((H, P), lambda i: (0, 0)),
            pl.BlockSpec((1, P), lambda i: (0, 0)),
        ],
        out_specs=pl.BlockSpec((tm, P), lambda i: (i, 0)),
        compiler_params=pltpu.CompilerParams(
            dimension_semantics=("parallel",),
            vmem_limit_bytes=32 * 1024 * 1024,
        ),
    )(x, w1, b1, w2, b2)
    return out[:M]


# ------------------------------ glue (plain JAX) ----------------------------

def _im2col_nhwc(x, kh, kw):
    # x: (N, H, W, C) -> (N, OH, OW, KH*KW*C); patch entries ordered (kh, kw, c), c fastest.
    N, H, W, C = x.shape
    OH, OW = H - kh + 1, W - kw + 1
    cols = []
    for i in range(kh):
        for j in range(kw):
            cols.append(x[:, i:i + OH, j:j + OW, :])
    return jnp.concatenate(cols, axis=-1), (N, OH, OW)


def _maxpool2x2_nhwc(x):
    # Plain-JAX window max (exact in any dtype); replaces the old Pallas pool kernel.
    N, H, W, C = x.shape
    return jnp.max(x.reshape(N, H // 2, 2, W // 2, 2, C), axis=(2, 4))


# ------------------------- parameter packing (one-time) ---------------------

def pack_params(params):
    """Repack / transpose / pad / bf16-cast all weights once, outside the hot path."""
    # conv weights (Cout, Cin, KH, KW) -> im2col matrices (KH*KW*Cin, Cout).
    w1c = jnp.transpose(params["conv1_w"], (2, 3, 1, 0)).reshape(25, 32)
    w1c = jnp.pad(w1c, ((0, CONV1_K_PAD - 25), (0, 0)))           # K 25 -> 32
    w2c = jnp.transpose(params["conv2_w"], (2, 3, 1, 0)).reshape(800, 64)

    # fc1: (out,in) -> (in,out) and permute rows so the PyTorch NCHW flatten
    # (c,h,w) is consumed directly from our NHWC (h,w,c) flatten.
    wf1 = params["fc1_w"].T                                        # (1024_in_nchw, 1024_out)
    wf1 = wf1.reshape(64, 4, 4, 1024).transpose(1, 2, 0, 3).reshape(1024, 1024)

    # fc2: (10,1024) -> (1024,10) -> pad out-dim to a lane-dense 128.
    wf2 = jnp.pad(params["fc2_w"].T, ((0, 0), (0, FC2_PAD - 10)))
    bf2 = jnp.pad(params["fc2_b"], (0, FC2_PAD - 10))

    bf16 = jnp.bfloat16
    return {
        "c1_w": w1c.astype(bf16), "c1_b": params["conv1_b"].reshape(1, 32).astype(jnp.float32),
        "c2_w": w2c.astype(bf16), "c2_b": params["conv2_b"].reshape(1, 64).astype(jnp.float32),
        "fc1_w": wf1.astype(bf16), "fc1_b": params["fc1_b"].reshape(1, 1024).astype(jnp.float32),
        "fc2_w": wf2.astype(bf16), "fc2_b": bf2.reshape(1, FC2_PAD).astype(jnp.float32),
    }


# --------------------------------- forward ----------------------------------

def net1_forward(packed, x_nchw, *, conv_tile=512, fc_tile=256):
    N = x_nchw.shape[0]
    # NCHW with C==1 -> NHWC is a pure (free) reshape; cast activations to bf16.
    x = x_nchw.reshape(N, 28, 28, 1).astype(jnp.bfloat16)

    # conv1 + relu (im2col GEMM, K padded 25->32), then 2x2 max-pool.
    p1, (_, oh1, ow1) = _im2col_nhwc(x, 5, 5)                       # (N,24,24,25)
    p1 = jnp.pad(p1, ((0, 0), (0, 0), (0, 0), (0, CONV1_K_PAD - 25)))
    y1 = gemm_bias_act(p1.reshape(N * oh1 * ow1, CONV1_K_PAD),
                       packed["c1_w"], packed["c1_b"], tile_m=conv_tile)
    y1 = _maxpool2x2_nhwc(y1.reshape(N, oh1, ow1, 32))              # (N,12,12,32) bf16

    # conv2 + relu, then 2x2 max-pool.
    p2, (_, oh2, ow2) = _im2col_nhwc(y1, 5, 5)                      # (N,8,8,800)
    y2 = gemm_bias_act(p2.reshape(N * oh2 * ow2, 800),
                       packed["c2_w"], packed["c2_b"], tile_m=conv_tile)
    y2 = _maxpool2x2_nhwc(y2.reshape(N, oh2, ow2, 64))              # (N,4,4,64) bf16

    # Flatten NHWC (free reshape); fc1's weight rows were pre-permuted to match
    # PyTorch's NCHW reshape(-1, 1024).  Fused fc1+fc2 kernel, slice 128 -> 10.
    xf = y2.reshape(N, 1024)
    logits = fc_fused(xf, packed["fc1_w"], packed["fc1_b"],
                      packed["fc2_w"], packed["fc2_b"], tile_m=fc_tile)
    return logits[:, :10]


# --------------------------------- init / main -------------------------------

def init_params(key):
    # Deterministic init mirroring PyTorch default uniform(-1/sqrt(fan_in), +1/sqrt(fan_in)).
    ks = jax.random.split(key, 8)

    def u(k, shape, fan_in):
        bound = 1.0 / jnp.sqrt(jnp.float32(fan_in))
        return jax.random.uniform(k, shape, jnp.float32, -bound, bound)

    return {
        "conv1_w": u(ks[0], (32, 1, 5, 5), 1 * 5 * 5),
        "conv1_b": u(ks[1], (32,), 1 * 5 * 5),
        "conv2_w": u(ks[2], (64, 32, 5, 5), 32 * 5 * 5),
        "conv2_b": u(ks[3], (64,), 32 * 5 * 5),
        "fc1_w": u(ks[4], (1024, 1024), 1024),
        "fc1_b": u(ks[5], (1024,), 1024),
        "fc2_w": u(ks[6], (10, 1024), 1024),
        "fc2_b": u(ks[7], (10,), 1024),
    }


if __name__ == "__main__":
    key = jax.random.PRNGKey(0)
    pkey, xkey = jax.random.split(key)
    params = init_params(pkey)
    packed = pack_params(params)          # one-time repack, outside the jitted forward
    # Input must be (N, 1, 28, 28) so that 64 * 4 * 4 == 1024 matches fc1.
    x = jax.random.normal(xkey, (2, 1, 28, 28), jnp.float32)
    fwd = jax.jit(net1_forward)
    out = jax.block_until_ready(fwd(packed, x))
    assert out.shape == (2, 10), out.shape
    assert bool(jnp.all(jnp.isfinite(out)))
    print("KERNEL_OK")
</pallas_src>

<mosaic_0001>
module attributes {stable_mosaic.version = 11 : i64} {
  func.func @_gemm_bias_act_kernel(%arg0: i32, %arg1: memref<512x32xbf16, #tpu.memory_space<vmem>>, %arg2: memref<32x32xbf16, #tpu.memory_space<vmem>>, %arg3: memref<1x32xf32, #tpu.memory_space<vmem>>, %arg4: memref<512x32xbf16, #tpu.memory_space<vmem>>) attributes {dimension_semantics = [#tpu.dimension_semantics<parallel>], iteration_bounds = array<i64: 3>, scalar_prefetch = 0 : i64, scratch_operands = 0 : i64, tpu.core_type = #tpu.core_type<tc>, window_params = [{transform_indices = @transform_0, window_bounds = array<i64: 512, 32>}, {pipeline_mode = #tpu.pipeline_mode<synchronous>, transform_indices = @transform_1, window_bounds = array<i64: 32, 32>}, {pipeline_mode = #tpu.pipeline_mode<synchronous>, transform_indices = @transform_2, window_bounds = array<i64: 1, 32>}, {transform_indices = @transform_3, window_bounds = array<i64: 512, 32>}]} {
    %c0 = arith.constant 0 : index
    %c0_0 = arith.constant 0 : index
    %0 = vector.load %arg1[%c0, %c0_0] : memref<512x32xbf16, #tpu.memory_space<vmem>>, vector<512x32xbf16>
    %c0_1 = arith.constant 0 : index
    %c0_2 = arith.constant 0 : index
    %1 = vector.load %arg2[%c0_1, %c0_2] : memref<32x32xbf16, #tpu.memory_space<vmem>>, vector<32x32xbf16>
    %cst = arith.constant dense<0.000000e+00> : vector<512x32xf32>
    %2 = tpu.matmul %0, %1, %cst {dimension_numbers = #tpu.dot_dimension_numbers<[1], [0], [0], [1], [0, 0, 1, 1], [], []>} : vector<512x32xbf16>, vector<32x32xbf16>, vector<512x32xf32> -> vector<512x32xf32>
    %c0_3 = arith.constant 0 : index
    %c0_4 = arith.constant 0 : index
    %3 = vector.load %arg3[%c0_3, %c0_4] : memref<1x32xf32, #tpu.memory_space<vmem>>, vector<1x32xf32>
    %4 = vector.broadcast %3 : vector<1x32xf32> to vector<512x32xf32>
    %5 = arith.addf %2, %4 : vector<512x32xf32>
    %cst_5 = arith.constant 0.000000e+00 : f32
    %6 = vector.broadcast %cst_5 : f32 to vector<512x32xf32>
    %7 = arith.maximumf %5, %6 : vector<512x32xf32>
    %8 = arith.truncf %7 : vector<512x32xf32> to vector<512x32xbf16>
    %c0_6 = arith.constant 0 : index
    %c0_7 = arith.constant 0 : index
    %9 = vector.load %arg4[%c0_6, %c0_7] : memref<512x32xbf16, #tpu.memory_space<vmem>>, vector<512x32xbf16>
    tpu.vector_store %arg4[%c0_6, %c0_7], %8 {strides = array<i32>} : memref<512x32xbf16, #tpu.memory_space<vmem>>, vector<512x32xbf16>,
    return
  }
  func.func @transform_0(%arg0: i32) -> (i32, i32) {
    %c0_i32 = arith.constant 0 : i32
    %c0_i32_0 = arith.constant 0 : i32
    return %arg0, %c0_i32 : i32, i32
  }
  func.func @transform_1(%arg0: i32) -> (i32, i32) {
    %c0_i32 = arith.constant 0 : i32
    %c0_i32_0 = arith.constant 0 : i32
    %c0_i32_1 = arith.constant 0 : i32
    return %c0_i32, %c0_i32_0 : i32, i32
  }
  func.func @transform_2(%arg0: i32) -> (i32, i32) {
    %c0_i32 = arith.constant 0 : i32
    %c0_i32_0 = arith.constant 0 : i32
    %c0_i32_1 = arith.constant 0 : i32
    return %c0_i32, %c0_i32_0 : i32, i32
  }
  func.func @transform_3(%arg0: i32) -> (i32, i32) {
    %c0_i32 = arith.constant 0 : i32
    %c0_i32_0 = arith.constant 0 : i32
    return %arg0, %c0_i32 : i32, i32
  }
}

module attributes {stable_mosaic.version = 11 : i64} {
  func.func @_gemm_bias_act_kernel(%arg0: i32, %arg1: memref<128x800xbf16, #tpu.memory_space<vmem>>, %arg2: memref<800x64xbf16, #tpu.memory_space<vmem>>, %arg3: memref<1x64xf32, #tpu.memory_space<vmem>>, %arg4: memref<128x64xbf16, #tpu.memory_space<vmem>>) attributes {dimension_semantics = [#tpu.dimension_semantics<parallel>], iteration_bounds = array<i64: 1>, scalar_prefetch = 0 : i64, scratch_operands = 0 : i64, tpu.core_type = #tpu.core_type<tc>, window_params = [{transform_indices = @transform_0, window_bounds = array<i64: 128, 800>}, {pipeline_mode = #tpu.pipeline_mode<synchronous>, transform_indices = @transform_1, window_bounds = array<i64: 800, 64>}, {pipeline_mode = #tpu.pipeline_mode<synchronous>, transform_indices = @transform_2, window_bounds = array<i64: 1, 64>}, {transform_indices = @transform_3, window_bounds = array<i64: 128, 64>}]} {
    %c0 = arith.constant 0 : index
    %c0_0 = arith.constant 0 : index
    %0 = vector.load %arg1[%c0, %c0_0] : memref<128x800xbf16, #tpu.memory_space<vmem>>, vector<128x800xbf16>
    %c0_1 = arith.constant 0 : index
    %c0_2 = arith.constant 0 : index
    %1 = vector.load %arg2[%c0_1, %c0_2] : memref<800x64xbf16, #tpu.memory_space<vmem>>, vector<800x64xbf16>
    %cst = arith.constant dense<0.000000e+00> : vector<128x64xf32>
    %2 = tpu.matmul %0, %1, %cst {dimension_numbers = #tpu.dot_dimension_numbers<[1], [0], [0], [1], [0, 0, 1, 1], [], []>} : vector<128x800xbf16>, vector<800x64xbf16>, vector<128x64xf32> -> vector<128x64xf32>
    %c0_3 = arith.constant 0 : index
    %c0_4 = arith.constant 0 : index
    %3 = vector.load %arg3[%c0_3, %c0_4] : memref<1x64xf32, #tpu.memory_space<vmem>>, vector<1x64xf32>
    %4 = vector.broadcast %3 : vector<1x64xf32> to vector<128x64xf32>
    %5 = arith.addf %2, %4 : vector<128x64xf32>
    %cst_5 = arith.constant 0.000000e+00 : f32
    %6 = vector.broadcast %cst_5 : f32 to vector<128x64xf32>
    %7 = arith.maximumf %5, %6 : vector<128x64xf32>
    %8 = arith.truncf %7 : vector<128x64xf32> to vector<128x64xbf16>
    %c0_6 = arith.constant 0 : index
    %c0_7 = arith.constant 0 : index
    %9 = vector.load %arg4[%c0_6, %c0_7] : memref<128x64xbf16, #tpu.memory_space<vmem>>, vector<128x64xbf16>
    tpu.vector_store %arg4[%c0_6, %c0_7], %8 {strides = array<i32>} : memref<128x64xbf16, #tpu.memory_space<vmem>>, vector<128x64xbf16>,
    return
  }
  func.func @transform_0(%arg0: i32) -> (i32, i32) {
    %c0_i32 = arith.constant 0 : i32
    %c0_i32_0 = arith.constant 0 : i32
    return %arg0, %c0_i32 : i32, i32
  }
  func.func @transform_1(%arg0: i32) -> (i32, i32) {
    %c0_i32 = arith.constant 0 : i32
    %c0_i32_0 = arith.constant 0 : i32
    %c0_i32_1 = arith.constant 0 : i32
    return %c0_i32, %c0_i32_0 : i32, i32
  }
  func.func @transform_2(%arg0: i32) -> (i32, i32) {
    %c0_i32 = arith.constant 0 : i32
    %c0_i32_0 = arith.constant 0 : i32
    %c0_i32_1 = arith.constant 0 : i32
    return %c0_i32, %c0_i32_0 : i32, i32
  }
  func.func @transform_3(%arg0: i32) -> (i32, i32) {
    %c0_i32 = arith.constant 0 : i32
    %c0_i32_0 = arith.constant 0 : i32
    return %arg0, %c0_i32 : i32, i32
  }
}

module attributes {stable_mosaic.version = 11 : i64} {
  func.func @_fc_fused_kernel(%arg0: i32, %arg1: memref<8x1024xbf16, #tpu.memory_space<vmem>>, %arg2: memref<1024x1024xbf16, #tpu.memory_space<vmem>>, %arg3: memref<1x1024xf32, #tpu.memory_space<vmem>>, %arg4: memref<1024x128xbf16, #tpu.memory_space<vmem>>, %arg5: memref<1x128xf32, #tpu.memory_space<vmem>>, %arg6: memref<8x128xf32, #tpu.memory_space<vmem>>) attributes {dimension_semantics = [#tpu.dimension_semantics<parallel>], iteration_bounds = array<i64: 1>, scalar_prefetch = 0 : i64, scratch_operands = 0 : i64, tpu.core_type = #tpu.core_type<tc>, window_params = [{transform_indices = @transform_0, window_bounds = array<i64: 8, 1024>}, {pipeline_mode = #tpu.pipeline_mode<synchronous>, transform_indices = @transform_1, window_bounds = array<i64: 1024, 1024>}, {pipeline_mode = #tpu.pipeline_mode<synchronous>, transform_indices = @transform_2, window_bounds = array<i64: 1, 1024>}, {pipeline_mode = #tpu.pipeline_mode<synchronous>, transform_indices = @transform_3, window_bounds = array<i64: 1024, 128>}, {pipeline_mode = #tpu.pipeline_mode<synchronous>, transform_indices = @transform_4, window_bounds = array<i64: 1, 128>}, {transform_indices = @transform_5, window_bounds = array<i64: 8, 128>}]} {
    %c0 = arith.constant 0 : index
    %c0_0 = arith.constant 0 : index
    %0 = vector.load %arg1[%c0, %c0_0] : memref<8x1024xbf16, #tpu.memory_space<vmem>>, vector<8x1024xbf16>
    %c0_1 = arith.constant 0 : index
    %c0_2 = arith.constant 0 : index
    %1 = vector.load %arg2[%c0_1, %c0_2] : memref<1024x1024xbf16, #tpu.memory_space<vmem>>, vector<1024x1024xbf16>
    %cst = arith.constant dense<0.000000e+00> : vector<8x1024xf32>
    %2 = tpu.matmul %0, %1, %cst {dimension_numbers = #tpu.dot_dimension_numbers<[1], [0], [0], [1], [0, 0, 1, 1], [], []>} : vector<8x1024xbf16>, vector<1024x1024xbf16>, vector<8x1024xf32> -> vector<8x1024xf32>
    %c0_3 = arith.constant 0 : index
    %c0_4 = arith.constant 0 : index
    %3 = vector.load %arg3[%c0_3, %c0_4] : memref<1x1024xf32, #tpu.memory_space<vmem>>, vector<1x1024xf32>
    %4 = vector.broadcast %3 : vector<1x1024xf32> to vector<8x1024xf32>
    %5 = arith.addf %2, %4 : vector<8x1024xf32>
    %cst_5 = arith.constant 0.000000e+00 : f32
    %6 = vector.broadcast %cst_5 : f32 to vector<8x1024xf32>
    %7 = arith.maximumf %5, %6 : vector<8x1024xf32>
    %8 = arith.truncf %7 : vector<8x1024xf32> to vector<8x1024xbf16>
    %c0_6 = arith.constant 0 : index
    %c0_7 = arith.constant 0 : index
    %9 = vector.load %arg4[%c0_6, %c0_7] : memref<1024x128xbf16, #tpu.memory_space<vmem>>, vector<1024x128xbf16>
    %cst_8 = arith.constant dense<0.000000e+00> : vector<8x128xf32>
    %10 = tpu.matmul %8, %9, %cst_8 {dimension_numbers = #tpu.dot_dimension_numbers<[1], [0], [0], [1], [0, 0, 1, 1], [], []>} : vector<8x1024xbf16>, vector<1024x128xbf16>, vector<8x128xf32> -> vector<8x128xf32>
    %c0_9 = arith.constant 0 : index
    %c0_10 = arith.constant 0 : index
    %11 = vector.load %arg5[%c0_9, %c0_10] : memref<1x128xf32, #tpu.memory_space<vmem>>, vector<1x128xf32>
    %12 = vector.broadcast %11 : vector<1x128xf32> to vector<8x128xf32>
    %13 = arith.addf %10, %12 : vector<8x128xf32>
    %c0_11 = arith.constant 0 : index
    %c0_12 = arith.constant 0 : index
    %14 = vector.load %arg6[%c0_11, %c0_12] : memref<8x128xf32, #tpu.memory_space<vmem>>, vector<8x128xf32>
    tpu.vector_store %arg6[%c0_11, %c0_12], %13 {strides = array<i32>} : memref<8x128xf32, #tpu.memory_space<vmem>>, vector<8x128xf32>,
    return
  }
  func.func @transform_0(%arg0: i32) -> (i32, i32) {
    %c0_i32 = arith.constant 0 : i32
    %c0_i32_0 = arith.constant 0 : i32
    return %arg0, %c0_i32 : i32, i32
  }
  func.func @transform_1(%arg0: i32) -> (i32, i32) {
    %c0_i32 = arith.constant 0 : i32
    %c0_i32_0 = arith.constant 0 : i32
    %c0_i32_1 = arith.constant 0 : i32
    return %c0_i32, %c0_i32_0 : i32, i32
  }
  func.func @transform_2(%arg0: i32) -> (i32, i32) {
    %c0_i32 = arith.constant 0 : i32
    %c0_i32_0 = arith.constant 0 : i32
    %c0_i32_1 = arith.constant 0 : i32
    return %c0_i32, %c0_i32_0 : i32, i32
  }
  func.func @transform_3(%arg0: i32) -> (i32, i32) {
    %c0_i32 = arith.constant 0 : i32
    %c0_i32_0 = arith.constant 0 : i32
    %c0_i32_1 = arith.constant 0 : i32
    return %c0_i32, %c0_i32_0 : i32, i32
  }
  func.func @transform_4(%arg0: i32) -> (i32, i32) {
    %c0_i32 = arith.constant 0 : i32
    %c0_i32_0 = arith.constant 0 : i32
    %c0_i32_1 = arith.constant 0 : i32
    return %c0_i32, %c0_i32_0 : i32, i32
  }
  func.func @transform_5(%arg0: i32) -> (i32, i32) {
    %c0_i32 = arith.constant 0 : i32
    %c0_i32_0 = arith.constant 0 : i32
    return %arg0, %c0_i32 : i32, i32
  }
}

</mosaic_0001>

<bundles_post_ra>
// kernel: net1_forward.3
= control target key start
LH: loop header
LB: loop body
LE: loop exit
PB: predicated region body
PF: predicated region fallthrough
CT: control target
= control target key end

     0   :  { %s1631_s12 = smov 0   ;;  %s1926_s0 = inlined_call_operand.vmem [shape: bf16[1536,32], index: 0, kind: input, shape index: {}]   ;;  %s1927_s1 = inlined_call_operand.vmem [shape: bf16[32,32], index: 1, kind: input, shape index: {}]   ;;  %s1928_s2 = inlined_call_operand.vmem [shape: f32[1,32], index: 2, kind: input, shape index: {}]   ;;  %s1929_s3 = inlined_call_operand.vmem [shape: bf16[1536,32], index: 3, kind: output, shape index: {}]  }
   0x1 LB: > { %s1249_s13 = sadd.s32 4294967295, %s1609_s12   ;;  %p1253_p0 = scmp.ge.s32.totalorder %s1609_s12, 1  ;;  %s1609_s12 = sphi %s1631_s12, %s13_s12  }
   0x2   : > { %p138_p1 = scmp.lt.s32.totalorder %s1609_s12, 4 }
   0x4   : > { %p139_p2 = pnand %p1253_p0, %p138_p1 }
   0x5   : > { %s1254_s16 = sshll.u32 (!%p139_p2), %s1249_s13, 6 }
   0x6   : > { %142 = sbr.rel (%p139_p2) target bundleno = 283 (0x11b), region = 32  ;;  %p163_p3 = scmp.lt.s32.totalorder (!%p139_p2), %s1254_s16, 191 }
   0xb   : > { %v1569_v0 = vld [vmem:[%s1927_s1 + $0x8] sm:$0xff]   ;;  %v1570_v1 = vld [vmem:[%s1927_s1] sm:$0xff]   ;;  %s1931_s16 = smov (!%p163_p3, %s1254_s16), 191  ;;  %vm422_vm0 = vcmask 261120   ;;  %vm1128_vm1 = vcmask 257024  }
   0xc   : > { %1489 = vmatprep.subr.bf16.mxu0 %v1569_v0  ;;  %1557 = vmatprep.subr.bf16.mxu1 %v1569_v0  ;;  %s1255_s19 = sshll.u32 %s1931_s16, 2  ;;  %v1722_v34 = vld [vmem:[%s1928_s2] ss:$0 sm:$0xff] }
   0xd   : > { %1490 = vmatpush3.bf16.msra.mxu0 %v1569_v0  ;;  %1559 = vmatpush3.bf16.msra.mxu1 %v1569_v0  ;;  %s1653_s22 = scalar_lea.vmem %s1926_s0, %s1255_s19  ;;  %s1732_s27 = scalar_lea.vmem %s1929_s3, %s1255_s19 }
   0xe   : > { %1491 = vmatprep.subr.bf16.mxu0 %v1570_v1  ;;  %1558 = vmatprep.subr.bf16.mxu1 %v1570_v1  ;;  %v1571_v2 = vld [vmem:[%s1653_s22] sm:$0xff]   ;;  %v1573_v4 = vld [vmem:[%s1653_s22 + $0x8] sm:$0xff]   ;;  %v1575_v6 = vld [vmem:[%s1653_s22 + $0x10] sm:$0xff]  }
   0xf   : > { %v1572_v3 = vld [vmem:[%s1653_s22 + $0x80] sm:$0xff]   ;;  %1493 = vmatprep.mubr.msk.bf16.mxu0 %vm422_vm0, %v1571_v2  ;;  %v1574_v5 = vld [vmem:[%s1653_s22 + $0x88] sm:$0xff]   ;;  %v1576_v7 = vld [vmem:[%s1653_s22 + $0x90] sm:$0xff]  }
  0x10   : > { %1525 = vmatprep.mubr.msk.bf16.mxu1 %vm422_vm0, %v1572_v3  ;;  %v1577_v8 = vld [vmem:[%s1653_s22 + $0x18] sm:$0xff]   ;;  %v1579_v10 = vld [vmem:[%s1653_s22 + $0x20] sm:$0xff]   ;;  %v1581_v12 = vld [vmem:[%s1653_s22 + $0x28] sm:$0xff]  }
  0x11   : > { %1492 = vmatpush3.bf16.msra.mxu0 %v1570_v1  ;;  %1560 = vmatpush3.bf16.msra.mxu1 %v1570_v1  ;;  %v1578_v9 = vld [vmem:[%s1653_s22 + $0x98] sm:$0xff]   ;;  %v1580_v11 = vld [vmem:[%s1653_s22 + $0xa0] sm:$0xff]   ;;  %v1582_v13 = vld [vmem:[%s1653_s22 + $0xa8] sm:$0xff]  }
  0x12   : > { %v1583_v14 = vld [vmem:[%s1653_s22 + $0x30] sm:$0xff]   ;;  %v1585_v16 = vld [vmem:[%s1653_s22 + $0x38] sm:$0xff]   ;;  %v1587_v18 = vld [vmem:[%s1653_s22 + $0x40] sm:$0xff]  }
  0x13   : > { %v1584_v15 = vld [vmem:[%s1653_s22 + $0xb0] sm:$0xff]   ;;  %v1586_v17 = vld [vmem:[%s1653_s22 + $0xb8] sm:$0xff]   ;;  %v1588_v19 = vld [vmem:[%s1653_s22 + $0xc0] sm:$0xff]  }
  0x14   : > { %1494 = vmatmul.mubr.msk.bf16.vlgmr.msra.gmra.mxu0 %vm422_vm0, %v1573_v4  ;;  %1526 = vmatmul.mubr.msk.bf16.vlgmr.msra.gmra.mxu1 %vm422_vm0, %v1574_v5  ;;  %v1589_v20 = vld [vmem:[%s1653_s22 + $0x48] sm:$0xff]   ;;  %v1591_v22 = vld [vmem:[%s1653_s22 + $0x50] sm:$0xff]   ;;  %v1593_v24 = vld [vmem:[%s1653_s22 + $0x58] sm:$0xff]  }
  0x15   : > { %1497 = vmatprep.mubr.msk.bf16.mxu0 %vm422_vm0, %v1575_v6  ;;  %1529 = vmatprep.mubr.msk.bf16.mxu1 %vm422_vm0, %v1576_v7  ;;  %v1590_v21 = vld [vmem:[%s1653_s22 + $0xc8] sm:$0xff]   ;;  %v1592_v23 = vld [vmem:[%s1653_s22 + $0xd0] sm:$0xff]   ;;  %v1594_v25 = vld [vmem:[%s1653_s22 + $0xd8] sm:$0xff]  }
  0x16   : > { %v1595_v26 = vld [vmem:[%s1653_s22 + $0x60] sm:$0xff]   ;;  %v1597_v28 = vld [vmem:[%s1653_s22 + $0x68] sm:$0xff]   ;;  %v1599_v30 = vld [vmem:[%s1653_s22 + $0x70] sm:$0xff]  }
  0x17   : > { %v1596_v27 = vld [vmem:[%s1653_s22 + $0xe0] sm:$0xff]   ;;  %v1598_v29 = vld [vmem:[%s1653_s22 + $0xe8] sm:$0xff]   ;;  %v1600_v31 = vld [vmem:[%s1653_s22 + $0xf0] sm:$0xff]  }
  0x18   : > { %v1601_v32 = vld [vmem:[%s1653_s22 + $0x78] sm:$0xff]  }
  0x19   : > { %v1602_v33 = vld [vmem:[%s1653_s22 + $0xf8] sm:$0xff]  }
  0x1c   : > { %1498 = vmatmul.mubr.msk.bf16.gmra.mxu0 %vm422_vm0, %v1577_v8  ;;  %1530 = vmatmul.mubr.msk.bf16.gmra.mxu1 %vm422_vm0, %v1578_v9 }
  0x1d   : > { %1501 = vmatprep.mubr.msk.bf16.mxu0 %vm422_vm0, %v1579_v10  ;;  %1533 = vmatprep.mubr.msk.bf16.mxu1 %vm422_vm0, %v1580_v11 }
  0x24   : > { %1502 = vmatmul.mubr.msk.bf16.gmra.mxu0 %vm422_vm0, %v1581_v12  ;;  %1534 = vmatmul.mubr.msk.bf16.gmra.mxu1 %vm422_vm0, %v1582_v13 }
  0x25   : > { %1505 = vmatprep.mubr.msk.bf16.mxu0 %vm422_vm0, %v1583_v14  ;;  %1537 = vmatprep.mubr.msk.bf16.mxu1 %vm422_vm0, %v1584_v15 }
  0x2c   : > { %1506 = vmatmul.mubr.msk.bf16.gmra.mxu0 %vm422_vm0, %v1585_v16  ;;  %1538 = vmatmul.mubr.msk.bf16.gmra.mxu1 %vm422_vm0, %v1586_v17 }
  0x2d   : > { %1509 = vmatprep.mubr.msk.bf16.mxu0 %vm422_vm0, %v1587_v18  ;;  %1541 = vmatprep.mubr.msk.bf16.mxu1 %vm422_vm0, %v1588_v19 }
  0x34   : > { %1510 = vmatmul.mubr.msk.bf16.gmra.mxu0 %vm422_vm0, %v1589_v20  ;;  %1542 = vmatmul.mubr.msk.bf16.gmra.mxu1 %vm422_vm0, %v1590_v21 }
  0x35   : > { %1513 = vmatprep.mubr.msk.bf16.mxu0 %vm422_vm0, %v1591_v22  ;;  %1545 = vmatprep.mubr.msk.bf16.mxu1 %vm422_vm0, %v1592_v23 }
  0x3c   : > { %1514 = vmatmul.mubr.msk.bf16.gmra.mxu0 %vm422_vm0, %v1593_v24  ;;  %1546 = vmatmul.mubr.msk.bf16.gmra.mxu1 %vm422_vm0, %v1594_v25 }
  0x3d   : > { %1517 = vmatprep.mubr.msk.bf16.mxu0 %vm422_vm0, %v1595_v26  ;;  %1549 = vmatprep.mubr.msk.bf16.mxu1 %vm422_vm0, %v1596_v27 }
  0x44   : > { %1518 = vmatmul.mubr.msk.bf16.gmra.mxu0 %vm422_vm0, %v1597_v28  ;;  %1550 = vmatmul.mubr.msk.bf16.gmra.mxu1 %vm422_vm0, %v1598_v29 }
  0x45   : > { %1521 = vmatprep.mubr.msk.bf16.mxu0 %vm422_vm0, %v1599_v30  ;;  %1553 = vmatprep.mubr.msk.bf16.mxu1 %vm422_vm0, %v1600_v31 }
  0x4c   : > { %1522 = vmatmul.mubr.msk.bf16.gmra.mxu0 %vm422_vm0, %v1601_v32  ;;  %1554 = vmatmul.mubr.msk.bf16.gmra.mxu1 %vm422_vm0, %v1602_v33 }
  0xd4   : > { %v1495_v35 = vpop.f32.mrf.mxu0  ;;  %v1527_v37 = vpop.f32.mrf.mxu1 }
  0xd5   : > { %v562_v36 = vadd.f32 %v1495_v35, %v1722_v34  ;;  %v690_v38 = vadd.f32 %v1527_v37, %v1722_v34 }
  0xd6   : > { %v553_v39 = vpop.f32.mrf.mxu0  ;;  %v681_v42 = vpop.f32.mrf.mxu1 }
  0xd7   : > { %v810_v40 = vmax.f32 %v562_v36, 0.0  ;;  %v554_v41 = vadd.f32 %v1722_v34, %v553_v39  ;;  %v842_v43 = vmax.f32 %v690_v38, 0.0  ;;  %v682_v44 = vadd.f32 %v1722_v34, %v681_v42 }
  0xd8   : > { %v1496_v45 = vpop.f32.mrf.mxu0  ;;  %v1528_v49 = vpop.f32.mrf.mxu1 }
  0xd9   : > { %v1393_v46 = vpack.c.bf16 %v810_v40, %v810_v40  ;;  %v808_v47 = vmax.f32 %v554_v41, 0.0  ;;  %v565_v48 = vadd.f32 %v1496_v45, %v1722_v34  ;;  %v1425_v50 = vpack.c.bf16 %v842_v43, %v842_v43 }
  0xda   : > { %v840_v51 = vmax.f32 %v682_v44, 0.0  ;;  %v693_v52 = vadd.f32 %v1528_v49, %v1722_v34  ;;  %v556_v53 = vpop.f32.mrf.mxu0  ;;  %v684_v57 = vpop.f32.mrf.mxu1 }
  0xdb   : > { %1131 = vst.msk [vmem:[%s1732_s27 + $0x8] sm:$0xf] %vm1128_vm1, %v1393_v46  ;;  %v1391_v54 = vpack.c.bf16 %v808_v47, %v808_v47  ;;  %v811_v55 = vmax.f32 %v565_v48, 0.0  ;;  %v557_v56 = vadd.f32 %v1722_v34, %v556_v53  ;;  %1163 = vst.msk [vmem:[%s1732_s27 + $0x88] sm:$0xf] %vm1128_vm1, %v1425_v50  ;;  %v685_v60 = vadd.f32 %v1722_v34, %v684_v57 }
  0xdc   : > { %v1423_v58 = vpack.c.bf16 %v840_v51, %v840_v51  ;;  %v843_v59 = vmax.f32 %v693_v52, 0.0  ;;  %v1499_v61 = vpop.f32.mrf.mxu0  ;;  %v1531_v1 = vpop.f32.mrf.mxu1 }
  0xdd   : > { %1129 = vst.msk [vmem:[%s1732_s27] sm:$0xf] %vm1128_vm1, %v1391_v54  ;;  %v1394_v62 = vpack.c.bf16 %v811_v55, %v811_v55  ;;  %v809_v63 = vmax.f32 %v557_v56, 0.0  ;;  %v578_v0 = vadd.f32 %v1499_v61, %v1722_v34  ;;  %v841_v3 = vmax.f32 %v685_v60, 0.0 }
  0xde   : > { %1161 = vst.msk [vmem:[%s1732_s27 + $0x80] sm:$0xf] %vm1128_vm1, %v1423_v58  ;;  %v1426_v2 = vpack.c.bf16 %v843_v59, %v843_v59  ;;  %v706_v4 = vadd.f32 %v1531_v1, %v1722_v34  ;;  %v569_v5 = vpop.f32.mrf.mxu0  ;;  %v697_v9 = vpop.f32.mrf.mxu1 }
  0xdf   : > { %1132 = vst.msk [vmem:[%s1732_s27 + $0xc] sm:$0xf] %vm1128_vm1, %v1394_v62  ;;  %v1392_v6 = vpack.c.bf16 %v809_v63, %v809_v63  ;;  %v814_v7 = vmax.f32 %v578_v0, 0.0  ;;  %v570_v8 = vadd.f32 %v1722_v34, %v569_v5  ;;  %v1424_v10 = vpack.c.bf16 %v841_v3, %v841_v3 }
  0xe0   : > { %1164 = vst.msk [vmem:[%s1732_s27 + $0x8c] sm:$0xf] %vm1128_vm1, %v1426_v2  ;;  %v846_v11 = vmax.f32 %v706_v4, 0.0  ;;  %v698_v12 = vadd.f32 %v1722_v34, %v697_v9  ;;  %v1500_v13 = vpop.f32.mrf.mxu0  ;;  %v1532_v17 = vpop.f32.mrf.mxu1 }
  0xe1   : > { %1130 = vst.msk [vmem:[%s1732_s27 + $0x4] sm:$0xf] %vm1128_vm1, %v1392_v6  ;;  %v1397_v14 = vpack.c.bf16 %v814_v7, %v814_v7  ;;  %v812_v15 = vmax.f32 %v570_v8, 0.0  ;;  %v581_v16 = vadd.f32 %v1500_v13, %v1722_v34  ;;  %1162 = vst.msk [vmem:[%s1732_s27 + $0x84] sm:$0xf] %vm1128_vm1, %v1424_v10  ;;  %v709_v20 = vadd.f32 %v1532_v17, %v1722_v34 }
  0xe2   : > { %v1429_v18 = vpack.c.bf16 %v846_v11, %v846_v11  ;;  %v844_v19 = vmax.f32 %v698_v12, 0.0  ;;  %v572_v21 = vpop.f32.mrf.mxu0  ;;  %v700_v25 = vpop.f32.mrf.mxu1 }
  0xe3   : > { %1135 = vst.msk [vmem:[%s1732_s27 + $0x18] sm:$0xf] %vm1128_vm1, %v1397_v14  ;;  %v1395_v22 = vpack.c.bf16 %v812_v15, %v812_v15  ;;  %v815_v23 = vmax.f32 %v581_v16, 0.0  ;;  %v573_v24 = vadd.f32 %v1722_v34, %v572_v21  ;;  %v847_v27 = vmax.f32 %v709_v20, 0.0 }
  0xe4   : > { %1167 = vst.msk [vmem:[%s1732_s27 + $0x98] sm:$0xf] %vm1128_vm1, %v1429_v18  ;;  %v1427_v26 = vpack.c.bf16 %v844_v19, %v844_v19  ;;  %v701_v28 = vadd.f32 %v1722_v34, %v700_v25  ;;  %v1503_v29 = vpop.f32.mrf.mxu0  ;;  %v1535_v33 = vpop.f32.mrf.mxu1 }
  0xe5   : > { %1133 = vst.msk [vmem:[%s1732_s27 + $0x10] sm:$0xf] %vm1128_vm1, %v1395_v22  ;;  %v1398_v30 = vpack.c.bf16 %v815_v23, %v815_v23  ;;  %v813_v31 = vmax.f32 %v573_v24, 0.0  ;;  %v594_v32 = vadd.f32 %v1503_v29, %v1722_v34  ;;  %v1430_v35 = vpack.c.bf16 %v847_v27, %v847_v27 }
  0xe6   : > { %1165 = vst.msk [vmem:[%s1732_s27 + $0x90] sm:$0xf] %vm1128_vm1, %v1427_v26  ;;  %v845_v36 = vmax.f32 %v701_v28, 0.0  ;;  %v722_v37 = vadd.f32 %v1535_v33, %v1722_v34  ;;  %v585_v38 = vpop.f32.mrf.mxu0  ;;  %v713_v42 = vpop.f32.mrf.mxu1 }
  0xe7   : > { %1136 = vst.msk [vmem:[%s1732_s27 + $0x1c] sm:$0xf] %vm1128_vm1, %v1398_v30  ;;  %v1396_v39 = vpack.c.bf16 %v813_v31, %v813_v31  ;;  %v818_v40 = vmax.f32 %v594_v32, 0.0  ;;  %v586_v41 = vadd.f32 %v1722_v34, %v585_v38  ;;  %1168 = vst.msk [vmem:[%s1732_s27 + $0x9c] sm:$0xf] %vm1128_vm1, %v1430_v35  ;;  %v714_v45 = vadd.f32 %v1722_v34, %v713_v42 }
  0xe8   : > { %v1428_v43 = vpack.c.bf16 %v845_v36, %v845_v36  ;;  %v850_v44 = vmax.f32 %v722_v37, 0.0  ;;  %v1504_v46 = vpop.f32.mrf.mxu0  ;;  %v1536_v50 = vpop.f32.mrf.mxu1 }
  0xe9   : > { %1134 = vst.msk [vmem:[%s1732_s27 + $0x14] sm:$0xf] %vm1128_vm1, %v1396_v39  ;;  %v1401_v47 = vpack.c.bf16 %v818_v40, %v818_v40  ;;  %v816_v48 = vmax.f32 %v586_v41, 0.0  ;;  %v597_v49 = vadd.f32 %v1504_v46, %v1722_v34  ;;  %v848_v52 = vmax.f32 %v714_v45, 0.0 }
  0xea   : > { %1166 = vst.msk [vmem:[%s1732_s27 + $0x94] sm:$0xf] %vm1128_vm1, %v1428_v43  ;;  %v1433_v51 = vpack.c.bf16 %v850_v44, %v850_v44  ;;  %v725_v53 = vadd.f32 %v1536_v50, %v1722_v34  ;;  %v588_v54 = vpop.f32.mrf.mxu0  ;;  %v716_v58 = vpop.f32.mrf.mxu1 }
  0xeb   : > { %1139 = vst.msk [vmem:[%s1732_s27 + $0x28] sm:$0xf] %vm1128_vm1, %v1401_v47  ;;  %v1399_v55 = vpack.c.bf16 %v816_v48, %v816_v48  ;;  %v819_v56 = vmax.f32 %v597_v49, 0.0  ;;  %v589_v57 = vadd.f32 %v1722_v34, %v588_v54  ;;  %v1431_v59 = vpack.c.bf16 %v848_v52, %v848_v52 }
  0xec   : > { %1171 = vst.msk [vmem:[%s1732_s27 + $0xa8] sm:$0xf] %vm1128_vm1, %v1433_v51  ;;  %v851_v60 = vmax.f32 %v725_v53, 0.0  ;;  %v717_v61 = vadd.f32 %v1722_v34, %v716_v58  ;;  %v1507_v62 = vpop.f32.mrf.mxu0  ;;  %v1539_v2 = vpop.f32.mrf.mxu1 }
  0xed   : > { %1137 = vst.msk [vmem:[%s1732_s27 + $0x20] sm:$0xf] %vm1128_vm1, %v1399_v55  ;;  %v1402_v63 = vpack.c.bf16 %v819_v56, %v819_v56  ;;  %v817_v0 = vmax.f32 %v589_v57, 0.0  ;;  %v610_v1 = vadd.f32 %v1507_v62, %v1722_v34  ;;  %1169 = vst.msk [vmem:[%s1732_s27 + $0xa0] sm:$0xf] %vm1128_vm1, %v1431_v59  ;;  %v738_v5 = vadd.f32 %v1539_v2, %v1722_v34 }
  0xee   : > { %v1434_v3 = vpack.c.bf16 %v851_v60, %v851_v60  ;;  %v849_v4 = vmax.f32 %v717_v61, 0.0  ;;  %v601_v6 = vpop.f32.mrf.mxu0  ;;  %v729_v10 = vpop.f32.mrf.mxu1 }
  0xef   : > { %1140 = vst.msk [vmem:[%s1732_s27 + $0x2c] sm:$0xf] %vm1128_vm1, %v1402_v63  ;;  %v1400_v7 = vpack.c.bf16 %v817_v0, %v817_v0  ;;  %v822_v8 = vmax.f32 %v610_v1, 0.0  ;;  %v602_v9 = vadd.f32 %v1722_v34, %v601_v6  ;;  %v854_v12 = vmax.f32 %v738_v5, 0.0 }
  0xf0   : > { %1172 = vst.msk [vmem:[%s1732_s27 + $0xac] sm:$0xf] %vm1128_vm1, %v1434_v3  ;;  %v1432_v11 = vpack.c.bf16 %v849_v4, %v849_v4  ;;  %v730_v13 = vadd.f32 %v1722_v34, %v729_v10  ;;  %v1508_v14 = vpop.f32.mrf.mxu0  ;;  %v1540_v18 = vpop.f32.mrf.mxu1 }
  0xf1   : > { %1138 = vst.msk [vmem:[%s1732_s27 + $0x24] sm:$0xf] %vm1128_vm1, %v1400_v7  ;;  %v1405_v15 = vpack.c.bf16 %v822_v8, %v822_v8  ;;  %v820_v16 = vmax.f32 %v602_v9, 0.0  ;;  %v613_v17 = vadd.f32 %v1508_v14, %v1722_v34  ;;  %v1437_v19 = vpack.c.bf16 %v854_v12, %v854_v12 }
  0xf2   : > { %1170 = vst.msk [vmem:[%s1732_s27 + $0xa4] sm:$0xf] %vm1128_vm1, %v1432_v11  ;;  %v852_v20 = vmax.f32 %v730_v13, 0.0  ;;  %v741_v21 = vadd.f32 %v1540_v18, %v1722_v34  ;;  %v604_v22 = vpop.f32.mrf.mxu0  ;;  %v732_v26 = vpop.f32.mrf.mxu1 }
  0xf3   : > { %1143 = vst.msk [vmem:[%s1732_s27 + $0x38] sm:$0xf] %vm1128_vm1, %v1405_v15  ;;  %v1403_v23 = vpack.c.bf16 %v820_v16, %v820_v16  ;;  %v823_v24 = vmax.f32 %v613_v17, 0.0  ;;  %v605_v25 = vadd.f32 %v1722_v34, %v604_v22  ;;  %1175 = vst.msk [vmem:[%s1732_s27 + $0xb8] sm:$0xf] %vm1128_vm1, %v1437_v19  ;;  %v733_v29 = vadd.f32 %v1722_v34, %v732_v26 }
  0xf4   : > { %v1435_v27 = vpack.c.bf16 %v852_v20, %v852_v20  ;;  %v855_v28 = vmax.f32 %v741_v21, 0.0  ;;  %v1511_v30 = vpop.f32.mrf.mxu0  ;;  %v1543_v35 = vpop.f32.mrf.mxu1 }
  0xf5   : > { %1141 = vst.msk [vmem:[%s1732_s27 + $0x30] sm:$0xf] %vm1128_vm1, %v1403_v23  ;;  %v1406_v31 = vpack.c.bf16 %v823_v24, %v823_v24  ;;  %v821_v32 = vmax.f32 %v605_v25, 0.0  ;;  %v626_v33 = vadd.f32 %v1511_v30, %v1722_v34  ;;  %v853_v37 = vmax.f32 %v733_v29, 0.0 }
  0xf6   : > { %1173 = vst.msk [vmem:[%s1732_s27 + $0xb0] sm:$0xf] %vm1128_vm1, %v1435_v27  ;;  %v1438_v36 = vpack.c.bf16 %v855_v28, %v855_v28  ;;  %v754_v38 = vadd.f32 %v1543_v35, %v1722_v34  ;;  %v617_v39 = vpop.f32.mrf.mxu0  ;;  %v745_v43 = vpop.f32.mrf.mxu1 }
  0xf7   : > { %1144 = vst.msk [vmem:[%s1732_s27 + $0x3c] sm:$0xf] %vm1128_vm1, %v1406_v31  ;;  %v1404_v40 = vpack.c.bf16 %v821_v32, %v821_v32  ;;  %v826_v41 = vmax.f32 %v626_v33, 0.0  ;;  %v618_v42 = vadd.f32 %v1722_v34, %v617_v39  ;;  %v1436_v44 = vpack.c.bf16 %v853_v37, %v853_v37 }
  0xf8   : > { %1176 = vst.msk [vmem:[%s1732_s27 + $0xbc] sm:$0xf] %vm1128_vm1, %v1438_v36  ;;  %v858_v45 = vmax.f32 %v754_v38, 0.0  ;;  %v746_v46 = vadd.f32 %v1722_v34, %v745_v43  ;;  %v1512_v47 = vpop.f32.mrf.mxu0  ;;  %v1544_v51 = vpop.f32.mrf.mxu1 }
  0xf9   : > { %1142 = vst.msk [vmem:[%s1732_s27 + $0x34] sm:$0xf] %vm1128_vm1, %v1404_v40  ;;  %v1409_v48 = vpack.c.bf16 %v826_v41, %v826_v41  ;;  %v824_v49 = vmax.f32 %v618_v42, 0.0  ;;  %v629_v50 = vadd.f32 %v1512_v47, %v1722_v34  ;;  %1174 = vst.msk [vmem:[%s1732_s27 + $0xb4] sm:$0xf] %vm1128_vm1, %v1436_v44  ;;  %v757_v54 = vadd.f32 %v1544_v51, %v1722_v34 }
  0xfa   : > { %v1441_v52 = vpack.c.bf16 %v858_v45, %v858_v45  ;;  %v856_v53 = vmax.f32 %v746_v46, 0.0  ;;  %v620_v55 = vpop.f32.mrf.mxu0  ;;  %v748_v59 = vpop.f32.mrf.mxu1 }
  0xfb   : > { %1147 = vst.msk [vmem:[%s1732_s27 + $0x48] sm:$0xf] %vm1128_vm1, %v1409_v48  ;;  %v1407_v56 = vpack.c.bf16 %v824_v49, %v824_v49  ;;  %v827_v57 = vmax.f32 %v629_v50, 0.0  ;;  %v621_v58 = vadd.f32 %v1722_v34, %v620_v55  ;;  %v859_v61 = vmax.f32 %v757_v54, 0.0 }
  0xfc   : > { %1179 = vst.msk [vmem:[%s1732_s27 + $0xc8] sm:$0xf] %vm1128_vm1, %v1441_v52  ;;  %v1439_v60 = vpack.c.bf16 %v856_v53, %v856_v53  ;;  %v749_v62 = vadd.f32 %v1722_v34, %v748_v59  ;;  %v1515_v63 = vpop.f32.mrf.mxu0  ;;  %v1547_v3 = vpop.f32.mrf.mxu1 }
  0xfd   : > { %1145 = vst.msk [vmem:[%s1732_s27 + $0x40] sm:$0xf] %vm1128_vm1, %v1407_v56  ;;  %v1410_v0 = vpack.c.bf16 %v827_v57, %v827_v57  ;;  %v825_v1 = vmax.f32 %v621_v58, 0.0  ;;  %v642_v2 = vadd.f32 %v1515_v63, %v1722_v34  ;;  %v1442_v4 = vpack.c.bf16 %v859_v61, %v859_v61 }
  0xfe   : > { %1177 = vst.msk [vmem:[%s1732_s27 + $0xc0] sm:$0xf] %vm1128_vm1, %v1439_v60  ;;  %v857_v5 = vmax.f32 %v749_v62, 0.0  ;;  %v770_v6 = vadd.f32 %v1547_v3, %v1722_v34  ;;  %v633_v7 = vpop.f32.mrf.mxu0  ;;  %v761_v11 = vpop.f32.mrf.mxu1 }
  0xff   : > { %1148 = vst.msk [vmem:[%s1732_s27 + $0x4c] sm:$0xf] %vm1128_vm1, %v1410_v0  ;;  %v1408_v8 = vpack.c.bf16 %v825_v1, %v825_v1  ;;  %v830_v9 = vmax.f32 %v642_v2, 0.0  ;;  %v634_v10 = vadd.f32 %v1722_v34, %v633_v7  ;;  %1180 = vst.msk [vmem:[%s1732_s27 + $0xcc] sm:$0xf] %vm1128_vm1, %v1442_v4  ;;  %v762_v14 = vadd.f32 %v1722_v34, %v761_v11 }
 0x100   : > { %v1440_v12 = vpack.c.bf16 %v857_v5, %v857_v5  ;;  %v862_v13 = vmax.f32 %v770_v6, 0.0  ;;  %v1516_v15 = vpop.f32.mrf.mxu0  ;;  %v1548_v19 = vpop.f32.mrf.mxu1 }
 0x101   : > { %1146 = vst.msk [vmem:[%s1732_s27 + $0x44] sm:$0xf] %vm1128_vm1, %v1408_v8  ;;  %v1413_v16 = vpack.c.bf16 %v830_v9, %v830_v9  ;;  %v828_v17 = vmax.f32 %v634_v10, 0.0  ;;  %v645_v18 = vadd.f32 %v1516_v15, %v1722_v34  ;;  %v860_v21 = vmax.f32 %v762_v14, 0.0 }
 0x102   : > { %1178 = vst.msk [vmem:[%s1732_s27 + $0xc4] sm:$0xf] %vm1128_vm1, %v1440_v12  ;;  %v1445_v20 = vpack.c.bf16 %v862_v13, %v862_v13  ;;  %v773_v22 = vadd.f32 %v1548_v19, %v1722_v34  ;;  %v636_v23 = vpop.f32.mrf.mxu0  ;;  %v764_v27 = vpop.f32.mrf.mxu1 }
 0x103   : > { %1151 = vst.msk [vmem:[%s1732_s27 + $0x58] sm:$0xf] %vm1128_vm1, %v1413_v16  ;;  %v1411_v24 = vpack.c.bf16 %v828_v17, %v828_v17  ;;  %v831_v25 = vmax.f32 %v645_v18, 0.0  ;;  %v637_v26 = vadd.f32 %v1722_v34, %v636_v23  ;;  %v1443_v28 = vpack.c.bf16 %v860_v21, %v860_v21 }
 0x104   : > { %1183 = vst.msk [vmem:[%s1732_s27 + $0xd8] sm:$0xf] %vm1128_vm1, %v1445_v20  ;;  %v863_v29 = vmax.f32 %v773_v22, 0.0  ;;  %v765_v30 = vadd.f32 %v1722_v34, %v764_v27  ;;  %v1519_v31 = vpop.f32.mrf.mxu0  ;;  %v1551_v36 = vpop.f32.mrf.mxu1 }
 0x105   : > { %1149 = vst.msk [vmem:[%s1732_s27 + $0x50] sm:$0xf] %vm1128_vm1, %v1411_v24  ;;  %v1414_v32 = vpack.c.bf16 %v831_v25, %v831_v25  ;;  %v829_v33 = vmax.f32 %v637_v26, 0.0  ;;  %v658_v35 = vadd.f32 %v1519_v31, %v1722_v34  ;;  %1181 = vst.msk [vmem:[%s1732_s27 + $0xd0] sm:$0xf] %vm1128_vm1, %v1443_v28  ;;  %v786_v39 = vadd.f32 %v1551_v36, %v1722_v34 }
 0x106   : > { %v1446_v37 = vpack.c.bf16 %v863_v29, %v863_v29  ;;  %v861_v38 = vmax.f32 %v765_v30, 0.0  ;;  %v649_v40 = vpop.f32.mrf.mxu0  ;;  %v777_v44 = vpop.f32.mrf.mxu1 }
 0x107   : > { %1152 = vst.msk [vmem:[%s1732_s27 + $0x5c] sm:$0xf] %vm1128_vm1, %v1414_v32  ;;  %v1412_v41 = vpack.c.bf16 %v829_v33, %v829_v33  ;;  %v834_v42 = vmax.f32 %v658_v35, 0.0  ;;  %v650_v43 = vadd.f32 %v1722_v34, %v649_v40  ;;  %v866_v46 = vmax.f32 %v786_v39, 0.0 }
 0x108   : > { %1184 = vst.msk [vmem:[%s1732_s27 + $0xdc] sm:$0xf] %vm1128_vm1, %v1446_v37  ;;  %v1444_v45 = vpack.c.bf16 %v861_v38, %v861_v38  ;;  %v778_v47 = vadd.f32 %v1722_v34, %v777_v44  ;;  %v1520_v48 = vpop.f32.mrf.mxu0  ;;  %v1552_v52 = vpop.f32.mrf.mxu1 }
 0x109   : > { %1150 = vst.msk [vmem:[%s1732_s27 + $0x54] sm:$0xf] %vm1128_vm1, %v1412_v41  ;;  %v1417_v49 = vpack.c.bf16 %v834_v42, %v834_v42  ;;  %v832_v50 = vmax.f32 %v650_v43, 0.0  ;;  %v661_v51 = vadd.f32 %v1520_v48, %v1722_v34  ;;  %v1449_v53 = vpack.c.bf16 %v866_v46, %v866_v46 }
 0x10a   : > { %1182 = vst.msk [vmem:[%s1732_s27 + $0xd4] sm:$0xf] %vm1128_vm1, %v1444_v45  ;;  %v864_v54 = vmax.f32 %v778_v47, 0.0  ;;  %v789_v55 = vadd.f32 %v1552_v52, %v1722_v34  ;;  %v652_v56 = vpop.f32.mrf.mxu0  ;;  %v780_v60 = vpop.f32.mrf.mxu1 }
 0x10b   : > { %1155 = vst.msk [vmem:[%s1732_s27 + $0x68] sm:$0xf] %vm1128_vm1, %v1417_v49  ;;  %v1415_v57 = vpack.c.bf16 %v832_v50, %v832_v50  ;;  %v835_v58 = vmax.f32 %v661_v51, 0.0  ;;  %v653_v59 = vadd.f32 %v1722_v34, %v652_v56  ;;  %1187 = vst.msk [vmem:[%s1732_s27 + $0xe8] sm:$0xf] %vm1128_vm1, %v1449_v53  ;;  %v781_v63 = vadd.f32 %v1722_v34, %v780_v60 }
 0x10c   : > { %v1447_v61 = vpack.c.bf16 %v864_v54, %v864_v54  ;;  %v867_v62 = vmax.f32 %v789_v55, 0.0  ;;  %v1523_v0 = vpop.f32.mrf.mxu0  ;;  %v1555_v4 = vpop.f32.mrf.mxu1 }
 0x10d   : > { %1153 = vst.msk [vmem:[%s1732_s27 + $0x60] sm:$0xf] %vm1128_vm1, %v1415_v57  ;;  %v1418_v1 = vpack.c.bf16 %v835_v58, %v835_v58  ;;  %v833_v2 = vmax.f32 %v653_v59, 0.0  ;;  %v674_v3 = vadd.f32 %v1523_v0, %v1722_v34  ;;  %v865_v6 = vmax.f32 %v781_v63, 0.0 }
 0x10e   : > { %1185 = vst.msk [vmem:[%s1732_s27 + $0xe0] sm:$0xf] %vm1128_vm1, %v1447_v61  ;;  %v1450_v5 = vpack.c.bf16 %v867_v62, %v867_v62  ;;  %v802_v7 = vadd.f32 %v1555_v4, %v1722_v34  ;;  %v665_v8 = vpop.f32.mrf.mxu0  ;;  %v793_v12 = vpop.f32.mrf.mxu1 }
 0x10f   : > { %1156 = vst.msk [vmem:[%s1732_s27 + $0x6c] sm:$0xf] %vm1128_vm1, %v1418_v1  ;;  %v1416_v9 = vpack.c.bf16 %v833_v2, %v833_v2  ;;  %v838_v10 = vmax.f32 %v674_v3, 0.0  ;;  %v666_v11 = vadd.f32 %v1722_v34, %v665_v8  ;;  %v1448_v13 = vpack.c.bf16 %v865_v6, %v865_v6 }
 0x110   : > { %1188 = vst.msk [vmem:[%s1732_s27 + $0xec] sm:$0xf] %vm1128_vm1, %v1450_v5  ;;  %v870_v14 = vmax.f32 %v802_v7, 0.0  ;;  %v794_v15 = vadd.f32 %v1722_v34, %v793_v12  ;;  %v1524_v16 = vpop.f32.mrf.mxu0  ;;  %v1556_v20 = vpop.f32.mrf.mxu1 }
 0x111   : > { %1154 = vst.msk [vmem:[%s1732_s27 + $0x64] sm:$0xf] %vm1128_vm1, %v1416_v9  ;;  %v1421_v17 = vpack.c.bf16 %v838_v10, %v838_v10  ;;  %v836_v18 = vmax.f32 %v666_v11, 0.0  ;;  %v677_v19 = vadd.f32 %v1524_v16, %v1722_v34  ;;  %1186 = vst.msk [vmem:[%s1732_s27 + $0xe4] sm:$0xf] %vm1128_vm1, %v1448_v13  ;;  %v805_v23 = vadd.f32 %v1556_v20, %v1722_v34 }
 0x112   : > { %v1453_v21 = vpack.c.bf16 %v870_v14, %v870_v14  ;;  %v868_v22 = vmax.f32 %v794_v15, 0.0  ;;  %v668_v24 = vpop.f32.mrf.mxu0  ;;  %v796_v28 = vpop.f32.mrf.mxu1 }
 0x113   : > { %1159 = vst.msk [vmem:[%s1732_s27 + $0x78] sm:$0xf] %vm1128_vm1, %v1421_v17  ;;  %v1419_v25 = vpack.c.bf16 %v836_v18, %v836_v18  ;;  %v839_v26 = vmax.f32 %v677_v19, 0.0  ;;  %v669_v27 = vadd.f32 %v1722_v34, %v668_v24  ;;  %v871_v30 = vmax.f32 %v805_v23, 0.0 }
 0x114   : > { %1191 = vst.msk [vmem:[%s1732_s27 + $0xf8] sm:$0xf] %vm1128_vm1, %v1453_v21  ;;  %v1451_v29 = vpack.c.bf16 %v868_v22, %v868_v22  ;;  %v797_v31 = vadd.f32 %v1722_v34, %v796_v28 }
 0x115   : > { %1157 = vst.msk [vmem:[%s1732_s27 + $0x70] sm:$0xf] %vm1128_vm1, %v1419_v25  ;;  %v1422_v32 = vpack.c.bf16 %v839_v26, %v839_v26  ;;  %v837_v33 = vmax.f32 %v669_v27, 0.0  ;;  %v1454_v35 = vpack.c.bf16 %v871_v30, %v871_v30 }
 0x116   : > { %1189 = vst.msk [vmem:[%s1732_s27 + $0xf0] sm:$0xf] %vm1128_vm1, %v1451_v29  ;;  %v869_v36 = vmax.f32 %v797_v31, 0.0 }
 0x117   : > { %1160 = vst.msk [vmem:[%s1732_s27 + $0x7c] sm:$0xf] %vm1128_vm1, %v1422_v32  ;;  %v1420_v37 = vpack.c.bf16 %v837_v33, %v837_v33  ;;  %1192 = vst.msk [vmem:[%s1732_s27 + $0xfc] sm:$0xf] %vm1128_vm1, %v1454_v35 }
 0x118   : > { %v1452_v38 = vpack.c.bf16 %v869_v36, %v869_v36 }
 0x119   : > { %1158 = vst.msk [vmem:[%s1732_s27 + $0x74] sm:$0xf] %vm1128_vm1, %v1420_v37 }
 0x11a   : > { %1190 = vst.msk [vmem:[%s1732_s27 + $0xf4] sm:$0xf] %vm1128_vm1, %v1452_v38 }
 0x11b PF: > { %s13_s12 = sadd.s32 1, %s1609_s12  }
 0x11c   : > { %p10_p4 = scmp.ge.s32.totalorder %s13_s12, 5  }
 0x11e   :  { %12 = sbr.rel (!%p10_p4) target bundleno = 1 (0x1), region = 62 }

// kernel: net1_forward.4
= control target key start
LH: loop header
LB: loop body
LE: loop exit
PB: predicated region body
PF: predicated region fallthrough
CT: control target
= control target key end

     0   :  { %vm766_vm0 = vcmask 261120   ;;  %vm1259_vm1 = vcmask 519168   ;;  %s2394_s1 = inlined_call_operand.vmem [shape: bf16[800,64], index: 1, kind: input, shape index: {}]   ;;  %s2395_s0 = inlined_call_operand.vmem [shape: bf16[128,800], index: 0, kind: input, shape index: {}]   ;;  %s2396_s2 = inlined_call_operand.vmem [shape: f32[1,64], index: 2, kind: input, shape index: {}]   ;;  %s2397_s3 = inlined_call_operand.vmem [shape: bf16[128,64], index: 3, kind: output, shape index: {}]  }
   0x1   :  { %v1665_v0 = vld [vmem:[%s2394_s1 + $0x78] sm:$0xff]   ;;  %v1669_v4 = vld [vmem:[%s2394_s1 + $0x70] sm:$0xff]   ;;  %v1673_v8 = vld [vmem:[%s2394_s1 + $0x68] sm:$0xff]  }
   0x2   :  { %v1666_v1 = vld [vmem:[%s2394_s1 + $0xf8] sm:$0xff]   ;;  %1427 = vmatprep.subr.bf16.mxu0 %v1665_v0  ;;  %v1670_v5 = vld [vmem:[%s2394_s1 + $0xf0] sm:$0xff]   ;;  %v1674_v9 = vld [vmem:[%s2394_s1 + $0xe8] sm:$0xff]  }
   0x3   :  { %v1667_v2 = vld [vmem:[%s2394_s1 + $0x38] sm:$0xff]   ;;  %1491 = vmatprep.subr.bf16.mxu1 %v1666_v1  ;;  %v1671_v6 = vld [vmem:[%s2394_s1 + $0x30] sm:$0xff]   ;;  %v1675_v10 = vld [vmem:[%s2394_s1 + $0x28] sm:$0xff]  }
   0x4   :  { %v1668_v3 = vld [vmem:[%s2394_s1 + $0xb8] sm:$0xff]   ;;  %1428 = vmatpush3.bf16.msra.mxu0 %v1667_v2  ;;  %v1672_v7 = vld [vmem:[%s2394_s1 + $0xb0] sm:$0xff]   ;;  %v1676_v11 = vld [vmem:[%s2394_s1 + $0xa8] sm:$0xff]  }
   0x5   :  { %1492 = vmatpush3.bf16.msra.mxu1 %v1668_v3  ;;  %1429 = vmatprep.subr.bf16.mxu0 %v1669_v4  ;;  %v1677_v12 = vld [vmem:[%s2394_s1 + $0x60] sm:$0xff]   ;;  %v1681_v16 = vld [vmem:[%s2394_s1 + $0x58] sm:$0xff]   ;;  %v1685_v20 = vld [vmem:[%s2394_s1 + $0x50] sm:$0xff]  }
   0x6   :  { %1493 = vmatprep.subr.bf16.mxu1 %v1670_v5  ;;  %v1678_v13 = vld [vmem:[%s2394_s1 + $0xe0] sm:$0xff]   ;;  %v1682_v17 = vld [vmem:[%s2394_s1 + $0xd8] sm:$0xff]   ;;  %v1686_v21 = vld [vmem:[%s2394_s1 + $0xd0] sm:$0xff]  }
   0x7   :  { %v1679_v14 = vld [vmem:[%s2394_s1 + $0x20] sm:$0xff]   ;;  %v1683_v18 = vld [vmem:[%s2394_s1 + $0x18] sm:$0xff]   ;;  %v1687_v22 = vld [vmem:[%s2394_s1 + $0x10] sm:$0xff]  }
   0x8   :  { %1430 = vmatpush3.bf16.msra.mxu0 %v1671_v6  ;;  %v1680_v15 = vld [vmem:[%s2394_s1 + $0xa0] sm:$0xff]   ;;  %v1684_v19 = vld [vmem:[%s2394_s1 + $0x98] sm:$0xff]   ;;  %v1688_v23 = vld [vmem:[%s2394_s1 + $0x90] sm:$0xff]  }
   0x9   :  { %1494 = vmatpush3.bf16.msra.mxu1 %v1672_v7  ;;  %1431 = vmatprep.subr.bf16.mxu0 %v1673_v8  ;;  %v1689_v24 = vld [vmem:[%s2394_s1 + $0x48] sm:$0xff]   ;;  %v1693_v28 = vld [vmem:[%s2394_s1 + $0x40] sm:$0xff]   ;;  %v1703_v36 = vld [vmem:[%s2394_s1 + $0x178] sm:$0xff]  }
   0xa   :  { %1495 = vmatprep.subr.bf16.mxu1 %v1674_v9  ;;  %v1690_v25 = vld [vmem:[%s2394_s1 + $0xc8] sm:$0xff]   ;;  %v1694_v29 = vld [vmem:[%s2394_s1 + $0xc0] sm:$0xff]   ;;  %v1704_v37 = vld [vmem:[%s2394_s1 + $0x138] sm:$0xff]  }
   0xb   :  { %v1691_v26 = vld [vmem:[%s2394_s1 + $0x8] sm:$0xff]   ;;  %v1695_v30 = vld [vmem:[%s2394_s1] sm:$0xff]   ;;  %v1705_v38 = vld [vmem:[%s2395_s0 + $0x3c] ss:$28 sps:$4 sm:$0xff]  }
   0xc   :  { %1432 = vmatpush3.bf16.msra.mxu0 %v1675_v10  ;;  %v1692_v27 = vld [vmem:[%s2394_s1 + $0x88] sm:$0xff]   ;;  %v1696_v31 = vld [vmem:[%s2394_s1 + $0x80] sm:$0xff]   ;;  %v1709_v40 = vld [vmem:[%s2395_s0 + $0x38] ss:$28 sps:$4 sm:$0xff]  }
   0xd   :  { %1496 = vmatpush3.bf16.msra.mxu1 %v1676_v11  ;;  %1433 = vmatprep.subr.bf16.mxu0 %v1677_v12  ;;  %v1697_v32 = vld [vmem:[%s2395_s0] ss:$28 sps:$4 sm:$0xff]   ;;  %v1700_v34 = vld [vmem:[%s2395_s0 + $0x8] ss:$28 sps:$4 sm:$0xff]   ;;  %v1711_v42 = vld [vmem:[%s2394_s1 + $0x170] sm:$0xff]  }
   0xe   :  { %1497 = vmatprep.subr.bf16.mxu1 %v1678_v13  ;;  %v1699_v33 = vld [vmem:[%s2395_s0 + $0x4] ss:$28 sps:$4 sm:$0xff]   ;;  %v1702_v35 = vld [vmem:[%s2395_s0 + $0xc] ss:$28 sps:$4 sm:$0xff]   ;;  %v1712_v43 = vld [vmem:[%s2394_s1 + $0x130] sm:$0xff]  }
   0xf   :  { %823 = vmatprep.mubr.bf16.mxu0 %v1699_v33  ;;  %920 = vmatprep.mubr.bf16.mxu1 %v1702_v35  ;;  %v1707_v39 = vld [vmem:[%s2395_s0 + $0x44] ss:$28 sps:$4 sm:$0xff]   ;;  %v1713_v44 = vld [vmem:[%s2395_s0 + $0x74] ss:$28 sps:$4 sm:$0xff]   ;;  %v1715_v45 = vld [vmem:[%s2395_s0 + $0x7c] ss:$28 sps:$4 sm:$0xff]  }
  0x10   :  { %1434 = vmatpush3.bf16.msra.mxu0 %v1679_v14  ;;  %v1710_v41 = vld [vmem:[%s2395_s0 + $0x40] ss:$28 sps:$4 sm:$0xff]   ;;  %v1719_v46 = vld [vmem:[%s2394_s1 + $0x168] sm:$0xff]   ;;  %v1718_v49 = vld [vmem:[%s2395_s0 + $0x78] ss:$28 sps:$4 sm:$0xff]  }
  0x11   :  { %1498 = vmatpush3.bf16.msra.mxu1 %v1680_v15  ;;  %1435 = vmatprep.subr.bf16.mxu0 %v1681_v16  ;;  %v1720_v47 = vld [vmem:[%s2394_s1 + $0x128] sm:$0xff]   ;;  %v1723_v51 = vld [vmem:[%s2395_s0 + $0xb4] ss:$28 sps:$4 sm:$0xff]   ;;  %v1727_v52 = vld [vmem:[%s2394_s1 + $0x160] sm:$0xff]  }
  0x12   :  { %1499 = vmatprep.subr.bf16.mxu1 %v1682_v17  ;;  %v1717_v48 = vld [vmem:[%s2395_s0 + $0x70] ss:$28 sps:$4 sm:$0xff]   ;;  %v1728_v53 = vld [vmem:[%s2394_s1 + $0x120] sm:$0xff]   ;;  %v1735_v54 = vld [vmem:[%s2394_s1 + $0x158] sm:$0xff]  }
  0x13   :  { %v1721_v50 = vld [vmem:[%s2395_s0 + $0xac] ss:$28 sps:$4 sm:$0xff]   ;;  %v1736_v55 = vld [vmem:[%s2394_s1 + $0x118] sm:$0xff]   ;;  %v1729_v58 = vld [vmem:[%s2395_s0 + $0xe4] ss:$28 sps:$4 sm:$0xff]  }
  0x14   :  { %1436 = vmatpush3.bf16.msra.mxu0 %v1683_v18  ;;  %v1725_v56 = vld [vmem:[%s2395_s0 + $0xa8] ss:$28 sps:$4 sm:$0xff]   ;;  %v1726_v57 = vld [vmem:[%s2395_s0 + $0xb0] ss:$28 sps:$4 sm:$0xff]   ;;  %v1733_v62 = vld [vmem:[%s2395_s0 + $0xe0] ss:$28 sps:$4 sm:$0xff]  }
  0x15   :  { %1500 = vmatpush3.bf16.msra.mxu1 %v1684_v19  ;;  %1437 = vmatprep.subr.bf16.mxu0 %v1685_v20  ;;  %v1731_v59 = vld [vmem:[%s2395_s0 + $0xec] ss:$28 sps:$4 sm:$0xff]   ;;  %v1743_v60 = vld [vmem:[%s2394_s1 + $0x150] sm:$0xff]   ;;  %v1737_v2 = vld [vmem:[%s2395_s0 + $0x11c] ss:$28 sps:$4 sm:$0xff]  }
  0x16   :  { %1501 = vmatprep.subr.bf16.mxu1 %v1686_v21  ;;  %v1744_v61 = vld [vmem:[%s2394_s1 + $0x110] sm:$0xff]   ;;  %v1734_v63 = vld [vmem:[%s2395_s0 + $0xe8] ss:$28 sps:$4 sm:$0xff]   ;;  %v1742_v7 = vld [vmem:[%s2395_s0 + $0x120] ss:$28 sps:$4 sm:$0xff]  }
  0x17   :  { %v1751_v0 = vld [vmem:[%s2394_s1 + $0x148] sm:$0xff]   ;;  %v1739_v3 = vld [vmem:[%s2395_s0 + $0x124] ss:$28 sps:$4 sm:$0xff]   ;;  %v1741_v6 = vld [vmem:[%s2395_s0 + $0x118] ss:$28 sps:$4 sm:$0xff]  }
  0x18   :  { %1438 = vmatpush3.bf16.msra.mxu0 %v1687_v22  ;;  %v1752_v1 = vld [vmem:[%s2394_s1 + $0x108] sm:$0xff]   ;;  %v1759_v4 = vld [vmem:[%s2394_s1 + $0x140] sm:$0xff]   ;;  %v1745_v9 = vld [vmem:[%s2395_s0 + $0x154] ss:$28 sps:$4 sm:$0xff]  }
  0x19   :  { %1502 = vmatpush3.bf16.msra.mxu1 %v1688_v23  ;;  %1439 = vmatprep.subr.bf16.mxu0 %v1689_v24  ;;  %v1760_v5 = vld [vmem:[%s2394_s1 + $0x100] sm:$0xff]   ;;  %v1767_v8 = vld [vmem:[%s2394_s1 + $0x188] sm:$0xff]   ;;  %v1747_v10 = vld [vmem:[%s2395_s0 + $0x15c] ss:$28 sps:$4 sm:$0xff]  }
  0x1a   :  { %1503 = vmatprep.subr.bf16.mxu1 %v1690_v25  ;;  %v1749_v11 = vld [vmem:[%s2395_s0 + $0x150] ss:$28 sps:$4 sm:$0xff]   ;;  %v1750_v12 = vld [vmem:[%s2395_s0 + $0x158] ss:$28 sps:$4 sm:$0xff]   ;;  %v1757_v15 = vld [vmem:[%s2395_s0 + $0x188] ss:$28 sps:$4 sm:$0xff]  }
  0x1b   :  { %v1753_v13 = vld [vmem:[%s2395_s0 + $0x18c] ss:$28 sps:$4 sm:$0xff]   ;;  %v1755_v14 = vld [vmem:[%s2395_s0 + $0x194] ss:$28 sps:$4 sm:$0xff]   ;;  %v1766_v18 = vld [vmem:[%s2395_s0 + $0x164] ss:$28 sps:$4 sm:$0xff]  }
  0x1c   :  { %1440 = vmatpush3.bf16.msra.mxu0 %v1691_v26  ;;  %v1758_v16 = vld [vmem:[%s2395_s0 + $0x190] ss:$28 sps:$4 sm:$0xff]   ;;  %v1764_v20 = vld [vmem:[%s2395_s0 + $0x160] ss:$28 sps:$4 sm:$0xff]   ;;  %v1772_v24 = vld [vmem:[%s2395_s0 + $0x48] ss:$28 sps:$4 sm:$0xff]  }
  0x1d   :  { %1504 = vmatpush3.bf16.msra.mxu1 %v1692_v27  ;;  %1441 = vmatprep.subr.bf16.mxu0 %v1693_v28  ;;  %v1763_v17 = vld [vmem:[%s2395_s0 + $0x14] ss:$28 sps:$4 sm:$0xff]   ;;  %v1768_v21 = vld [vmem:[%s2395_s0 + $0x4c] ss:$28 sps:$4 sm:$0xff]   ;;  %v1770_v22 = vld [vmem:[%s2395_s0 + $0x19c] ss:$28 sps:$4 sm:$0xff]  }
  0x1e   :  { %1505 = vmatprep.subr.bf16.mxu1 %v1694_v29  ;;  %v1761_v19 = vld [vmem:[%s2395_s0 + $0x10] ss:$28 sps:$4 sm:$0xff]   ;;  %v1774_v23 = vld [vmem:[%s2394_s1 + $0x180] sm:$0xff]   ;;  %v1773_v25 = vld [vmem:[%s2395_s0 + $0x198] ss:$28 sps:$4 sm:$0xff]  }
  0x1f   :  { %v1775_v26 = vld [vmem:[%s2395_s0 + $0x84] ss:$28 sps:$4 sm:$0xff]   ;;  %v1777_v27 = vld [vmem:[%s2395_s0 + $0x18] ss:$28 sps:$4 sm:$0xff]   ;;  %v1779_v29 = vld [vmem:[%s2395_s0 + $0x50] ss:$28 sps:$4 sm:$0xff]  }
  0x20   :  { %1442 = vmatpush3.bf16.msra.mxu0 %v1695_v30  ;;  %v1778_v28 = vld [vmem:[%s2395_s0 + $0x80] ss:$28 sps:$4 sm:$0xff]   ;;  %v1787_v35 = vld [vmem:[%s2395_s0 + $0xf8] ss:$28 sps:$4 sm:$0xff]  }
  0x21   :  { %1506 = vmatpush3.bf16.msra.mxu1 %v1696_v31  ;;  %1555 = vmatprep.subr.bf16.mxu0 %v1703_v36  ;;  %v1780_v30 = vld [vmem:[%s2395_s0 + $0xbc] ss:$28 sps:$4 sm:$0xff]   ;;  %v1782_v31 = vld [vmem:[%s2395_s0 + $0x88] ss:$28 sps:$4 sm:$0xff]  }
  0x22   :  { %1649 = vmatprep.subr.bf16.mxu1 %v1703_v36  ;;  %v1784_v33 = vld [vmem:[%s2395_s0 + $0xc0] ss:$28 sps:$4 sm:$0xff]   ;;  %v1788_v36 = vld [vmem:[%s2395_s0 + $0xf0] ss:$28 sps:$4 sm:$0xff]  }
  0x23   :  { %824 = vmatmul.mubr.bf16.vlgmr.msra.gmra.mxu0 %v1697_v32  ;;  %v1783_v32 = vld [vmem:[%s2395_s0 + $0xb8] ss:$28 sps:$4 sm:$0xff]  }
  0x24   :  { %921 = vmatmul.mubr.bf16.vlgmr.msra.gmra.mxu1 %v1700_v34  ;;  %1556 = vmatpush3.bf16.msra.mxu0 %v1704_v37  ;;  %v1785_v34 = vld [vmem:[%s2395_s0 + $0xf4] ss:$28 sps:$4 sm:$0xff]  }
  0x25   :  { %1657 = vmatpush3.bf16.msra.mxu1 %v1704_v37  ;;  %831 = vmatprep.mubr.bf16.mxu0 %v1705_v38  ;;  %v1789_v37 = vld [vmem:[%s2395_s0 + $0x130] ss:$28 sps:$4 sm:$0xff]  }
  0x26   :  { %928 = vmatprep.mubr.bf16.mxu1 %v1707_v39  ;;  %1557 = vmatprep.subr.bf16.mxu0 %v1711_v42  ;;  %v1790_v38 = vld [vmem:[%s2395_s0 + $0x12c] ss:$28 sps:$4 sm:$0xff]  }
  0x27   :  { %1650 = vmatprep.subr.bf16.mxu1 %v1711_v42  ;;  %v1792_v39 = vld [vmem:[%s2395_s0 + $0x168] ss:$28 sps:$4 sm:$0xff]  }
  0x28   :  { %1558 = vmatpush3.bf16.msra.mxu0 %v1712_v43 }
  0x29   :  { %1658 = vmatpush3.bf16.msra.mxu1 %v1712_v43  ;;  %1559 = vmatprep.subr.bf16.mxu0 %v1719_v46 }
  0x2a   :  { %1651 = vmatprep.subr.bf16.mxu1 %v1719_v46 }
  0x2b   :  { %832 = vmatmul.mubr.bf16.gmra.mxu0 %v1709_v40  ;;  %v1793_v40 = vld [vmem:[%s2395_s0 + $0x128] ss:$28 sps:$4 sm:$0xff]  }
  0x2c   :  { %929 = vmatmul.mubr.bf16.gmra.mxu1 %v1710_v41  ;;  %839 = vmatprep.mubr.bf16.mxu0 %v1713_v44  ;;  %v1794_v41 = vld [vmem:[%s2395_s0 + $0x1a0] ss:$28 sps:$4 sm:$0xff]  }
  0x2d   :  { %936 = vmatprep.mubr.bf16.mxu1 %v1715_v45  ;;  %1560 = vmatpush3.bf16.msra.mxu0 %v1720_v47  ;;  %v2144_v44 = vld [vmem:[%s2396_s2] ss:$0 sm:$0xff] }
  0x2e   :  { %1659 = vmatpush3.bf16.msra.mxu1 %v1720_v47  ;;  %1561 = vmatprep.subr.bf16.mxu0 %v1727_v52 }
  0x2f   :  { %1652 = vmatprep.subr.bf16.mxu1 %v1727_v52 }
  0x31   :  { %1562 = vmatpush3.bf16.msra.mxu0 %v1728_v53 }
  0x32   :  { %1660 = vmatpush3.bf16.msra.mxu1 %v1728_v53  ;;  %1563 = vmatprep.subr.bf16.mxu0 %v1735_v54 }
  0x33   :  { %840 = vmatmul.mubr.bf16.gmra.mxu0 %v1717_v48  ;;  %1653 = vmatprep.subr.bf16.mxu1 %v1735_v54 }
  0x34   :  { %937 = vmatmul.mubr.bf16.gmra.mxu1 %v1718_v49  ;;  %847 = vmatprep.mubr.bf16.mxu0 %v1721_v50 }
  0x35   :  { %944 = vmatprep.mubr.bf16.mxu1 %v1723_v51  ;;  %1564 = vmatpush3.bf16.msra.mxu0 %v1736_v55 }
  0x36   :  { %1661 = vmatpush3.bf16.msra.mxu1 %v1736_v55  ;;  %1565 = vmatprep.subr.bf16.mxu0 %v1743_v60 }
  0x37   :  { %1654 = vmatprep.subr.bf16.mxu1 %v1743_v60 }
  0x39   :  { %1566 = vmatpush3.bf16.msra.mxu0 %v1744_v61 }
  0x3a   :  { %1662 = vmatpush3.bf16.msra.mxu1 %v1744_v61  ;;  %1567 = vmatprep.subr.bf16.mxu0 %v1751_v0 }
  0x3b   :  { %848 = vmatmul.mubr.bf16.gmra.mxu0 %v1725_v56  ;;  %1655 = vmatprep.subr.bf16.mxu1 %v1751_v0 }
  0x3c   :  { %945 = vmatmul.mubr.bf16.gmra.mxu1 %v1726_v57  ;;  %855 = vmatprep.mubr.bf16.mxu0 %v1729_v58 }
  0x3d   :  { %952 = vmatprep.mubr.bf16.mxu1 %v1731_v59  ;;  %1568 = vmatpush3.bf16.msra.mxu0 %v1752_v1 }
  0x3e   :  { %1663 = vmatpush3.bf16.msra.mxu1 %v1752_v1  ;;  %1569 = vmatprep.subr.bf16.mxu0 %v1759_v4 }
  0x3f   :  { %1656 = vmatprep.subr.bf16.mxu1 %v1759_v4 }
  0x41   :  { %1570 = vmatpush3.bf16.msra.mxu0 %v1760_v5 }
  0x42   :  { %1664 = vmatpush3.bf16.msra.mxu1 %v1760_v5 }
  0x43   :  { %856 = vmatmul.mubr.bf16.gmra.mxu0 %v1733_v62  ;;  %1629 = vmatprep.subr.bf16.mxu1 %v1767_v8 }
  0x44   :  { %953 = vmatmul.mubr.bf16.gmra.mxu1 %v1734_v63  ;;  %863 = vmatprep.mubr.bf16.mxu0 %v1737_v2 }
  0x45   :  { %960 = vmatprep.mubr.bf16.mxu1 %v1739_v3 }
  0x4b   :  { %864 = vmatmul.mubr.bf16.gmra.mxu0 %v1741_v6 }
  0x4c   :  { %961 = vmatmul.mubr.bf16.gmra.mxu1 %v1742_v7  ;;  %871 = vmatprep.mubr.bf16.mxu0 %v1745_v9 }
  0x4d   :  { %968 = vmatprep.mubr.bf16.mxu1 %v1747_v10 }
  0x53   :  { %872 = vmatmul.mubr.bf16.gmra.mxu0 %v1749_v11 }
  0x54   :  { %969 = vmatmul.mubr.bf16.gmra.mxu1 %v1750_v12  ;;  %879 = vmatprep.mubr.bf16.mxu0 %v1753_v13 }
  0x55   :  { %976 = vmatprep.mubr.bf16.mxu1 %v1755_v14 }
  0x5b   :  { %880 = vmatmul.mubr.bf16.gmra.mxu0 %v1757_v15 }
  0x5c   :  { %977 = vmatmul.mubr.bf16.gmra.mxu1 %v1758_v16  ;;  %1017 = vmatprep.mubr.bf16.mxu0 %v1763_v17 }
  0x5d   :  { %1065 = vmatprep.mubr.bf16.mxu1 %v1766_v18 }
  0x63   :  { %1018 = vmatmul.mubr.bf16.vlgmr.msra.gmra.mxu0 %v1761_v19 }
  0x64   :  { %1066 = vmatmul.mubr.bf16.vlgmr.msra.gmra.mxu1 %v1764_v20  ;;  %1025 = vmatprep.mubr.bf16.mxu0 %v1768_v21 }
  0x65   :  { %1630 = vmatpush3.bf16.msra.mxu1 %v1767_v8  ;;  %1073 = vmatprep.mubr.bf16.mxu1 %v1770_v22 }
  0x66   :  { %1631 = vmatprep.subr.bf16.mxu1 %v1774_v23 }
  0x69   :  { %1632 = vmatpush3.bf16.msra.mxu1 %v1774_v23 }
  0x6b   :  { %1026 = vmatmul.mubr.bf16.gmra.mxu0 %v1772_v24 }
  0x6c   :  { %1074 = vmatmul.mubr.bf16.gmra.mxu1 %v1773_v25  ;;  %1033 = vmatprep.mubr.bf16.mxu0 %v1775_v26 }
  0x6d   :  { %1633 = vmatprep.mubr.msk.bf16.mxu1 %vm766_vm0, %v1777_v27 }
  0x73   :  { %1034 = vmatmul.mubr.bf16.gmra.mxu0 %v1778_v28 }
  0x74   :  { %1634 = vmatmul.mubr.msk.bf16.vlgmr.msra.gmra.mxu1 %vm766_vm0, %v1779_v29  ;;  %1041 = vmatprep.mubr.bf16.mxu0 %v1780_v30 }
  0x75   :  { %1637 = vmatprep.mubr.msk.bf16.mxu1 %vm766_vm0, %v1782_v31 }
  0x7b   :  { %1042 = vmatmul.mubr.bf16.gmra.mxu0 %v1783_v32 }
  0x7c   :  { %1638 = vmatmul.mubr.msk.bf16.gmra.mxu1 %vm766_vm0, %v1784_v33  ;;  %1049 = vmatprep.mubr.bf16.mxu0 %v1785_v34 }
  0x7d   :  { %1641 = vmatprep.mubr.msk.bf16.mxu1 %vm766_vm0, %v1787_v35 }
  0x83   :  { %1050 = vmatmul.mubr.bf16.gmra.mxu0 %v1788_v36 }
  0x84   :  { %1642 = vmatmul.mubr.msk.bf16.gmra.mxu1 %vm766_vm0, %v1789_v37  ;;  %1057 = vmatprep.mubr.bf16.mxu0 %v1790_v38 }
  0x85   :  { %1645 = vmatprep.mubr.msk.bf16.mxu1 %vm766_vm0, %v1792_v39 }
  0x8b   :  { %1058 = vmatmul.mubr.bf16.gmra.mxu0 %v1793_v40 }
  0x8c   :  { %1646 = vmatmul.mubr.msk.bf16.gmra.mxu1 %vm766_vm0, %v1794_v41 }
  0xe3   :  { %v1443_v42 = vpop.f32.mrf.mxu0 }
  0xe4   :  { %v1507_v43 = vpop.f32.mrf.mxu1 }
  0xe5   :  { %v1444_v45 = vpop.f32.mrf.mxu0 }
  0xe6   :  { %v1445_v46 = vadd.f32 %v1444_v45, %v1443_v42  ;;  %v1508_v47 = vpop.f32.mrf.mxu1 }
  0xe7   :  { %v1509_v48 = vadd.f32 %v1508_v47, %v1507_v43  ;;  %v1446_v49 = vpop.f32.mrf.mxu0 }
  0xe8   :  { %v826_v50 = vadd.f32 %v1445_v46, %v2144_v44  ;;  %v1510_v51 = vpop.f32.mrf.mxu1 }
  0xe9   :  { %v1447_v52 = vpop.f32.mrf.mxu0 }
  0xea   :  { %v2147_v53 = vadd.f32 %v1509_v48, %v826_v50  ;;  %v1448_v54 = vadd.f32 %v1447_v52, %v1446_v49  ;;  %v1511_v55 = vpop.f32.mrf.mxu1 }
  0xeb   :  { %v1512_v56 = vadd.f32 %v1511_v55, %v1510_v51  ;;  %v1449_v57 = vpop.f32.mrf.mxu0 }
  0xec   :  { %v829_v58 = vadd.f32 %v1448_v54, %v2144_v44  ;;  %v1513_v59 = vpop.f32.mrf.mxu1 }
  0xed   :  { %v1450_v60 = vpop.f32.mrf.mxu0 }
  0xee   :  { %v2150_v61 = vadd.f32 %v1512_v56, %v829_v58  ;;  %v1451_v62 = vadd.f32 %v1450_v60, %v1449_v57  ;;  %v1514_v63 = vpop.f32.mrf.mxu1 }
  0xef   :  { %v1515_v0 = vadd.f32 %v1514_v63, %v1513_v59  ;;  %v1452_v1 = vpop.f32.mrf.mxu0 }
  0xf0   :  { %v834_v2 = vadd.f32 %v1451_v62, %v2144_v44  ;;  %v1516_v3 = vpop.f32.mrf.mxu1 }
  0xf1   :  { %v1453_v4 = vpop.f32.mrf.mxu0 }
  0xf2   :  { %v2153_v5 = vadd.f32 %v1515_v0, %v834_v2  ;;  %v1454_v6 = vadd.f32 %v1453_v4, %v1452_v1  ;;  %v1517_v7 = vpop.f32.mrf.mxu1 }
  0xf3   :  { %v1518_v8 = vadd.f32 %v1517_v7, %v1516_v3  ;;  %v1455_v9 = vpop.f32.mrf.mxu0 }
  0xf4   :  { %v837_v10 = vadd.f32 %v1454_v6, %v2144_v44  ;;  %v1519_v11 = vpop.f32.mrf.mxu1 }
  0xf5   :  { %v1456_v12 = vpop.f32.mrf.mxu0 }
  0xf6   :  { %v2156_v13 = vadd.f32 %v1518_v8, %v837_v10  ;;  %v1457_v14 = vadd.f32 %v1456_v12, %v1455_v9  ;;  %v1520_v15 = vpop.f32.mrf.mxu1 }
  0xf7   :  { %v1521_v16 = vadd.f32 %v1520_v15, %v1519_v11  ;;  %v1458_v17 = vpop.f32.mrf.mxu0 }
  0xf8   :  { %v842_v18 = vadd.f32 %v1457_v14, %v2144_v44  ;;  %v1522_v19 = vpop.f32.mrf.mxu1 }
  0xf9   :  { %v1459_v20 = vpop.f32.mrf.mxu0 }
  0xfa   :  { %v2159_v21 = vadd.f32 %v1521_v16, %v842_v18  ;;  %v1460_v22 = vadd.f32 %v1459_v20, %v1458_v17  ;;  %v1523_v23 = vpop.f32.mrf.mxu1 }
  0xfb   :  { %v1524_v24 = vadd.f32 %v1523_v23, %v1522_v19  ;;  %v2161_v25 = vpop.f32.mrf.mxu0 }
  0xfc   :  { %v845_v26 = vadd.f32 %v1460_v22, %v2144_v44  ;;  %v2164_v27 = vpop.f32.mrf.mxu1 }
  0xfd   :  { %v2166_v28 = vpop.f32.mrf.mxu0 }
  0xfe   :  { %v2168_v29 = vadd.f32 %v1524_v24, %v845_v26  ;;  %v2170_v30 = vpop.f32.mrf.mxu1 }
  0xff   :  { %v2172_v31 = vpop.f32.mrf.mxu0 }
 0x100   :  { %v2174_v32 = vpop.f32.mrf.mxu1 }
 0x101   :  { %v2176_v33 = vpop.f32.mrf.mxu0 }
 0x102   :  { %v2178_v34 = vpop.f32.mrf.mxu1 }
 0x103   :  { %v2180_v35 = vpop.f32.mrf.mxu0 }
 0x104   :  { %v2182_v36 = vpop.f32.mrf.mxu1 }
 0x105   :  { %v2184_v37 = vpop.f32.mrf.mxu0 }
 0x106   :  { %v2186_v38 = vpop.f32.mrf.mxu1 }
 0x107   :  { %v2188_v39 = vpop.f32.mrf.mxu0 }
 0x108   :  { %v2190_v40 = vpop.f32.mrf.mxu1 }
 0x109   :  { %v2192_v41 = vpop.f32.mrf.mxu0 }
 0x10a   :  { %v2194_v42 = vpop.f32.mrf.mxu1 }
 0x10b   :  { %v2196_v43 = vpop.f32.mrf.mxu0 }
 0x10c   :  { %v2198_v45 = vpop.f32.mrf.mxu1 }
 0x10d   :  { %v2200_v46 = vpop.f32.mrf.mxu0 }
 0x10e   :  { %v2202_v47 = vpop.f32.mrf.mxu1 }
 0x10f   :  { %v2204_v48 = vpop.f32.mrf.mxu0 }
 0x110   :  { %v2206_v49 = vpop.f32.mrf.mxu1 }
 0x111   :  { %2398 = vst [vmem:[#allocation2_spill] sm:$0xff] %v2206_v49  ;;  %v2208_v50 = vpop.f32.mrf.mxu0 }
 0x112   :  { %v2210_v51 = vpop.f32.mrf.mxu1 }
 0x113   :  { %2399 = vst [vmem:[#allocation3_spill] sm:$0xff] %v2210_v51  ;;  %v2212_v52 = vpop.f32.mrf.mxu0 }
 0x114   :  { %v2214_v54 = vpop.f32.mrf.mxu1 }
 0x115   :  { %v2216_v55 = vpop.f32.mrf.mxu0 }
 0x116   :  { %v2218_v56 = vpop.f32.mrf.mxu1 }
 0x117   :  { %v2220_v57 = vpop.f32.mrf.mxu0 }
 0x118   :  { %v2222_v58 = vpop.f32.mrf.mxu1 }
 0x119   :  { %2400 = vst [vmem:[#allocation4_spill] sm:$0xff] %v2222_v58  ;;  %v2224_v59 = vpop.f32.mrf.mxu0 }
 0x11a   :  { %v2226_v60 = vpop.f32.mrf.mxu1 }
 0x11b   :  { %2401 = vst [vmem:[#allocation5_spill] sm:$0xff] %v2226_v60  ;;  %v2228_v62 = vpop.f32.mrf.mxu0 }
 0x11c   :  { %v2230_v63 = vpop.f32.mrf.mxu1 }
 0x11d   :  { %v2232_v0 = vpop.f32.mrf.mxu0 }
 0x11e   :  { %v2234_v1 = vpop.f32.mrf.mxu1 }
 0x11f   :  { %v2236_v2 = vpop.f32.mrf.mxu0 }
 0x120   :  { %v2238_v3 = vpop.f32.mrf.mxu1 }
 0x121   :  { %2402 = vst [vmem:[#allocation6_spill] sm:$0xff] %v2238_v3  ;;  %v2240_v4 = vpop.f32.mrf.mxu0 }
 0x122   :  { %v2242_v6 = vpop.f32.mrf.mxu1 }
 0x123   :  { %2403 = vst [vmem:[#allocation7_spill] sm:$0xff] %v2242_v6  ;;  %v1571_v7 = vpop.f32.mrf.mxu0 }
 0x124   :  { %v2244_v8 = vpop.f32.mrf.mxu1 }
 0x125   :  { %2404 = vst [vmem:[#allocation8_spill] sm:$0xff] %v2244_v8  ;;  %v1572_v9 = vpop.f32.mrf.mxu0 }
 0x126   :  { %v2246_v10 = vpop.f32.mrf.mxu1  ;;  %v1573_v24 = vadd.f32 %v1572_v9, %v1571_v7 }
 0x127   :  { %2405 = vst [vmem:[#allocation9_spill] sm:$0xff] %v2246_v10  ;;  %v1574_v11 = vpop.f32.mrf.mxu0 }
 0x128   :  { %v2248_v12 = vpop.f32.mrf.mxu1  ;;  %v1020_v10 = vadd.f32 %v1573_v24, %v2147_v53 }
 0x129   :  { %2406 = vst [vmem:[#allocation10_spill] sm:$0xff] %v2248_v12  ;;  %v1575_v14 = vpop.f32.mrf.mxu0 }
 0x12a   :  { %v2250_v15 = vpop.f32.mrf.mxu1  ;;  %v1576_v58 = vadd.f32 %v1575_v14, %v1574_v11 }
 0x12b   :  { %2407 = vst [vmem:[#allocation11_spill] sm:$0xff] %v2250_v15  ;;  %v1577_v16 = vpop.f32.mrf.mxu0 }
 0x12c   :  { %v2252_v17 = vpop.f32.mrf.mxu1  ;;  %v1023_v11 = vadd.f32 %v1576_v58, %v2150_v61 }
 0x12d   :  { %v1578_v18 = vpop.f32.mrf.mxu0 }
 0x12e   :  { %v2254_v19 = vpop.f32.mrf.mxu1  ;;  %v1579_v20 = vadd.f32 %v1578_v18, %v1577_v16  ;;  %v1463_v16 = vadd.f32 %v2166_v28, %v2161_v25  ;;  %v1527_v28 = vadd.f32 %v2170_v30, %v2164_v27 }
 0x12f   :  { %v1580_v22 = vpop.f32.mrf.mxu0 }
 0x130   :  { %v2256_v23 = vpop.f32.mrf.mxu1  ;;  %v1028_v12 = vadd.f32 %v1579_v20, %v2153_v5  ;;  %v850_v25 = vadd.f32 %v1463_v16, %v2144_v44  ;;  %v1530_v16 = vadd.f32 %v2178_v34, %v2174_v32 }
 0x131   :  { %2408 = vst [vmem:[#allocation12_spill] sm:$0xff] %v2256_v23  ;;  %v1581_v26 = vpop.f32.mrf.mxu0 }
 0x132   :  { %v2258_v51 = vpop.f32.mrf.mxu1  ;;  %v1582_v49 = vadd.f32 %v1581_v26, %v1580_v22  ;;  %v1466_v22 = vadd.f32 %v2176_v33, %v2172_v31 }
 0x133   :  { %v1583_v60 = vpop.f32.mrf.mxu0 }
 0x134   :  { %v1635_v15 = vpop.f32.mrf.mxu1  ;;  %v1031_v9 = vadd.f32 %v1582_v49, %v2156_v13  ;;  %v1469_v13 = vadd.f32 %v2184_v37, %v2180_v35 }
 0x135   :  { %v1125_v6 = vadd.f32 %v1635_v15, %v1028_v12  ;;  %v1584_v3 = vpop.f32.mrf.mxu0 }
 0x136   :  { %v1116_v18 = vpop.f32.mrf.mxu1  ;;  %v1585_v14 = vadd.f32 %v1584_v3, %v1583_v60  ;;  %v853_v60 = vadd.f32 %v1466_v22, %v2144_v44 }
 0x137   :  { %v1181_v8 = vmax.f32 %v1125_v6, 0.0  ;;  %v1117_v23 = vadd.f32 %v1116_v18, %v1020_v10  ;;  %v1586_v7 = vpop.f32.mrf.mxu0  ;;  %v858_v10 = vadd.f32 %v1469_v13, %v2144_v44  ;;  %v1472_v18 = vadd.f32 %v2192_v41, %v2188_v39 }
 0x138   :  { %v1636_v5 = vpop.f32.mrf.mxu1  ;;  %v1036_v6 = vadd.f32 %v1585_v14, %v2159_v21  ;;  %v1481_v41 = vadd.f32 %v2216_v55, %v2212_v52 }
 0x139   :  { %v1413_v12 = vpack.c.bf16 %v1181_v8, %v1181_v8  ;;  %v1179_v15 = vmax.f32 %v1117_v23, 0.0  ;;  %v1128_v53 = vadd.f32 %v1636_v5, %v1031_v9  ;;  %v1587_v20 = vpop.f32.mrf.mxu0  ;;  %v947_v8 = vadd.f32 %v1527_v28, %v850_v25 }
 0x13a   :  { %v1119_v49 = vpop.f32.mrf.mxu1  ;;  %v1588_v30 = vadd.f32 %v1587_v20, %v1586_v7  ;;  %v1533_v23 = vadd.f32 %v2186_v38, %v2182_v36  ;;  %v1487_v36 = vadd.f32 %v2232_v0, %v2228_v62  ;;  %v1536_v62 = vadd.f32 %v2194_v42, %v2190_v40 }
 0x13b   :  { %1262 = vst.msk [vmem:[%s2397_s3 + $0x8] sm:$0xf] %vm1259_vm1, %v1413_v12  ;;  %v1411_v61 = vpack.c.bf16 %v1179_v15, %v1179_v15  ;;  %v1182_v31 = vmax.f32 %v1128_v53, 0.0  ;;  %v1120_v33 = vadd.f32 %v1119_v49, %v1023_v11  ;;  %v1589_v58 = vpop.f32.mrf.mxu0  ;;  %v950_v11 = vadd.f32 %v1530_v16, %v853_v60 }
 0x13c   :  { %v1639_v3 = vpop.f32.mrf.mxu1  ;;  %v1039_v38 = vadd.f32 %v1588_v30, %v2168_v29  ;;  %v955_v39 = vadd.f32 %v1533_v23, %v858_v10  ;;  %v861_v53 = vadd.f32 %v1472_v18, %v2144_v44  ;;  %v1475_v28 = vadd.f32 %v2200_v46, %v2196_v43  ;;  %v2413_v18 = vld [vmem:[#allocation12_spill] sm:$0xff] }
 0x13d   :  { %1260 = vst.msk [vmem:[%s2397_s3] sm:$0xf] %vm1259_vm1, %v1411_v61  ;;  %v1414_v27 = vpack.c.bf16 %v1182_v31, %v1182_v31  ;;  %v1180_v35 = vmax.f32 %v1120_v33, 0.0  ;;  %v1590_v37 = vpop.f32.mrf.mxu0  ;;  %v1545_v29 = vadd.f32 %v2218_v56, %v2214_v54  ;;  %v882_v55 = vadd.f32 %v1487_v36, %v2144_v44 }
 0x13e   :  { %v1591_v24 = vadd.f32 %v1590_v37, %v1589_v58  ;;  %v1132_v26 = vpop.f32.mrf.mxu1  ;;  %v1551_v61 = vadd.f32 %v2234_v1, %v2230_v63  ;;  %v1490_v40 = vadd.f32 %v2240_v4, %v2236_v2  ;;  %v874_v46 = vadd.f32 %v1481_v41, %v2144_v44  ;;  %v2410_v37 = vld [vmem:[#allocation9_spill] sm:$0xff]  ;;  %v2416_v41 = vld [vmem:[#allocation10_spill] sm:$0xff] }
 0x13f   :  { %1263 = vst.msk [vmem:[%s2397_s3 + $0xc] sm:$0xf] %vm1259_vm1, %v1414_v27  ;;  %v1412_v21 = vpack.c.bf16 %v1180_v35, %v1180_v35  ;;  %v1133_v7 = vadd.f32 %v1132_v26, %v1036_v6  ;;  %v1592_v9 = vpop.f32.mrf.mxu0  ;;  %v958_v58 = vadd.f32 %v1536_v62, %v861_v53  ;;  %v1484_v63 = vadd.f32 %v2224_v59, %v2220_v57 }
 0x140   :  { %v1044_v22 = vadd.f32 %v1591_v24, %v947_v8  ;;  %v1640_v5 = vpop.f32.mrf.mxu1  ;;  %v1615_v1 = vadd.f32 %v2254_v19, %v2252_v17  ;;  %v866_v60 = vadd.f32 %v1475_v28, %v2144_v44  ;;  %v1478_v57 = vadd.f32 %v2208_v50, %v2204_v48  ;;  %v2409_v19 = vld [vmem:[#allocation8_spill] sm:$0xff]  ;;  %v2411_v48 = vld [vmem:[#allocation6_spill] sm:$0xff]  ;;  %v2412_v50 = vld [vmem:[#allocation7_spill] sm:$0xff] }
 0x141   :  { %1261 = vst.msk [vmem:[%s2397_s3 + $0x4] sm:$0xf] %vm1259_vm1, %v1412_v21  ;;  %v1183_v32 = vmax.f32 %v1133_v7, 0.0  ;;  %v1593_v34 = vpop.f32.mrf.mxu0  ;;  %v979_v59 = vadd.f32 %v1551_v61, %v882_v55  ;;  %v885_v17 = vadd.f32 %v1490_v40, %v2144_v44  ;;  %v1609_v6 = vadd.f32 %v2410_v37, %v2409_v19  ;;  %v2418_v40 = vld [vmem:[#allocation2_spill] sm:$0xff] }
 0x142   :  { %v1141_v12 = vadd.f32 %v1639_v3, %v1044_v22  ;;  %v1594_v14 = vadd.f32 %v1593_v34, %v1592_v9  ;;  %v1135_v15 = vpop.f32.mrf.mxu1  ;;  %v1539_v3 = vadd.f32 %v2202_v47, %v2198_v45  ;;  %v971_v47 = vadd.f32 %v1545_v29, %v874_v46 }
 0x143   :  { %v1415_v0 = vpack.c.bf16 %v1183_v32, %v1183_v32  ;;  %v1136_v20 = vadd.f32 %v1135_v15, %v1039_v38  ;;  %v1595_v25 = vpop.f32.mrf.mxu0  ;;  %v877_v26 = vadd.f32 %v1484_v63, %v2144_v44  ;;  %v1554_v16 = vadd.f32 %v2412_v50, %v2411_v48 }
 0x144   :  { %v1185_v13 = vmax.f32 %v1141_v12, 0.0  ;;  %v1047_v49 = vadd.f32 %v1594_v14, %v950_v11  ;;  %v2310_v52 = vpop.f32.mrf.mxu1  ;;  %v1618_v21 = vadd.f32 %v2258_v51, %v2413_v18  ;;  %v1076_v9 = vadd.f32 %v1615_v1, %v979_v59  ;;  %v2415_v11 = vld [vmem:[#allocation5_spill] sm:$0xff]  ;;  %v2417_v12 = vld [vmem:[#allocation11_spill] sm:$0xff] }
 0x145   :  { %1264 = vst.msk [vmem:[%s2397_s3 + $0x10] sm:$0xf] %vm1259_vm1, %v1415_v0  ;;  %v1184_v42 = vmax.f32 %v1136_v20, 0.0  ;;  %v1596_v43 = vpop.f32.mrf.mxu0  ;;  %v963_v22 = vadd.f32 %v1539_v3, %v866_v60  ;;  %v1612_v14 = vadd.f32 %v2417_v12, %v2416_v41  ;;  %v1068_v53 = vadd.f32 %v1609_v6, %v971_v47 }
 0x146   :  { %v1417_v54 = vpack.c.bf16 %v1185_v13, %v1185_v13  ;;  %v1144_v56 = vadd.f32 %v1640_v5, %v1047_v49  ;;  %v1597_v31 = vadd.f32 %v1596_v43, %v1595_v25  ;;  %v1148_v33 = vpop.f32.mrf.mxu1  ;;  %v2414_v5 = vld [vmem:[#allocation4_spill] sm:$0xff]  ;;  %v869_v62 = vadd.f32 %v1478_v57, %v2144_v44 }
 0x147   :  { %v1416_v2 = vpack.c.bf16 %v1184_v42, %v1184_v42  ;;  %v1598_v4 = vpop.f32.mrf.mxu0  ;;  %v1548_v36 = vadd.f32 %v2415_v11, %v2414_v5  ;;  %v2419_v42 = vld [vmem:[#allocation3_spill] sm:$0xff] }
 0x148   :  { %1266 = vst.msk [vmem:[%s2397_s3 + $0x18] sm:$0xf] %vm1259_vm1, %v1417_v54  ;;  %v1186_v27 = vmax.f32 %v1144_v56, 0.0  ;;  %v1052_v30 = vadd.f32 %v1597_v31, %v955_v39  ;;  %v2333_v35 = vpop.f32.mrf.mxu1  ;;  %v982_v39 = vadd.f32 %v1554_v16, %v885_v17  ;;  %v1542_v43 = vadd.f32 %v2419_v42, %v2418_v40 }
 0x149   :  { %1265 = vst.msk [vmem:[%s2397_s3 + $0x14] sm:$0xf] %vm1259_vm1, %v1416_v2  ;;  %v1599_v45 = vpop.f32.mrf.mxu0  ;;  %v974_v29 = vadd.f32 %v1548_v36, %v877_v26 }
 0x14a   :  { %v1418_v8 = vpack.c.bf16 %v1186_v27, %v1186_v27  ;;  %v1149_v10 = vadd.f32 %v1148_v33, %v1052_v30  ;;  %v1600_v23 = vadd.f32 %v1599_v45, %v1598_v4  ;;  %v1151_v24 = vpop.f32.mrf.mxu1  ;;  %v1079_v61 = vadd.f32 %v1618_v21, %v982_v39 }
 0x14b   :  { %v1601_v7 = vpop.f32.mrf.mxu0  ;;  %v1071_v63 = vadd.f32 %v1612_v14, %v974_v29  ;;  %v966_v1 = vadd.f32 %v1542_v43, %v869_v62 }
 0x14c   :  { %1267 = vst.msk [vmem:[%s2397_s3 + $0x1c] sm:$0xf] %vm1259_vm1, %v1418_v8  ;;  %v1187_v32 = vmax.f32 %v1149_v10, 0.0  ;;  %v1055_v34 = vadd.f32 %v1600_v23, %v958_v58  ;;  %v1647_v38 = vpop.f32.mrf.mxu1 }
 0x14d   :  { %v1173_v15 = vadd.f32 %v1647_v38, %v1076_v9  ;;  %v1602_v51 = vpop.f32.mrf.mxu0 }
 0x14e   :  { %v1419_v0 = vpack.c.bf16 %v1187_v32, %v1187_v32  ;;  %v1152_v20 = vadd.f32 %v1151_v24, %v1055_v34  ;;  %v1603_v25 = vadd.f32 %v1602_v51, %v1601_v7  ;;  %v1164_v28 = vpop.f32.mrf.mxu1 }
 0x14f   :  { %v1193_v13 = vmax.f32 %v1173_v15, 0.0  ;;  %v1165_v49 = vadd.f32 %v1164_v28, %v1068_v53  ;;  %v1604_v55 = vpop.f32.mrf.mxu0 }
 0x150   :  { %1268 = vst.msk [vmem:[%s2397_s3 + $0x20] sm:$0xf] %vm1259_vm1, %v1419_v0  ;;  %v1188_v46 = vmax.f32 %v1152_v20, 0.0  ;;  %v1060_v54 = vadd.f32 %v1603_v25, %v963_v22  ;;  %v1648_v44 = vpop.f32.mrf.mxu1 }
 0x151   :  { %v1425_v56 = vpack.c.bf16 %v1193_v13, %v1193_v13  ;;  %v1191_v31 = vmax.f32 %v1165_v49, 0.0  ;;  %v1176_v33 = vadd.f32 %v1648_v44, %v1079_v61  ;;  %v1605_v58 = vpop.f32.mrf.mxu0 }
 0x152   :  { %v1420_v2 = vpack.c.bf16 %v1188_v46, %v1188_v46  ;;  %v1157_v4 = vadd.f32 %v2310_v52, %v1060_v54  ;;  %v1606_v60 = vadd.f32 %v1605_v58, %v1604_v55  ;;  %v1167_v3 = vpop.f32.mrf.mxu1 }
 0x153   :  { %1274 = vst.msk [vmem:[%s2397_s3 + $0x38] sm:$0xf] %vm1259_vm1, %v1425_v56  ;;  %v1423_v27 = vpack.c.bf16 %v1191_v31, %v1191_v31  ;;  %v1194_v30 = vmax.f32 %v1176_v33, 0.0  ;;  %v1168_v57 = vadd.f32 %v1167_v3, %v1071_v63 }
 0x154   :  { %1269 = vst.msk [vmem:[%s2397_s3 + $0x24] sm:$0xf] %vm1259_vm1, %v1420_v2  ;;  %v1189_v59 = vmax.f32 %v1157_v4, 0.0  ;;  %v1063_v17 = vadd.f32 %v1606_v60, %v966_v1 }
 0x155   :  { %1272 = vst.msk [vmem:[%s2397_s3 + $0x30] sm:$0xf] %vm1259_vm1, %v1423_v27  ;;  %v1426_v52 = vpack.c.bf16 %v1194_v30, %v1194_v30  ;;  %v1192_v19 = vmax.f32 %v1168_v57, 0.0 }
 0x156   :  { %v1421_v37 = vpack.c.bf16 %v1189_v59, %v1189_v59  ;;  %v1160_v6 = vadd.f32 %v2333_v35, %v1063_v17 }
 0x157   :  { %1275 = vst.msk [vmem:[%s2397_s3 + $0x3c] sm:$0xf] %vm1259_vm1, %v1426_v52  ;;  %v1424_v45 = vpack.c.bf16 %v1192_v19, %v1192_v19 }
 0x158   :  { %1270 = vst.msk [vmem:[%s2397_s3 + $0x28] sm:$0xf] %vm1259_vm1, %v1421_v37  ;;  %v1190_v47 = vmax.f32 %v1160_v6, 0.0 }
 0x159   :  { %1273 = vst.msk [vmem:[%s2397_s3 + $0x34] sm:$0xf] %vm1259_vm1, %v1424_v45 }
 0x15a   :  { %v1422_v8 = vpack.c.bf16 %v1190_v47, %v1190_v47 }
 0x15c   :  { %1271 = vst.msk [vmem:[%s2397_s3 + $0x2c] sm:$0xf] %vm1259_vm1, %v1422_v8 }

// kernel: net1_forward.5
= control target key start
LH: loop header
LB: loop body
LE: loop exit
PB: predicated region body
PF: predicated region fallthrough
CT: control target
= control target key end

     0   :  { %s7178_s1 = inlined_call_operand.vmem [shape: bf16[1024,1024], index: 1, kind: input, shape index: {}]   ;;  %s7179_s0 = inlined_call_operand.vmem [shape: bf16[8,1024], index: 0, kind: input, shape index: {}]   ;;  %s7180_s2 = inlined_call_operand.vmem [shape: f32[1,1024], index: 2, kind: input, shape index: {}]   ;;  %s7181_s3 = inlined_call_operand.vmem [shape: bf16[1024,128], index: 3, kind: input, shape index: {}]   ;;  %s7182_s4 = inlined_call_operand.vmem [shape: f32[1,128], index: 4, kind: input, shape index: {}]   ;;  %s7183_s5 = inlined_call_operand.vmem [shape: f32[8,128], index: 5, kind: output, shape index: {}]  }
   0x1   :  { %v81_v0 = vld [vmem:[%s7178_s1 + $0x1c0] sm:$0xff]  ;;  %v5391_v54 = vld [vmem:[%s7179_s0 + $0x8] sm:$0xff] }
   0x2   :  { %v85_v1 = vld [vmem:[%s7178_s1 + $0x1e0] sm:$0xff]  ;;  %v5405_v59 = vcombine.high %v5391_v54, %v5391_v54 }
   0x3   :  { %v209_v2 = vld [vmem:[%s7178_s1 + $0x5c0] sm:$0xff]  ;;  %v4588_v3 = vcombine.high %v81_v0, %v85_v1  ;;  %v4587_v5 = vcombine.low %v81_v0, %v85_v1 }
   0x4   :  { %v213_v4 = vld [vmem:[%s7178_s1 + $0x5e0] sm:$0xff]  ;;  %3240 = vmatprep.mubr.bf16.mxu1 %v5405_v59 }
   0x5   :  { %v73_v6 = vld [vmem:[%s7178_s1 + $0x180] sm:$0xff]  ;;  %v4716_v8 = vcombine.high %v209_v2, %v213_v4  ;;  %v4715_v9 = vcombine.low %v209_v2, %v213_v4  ;;  %3167 = vmatprep.subr.bf16.mxu0 %v4588_v3 }
   0x6   :  { %v77_v7 = vld [vmem:[%s7178_s1 + $0x1a0] sm:$0xff]  ;;  %3168 = vmatpush1.bf16.msra.mxu0 %v4587_v5 }
   0x7   :  { %v4580_v10 = vcombine.high %v73_v6, %v77_v7  ;;  %v201_v11 = vld [vmem:[%s7178_s1 + $0x580] sm:$0xff]  ;;  %3208 = vmatprep.subr.bf16.mxu1 %v4716_v8  ;;  %v4579_v18 = vcombine.low %v73_v6, %v77_v7 }
   0x8   :  { %v205_v12 = vld [vmem:[%s7178_s1 + $0x5a0] sm:$0xff]  ;;  %3209 = vmatpush1.bf16.msra.mxu1 %v4715_v9 }
   0x9   :  { %v65_v13 = vld [vmem:[%s7178_s1 + $0x140] sm:$0xff]  ;;  %v4708_v14 = vcombine.high %v201_v11, %v205_v12  ;;  %3169 = vmatprep.subr.bf16.mxu0 %v4580_v10  ;;  %v4707_v19 = vcombine.low %v201_v11, %v205_v12 }
   0xa   :  { %v69_v15 = vld [vmem:[%s7178_s1 + $0x160] sm:$0xff]  ;;  %3170 = vmatpush1.bf16.msra.mxu0 %v4579_v18 }
   0xb   :  { %v193_v16 = vld [vmem:[%s7178_s1 + $0x540] sm:$0xff]  ;;  %v4572_v20 = vcombine.high %v65_v13, %v69_v15  ;;  %3210 = vmatprep.subr.bf16.mxu1 %v4708_v14  ;;  %v4571_v26 = vcombine.low %v65_v13, %v69_v15 }
   0xc   :  { %v197_v17 = vld [vmem:[%s7178_s1 + $0x560] sm:$0xff]  ;;  %3211 = vmatpush1.bf16.msra.mxu1 %v4707_v19 }
   0xd   :  { %v4700_v21 = vcombine.high %v193_v16, %v197_v17  ;;  %v57_v22 = vld [vmem:[%s7178_s1 + $0x100] sm:$0xff]  ;;  %3171 = vmatprep.subr.bf16.mxu0 %v4572_v20  ;;  %v4699_v27 = vcombine.low %v193_v16, %v197_v17 }
   0xe   :  { %v61_v23 = vld [vmem:[%s7178_s1 + $0x120] sm:$0xff]  ;;  %3172 = vmatpush1.bf16.msra.mxu0 %v4571_v26 }
   0xf   :  { %v185_v24 = vld [vmem:[%s7178_s1 + $0x500] sm:$0xff]  ;;  %v4564_v28 = vcombine.high %v57_v22, %v61_v23  ;;  %3212 = vmatprep.subr.bf16.mxu1 %v4700_v21  ;;  %v4563_v34 = vcombine.low %v57_v22, %v61_v23 }
  0x10   :  { %v189_v25 = vld [vmem:[%s7178_s1 + $0x520] sm:$0xff]  ;;  %3213 = vmatpush1.bf16.msra.mxu1 %v4699_v27 }
  0x11   :  { %v4692_v29 = vcombine.high %v185_v24, %v189_v25  ;;  %v49_v30 = vld [vmem:[%s7178_s1 + $0xc0] sm:$0xff]  ;;  %3173 = vmatprep.subr.bf16.mxu0 %v4564_v28  ;;  %v4691_v35 = vcombine.low %v185_v24, %v189_v25 }
  0x12   :  { %v53_v31 = vld [vmem:[%s7178_s1 + $0xe0] sm:$0xff]  ;;  %3174 = vmatpush1.bf16.msra.mxu0 %v4563_v34 }
  0x13   :  { %v177_v32 = vld [vmem:[%s7178_s1 + $0x4c0] sm:$0xff]  ;;  %v4556_v36 = vcombine.high %v49_v30, %v53_v31  ;;  %3214 = vmatprep.subr.bf16.mxu1 %v4692_v29  ;;  %v4555_v42 = vcombine.low %v49_v30, %v53_v31 }
  0x14   :  { %v181_v33 = vld [vmem:[%s7178_s1 + $0x4e0] sm:$0xff]  ;;  %3215 = vmatpush1.bf16.msra.mxu1 %v4691_v35 }
  0x15   :  { %v4684_v37 = vcombine.high %v177_v32, %v181_v33  ;;  %v41_v38 = vld [vmem:[%s7178_s1 + $0x80] sm:$0xff]  ;;  %3175 = vmatprep.subr.bf16.mxu0 %v4556_v36  ;;  %v4683_v43 = vcombine.low %v177_v32, %v181_v33 }
  0x16   :  { %v45_v39 = vld [vmem:[%s7178_s1 + $0xa0] sm:$0xff]  ;;  %3176 = vmatpush1.bf16.msra.mxu0 %v4555_v42 }
  0x17   :  { %v169_v40 = vld [vmem:[%s7178_s1 + $0x480] sm:$0xff]  ;;  %v4548_v44 = vcombine.high %v41_v38, %v45_v39  ;;  %3216 = vmatprep.subr.bf16.mxu1 %v4684_v37  ;;  %v4547_v50 = vcombine.low %v41_v38, %v45_v39 }
  0x18   :  { %v173_v41 = vld [vmem:[%s7178_s1 + $0x4a0] sm:$0xff]  ;;  %3217 = vmatpush1.bf16.msra.mxu1 %v4683_v43 }
  0x19   :  { %v4676_v45 = vcombine.high %v169_v40, %v173_v41  ;;  %v33_v46 = vld [vmem:[%s7178_s1 + $0x40] sm:$0xff]  ;;  %3177 = vmatprep.subr.bf16.mxu0 %v4548_v44  ;;  %v4675_v51 = vcombine.low %v169_v40, %v173_v41 }
  0x1a   :  { %v37_v47 = vld [vmem:[%s7178_s1 + $0x60] sm:$0xff]  ;;  %3178 = vmatpush1.bf16.msra.mxu0 %v4547_v50 }
  0x1b   :  { %v161_v48 = vld [vmem:[%s7178_s1 + $0x440] sm:$0xff]  ;;  %v4540_v52 = vcombine.high %v33_v46, %v37_v47  ;;  %3218 = vmatprep.subr.bf16.mxu1 %v4676_v45  ;;  %v4539_v62 = vcombine.low %v33_v46, %v37_v47 }
  0x1c   :  { %v165_v49 = vld [vmem:[%s7178_s1 + $0x460] sm:$0xff]  ;;  %3219 = vmatpush1.bf16.msra.mxu1 %v4675_v51 }
  0x1d   :  { %v5386_v53 = vld [vmem:[%s7179_s0] sm:$0xff]  ;;  %v4668_v55 = vcombine.high %v161_v48, %v165_v49  ;;  %3179 = vmatprep.subr.bf16.mxu0 %v4540_v52  ;;  %v4667_v63 = vcombine.low %v161_v48, %v165_v49 }
  0x1e   :  { %v25_v56 = vld [vmem:[%s7178_s1] sm:$0xff]  ;;  %v5401_v58 = vcombine.high %v5386_v53, %v5386_v53  ;;  %3180 = vmatpush1.bf16.msra.mxu0 %v4539_v62 }
  0x1f   :  { %v29_v57 = vld [vmem:[%s7178_s1 + $0x20] sm:$0xff]  ;;  %3220 = vmatprep.subr.bf16.mxu1 %v4668_v55 }
  0x20   :  { %v153_v60 = vld [vmem:[%s7178_s1 + $0x400] sm:$0xff]  ;;  %3199 = vmatprep.mubr.bf16.mxu0 %v5401_v58  ;;  %v4532_v0 = vcombine.high %v25_v56, %v29_v57  ;;  %v4531_v6 = vcombine.low %v25_v56, %v29_v57  ;;  %3221 = vmatpush1.bf16.msra.mxu1 %v4667_v63 }
  0x21   :  { %v157_v61 = vld [vmem:[%s7178_s1 + $0x420] sm:$0xff] }
  0x22   :  { %v4660_v1 = vcombine.high %v153_v60, %v157_v61  ;;  %v145_v2 = vld [vmem:[%s7178_s1 + $0x3c0] sm:$0xff]  ;;  %3181 = vmatprep.subr.bf16.mxu0 %v4532_v0  ;;  %v4659_v7 = vcombine.low %v153_v60, %v157_v61 }
  0x23   :  { %v149_v3 = vld [vmem:[%s7178_s1 + $0x3e0] sm:$0xff]  ;;  %3182 = vmatpush1.bf16.msra.mxu0 %v4531_v6 }
  0x24   :  { %v273_v4 = vld [vmem:[%s7178_s1 + $0x7c0] sm:$0xff]  ;;  %v4652_v8 = vcombine.high %v145_v2, %v149_v3  ;;  %3222 = vmatprep.subr.bf16.mxu1 %v4660_v1  ;;  %v4651_v14 = vcombine.low %v145_v2, %v149_v3 }
  0x25   :  { %v277_v5 = vld [vmem:[%s7178_s1 + $0x7e0] sm:$0xff]  ;;  %3223 = vmatpush1.bf16.msra.mxu1 %v4659_v7 }
  0x26   :  { %v4780_v9 = vcombine.high %v273_v4, %v277_v5  ;;  %v137_v10 = vld [vmem:[%s7178_s1 + $0x380] sm:$0xff]  ;;  %3183 = vmatprep.subr.bf16.mxu0 %v4652_v8  ;;  %v4779_v15 = vcombine.low %v273_v4, %v277_v5 }
  0x27   :  { %v141_v11 = vld [vmem:[%s7178_s1 + $0x3a0] sm:$0xff]  ;;  %3184 = vmatpush2.bf16.msra.mxu0 %v4651_v14 }
  0x28   :  { %v265_v12 = vld [vmem:[%s7178_s1 + $0x780] sm:$0xff]  ;;  %v4644_v16 = vcombine.high %v137_v10, %v141_v11  ;;  %3224 = vmatprep.subr.bf16.mxu1 %v4780_v9  ;;  %v4643_v22 = vcombine.low %v137_v10, %v141_v11 }
  0x29   :  { %v269_v13 = vld [vmem:[%s7178_s1 + $0x7a0] sm:$0xff]  ;;  %3225 = vmatpush2.bf16.msra.mxu1 %v4779_v15 }
  0x2a   :  { %v4772_v17 = vcombine.high %v265_v12, %v269_v13  ;;  %v129_v18 = vld [vmem:[%s7178_s1 + $0x340] sm:$0xff]  ;;  %3185 = vmatprep.subr.bf16.mxu0 %v4644_v16  ;;  %v4771_v23 = vcombine.low %v265_v12, %v269_v13  ;;  %v5531_v16 = vcombine.low %v5386_v53, %v5386_v53 }
  0x2b   :  { %v133_v19 = vld [vmem:[%s7178_s1 + $0x360] sm:$0xff]  ;;  %3186 = vmatpush2.bf16.msra.mxu0 %v4643_v22 }
  0x2c   :  { %v257_v20 = vld [vmem:[%s7178_s1 + $0x740] sm:$0xff]  ;;  %v4636_v24 = vcombine.high %v129_v18, %v133_v19  ;;  %3226 = vmatprep.subr.bf16.mxu1 %v4772_v17  ;;  %v4635_v30 = vcombine.low %v129_v18, %v133_v19  ;;  %v5542_v19 = vld [vmem:[%s7179_s0 + $0x10] sm:$0xff] }
  0x2d   :  { %v261_v21 = vld [vmem:[%s7178_s1 + $0x760] sm:$0xff]  ;;  %3227 = vmatpush2.bf16.msra.mxu1 %v4771_v23 }
  0x2e   :  { %v4764_v25 = vcombine.high %v257_v20, %v261_v21  ;;  %v121_v26 = vld [vmem:[%s7178_s1 + $0x300] sm:$0xff]  ;;  %3187 = vmatprep.subr.bf16.mxu0 %v4636_v24  ;;  %v4763_v31 = vcombine.low %v257_v20, %v261_v21  ;;  %v5546_v20 = vcombine.low %v5391_v54, %v5391_v54  ;;  %v5551_v21 = vld [vmem:[%s7179_s0 + $0x18] sm:$0xff] }
  0x2f   :  { %v125_v27 = vld [vmem:[%s7178_s1 + $0x320] sm:$0xff]  ;;  %3188 = vmatpush2.bf16.msra.mxu0 %v4635_v30 }
  0x30   :  { %v249_v28 = vld [vmem:[%s7178_s1 + $0x700] sm:$0xff]  ;;  %v4628_v32 = vcombine.high %v121_v26, %v125_v27  ;;  %3228 = vmatprep.subr.bf16.mxu1 %v4764_v25  ;;  %v4627_v38 = vcombine.low %v121_v26, %v125_v27  ;;  %v5561_v26 = vcombine.high %v5542_v19, %v5542_v19 }
  0x31   :  { %v253_v29 = vld [vmem:[%s7178_s1 + $0x720] sm:$0xff]  ;;  %3229 = vmatpush2.bf16.msra.mxu1 %v4763_v31 }
  0x32   :  { %v4756_v33 = vcombine.high %v249_v28, %v253_v29  ;;  %v113_v34 = vld [vmem:[%s7178_s1 + $0x2c0] sm:$0xff]  ;;  %3189 = vmatprep.subr.bf16.mxu0 %v4628_v32  ;;  %v4755_v39 = vcombine.low %v249_v28, %v253_v29  ;;  %v5572_v29 = vcombine.high %v5551_v21, %v5551_v21 }
  0x33   :  { %v117_v35 = vld [vmem:[%s7178_s1 + $0x2e0] sm:$0xff]  ;;  %3190 = vmatpush2.bf16.msra.mxu0 %v4627_v38 }
  0x34   :  { %v241_v36 = vld [vmem:[%s7178_s1 + $0x6c0] sm:$0xff]  ;;  %v4620_v40 = vcombine.high %v113_v34, %v117_v35  ;;  %3230 = vmatprep.subr.bf16.mxu1 %v4756_v33  ;;  %v4619_v46 = vcombine.low %v113_v34, %v117_v35 }
  0x35   :  { %v245_v37 = vld [vmem:[%s7178_s1 + $0x6e0] sm:$0xff]  ;;  %3231 = vmatpush2.bf16.msra.mxu1 %v4755_v39 }
  0x36   :  { %v4748_v41 = vcombine.high %v241_v36, %v245_v37  ;;  %v105_v42 = vld [vmem:[%s7178_s1 + $0x280] sm:$0xff]  ;;  %3191 = vmatprep.subr.bf16.mxu0 %v4620_v40  ;;  %v4747_v47 = vcombine.low %v241_v36, %v245_v37 }
  0x37   :  { %v109_v43 = vld [vmem:[%s7178_s1 + $0x2a0] sm:$0xff]  ;;  %3192 = vmatpush2.bf16.msra.mxu0 %v4619_v46 }
  0x38   :  { %v233_v44 = vld [vmem:[%s7178_s1 + $0x680] sm:$0xff]  ;;  %v4612_v48 = vcombine.high %v105_v42, %v109_v43  ;;  %3232 = vmatprep.subr.bf16.mxu1 %v4748_v41  ;;  %v4611_v56 = vcombine.low %v105_v42, %v109_v43 }
  0x39   :  { %v237_v45 = vld [vmem:[%s7178_s1 + $0x6a0] sm:$0xff]  ;;  %3233 = vmatpush2.bf16.msra.mxu1 %v4747_v47 }
  0x3a   :  { %v4740_v49 = vcombine.high %v233_v44, %v237_v45  ;;  %v97_v50 = vld [vmem:[%s7178_s1 + $0x240] sm:$0xff]  ;;  %3193 = vmatprep.subr.bf16.mxu0 %v4612_v48  ;;  %v4739_v57 = vcombine.low %v233_v44, %v237_v45 }
  0x3b   :  { %v101_v51 = vld [vmem:[%s7178_s1 + $0x260] sm:$0xff]  ;;  %3194 = vmatpush2.bf16.msra.mxu0 %v4611_v56 }
  0x3c   :  { %v225_v52 = vld [vmem:[%s7178_s1 + $0x640] sm:$0xff]  ;;  %v4604_v60 = vcombine.high %v97_v50, %v101_v51  ;;  %3234 = vmatprep.subr.bf16.mxu1 %v4740_v49  ;;  %v4603_v2 = vcombine.low %v97_v50, %v101_v51 }
  0x3d   :  { %v229_v55 = vld [vmem:[%s7178_s1 + $0x660] sm:$0xff]  ;;  %3235 = vmatpush2.bf16.msra.mxu1 %v4739_v57 }
  0x3e   :  { %v4732_v61 = vcombine.high %v225_v52, %v229_v55  ;;  %v89_v62 = vld [vmem:[%s7178_s1 + $0x200] sm:$0xff]  ;;  %3195 = vmatprep.subr.bf16.mxu0 %v4604_v60  ;;  %v4731_v3 = vcombine.low %v225_v52, %v229_v55 }
  0x3f   :  { %v93_v63 = vld [vmem:[%s7178_s1 + $0x220] sm:$0xff]  ;;  %3196 = vmatpush2.bf16.msra.mxu0 %v4603_v2 }
  0x40   :  { %v217_v0 = vld [vmem:[%s7178_s1 + $0x600] sm:$0xff]  ;;  %v4596_v4 = vcombine.high %v89_v62, %v93_v63  ;;  %3236 = vmatprep.subr.bf16.mxu1 %v4732_v61  ;;  %v4595_v10 = vcombine.low %v89_v62, %v93_v63 }
  0x41   :  { %v221_v1 = vld [vmem:[%s7178_s1 + $0x620] sm:$0xff]  ;;  %3237 = vmatpush2.bf16.msra.mxu1 %v4731_v3 }
  0x42   :  { %v4724_v5 = vcombine.high %v217_v0, %v221_v1  ;;  %v337_v6 = vld [vmem:[%s7178_s1 + $0x9c0] sm:$0xff]  ;;  %3197 = vmatprep.subr.bf16.mxu0 %v4596_v4  ;;  %v4723_v11 = vcombine.low %v217_v0, %v221_v1 }
  0x43   :  { %v341_v7 = vld [vmem:[%s7178_s1 + $0x9e0] sm:$0xff]  ;;  %3198 = vmatpush2.bf16.msra.mxu0 %v4595_v10 }
  0x44   :  { %v465_v8 = vld [vmem:[%s7178_s1 + $0xdc0] sm:$0xff]  ;;  %v4844_v12 = vcombine.high %v337_v6, %v341_v7  ;;  %3238 = vmatprep.subr.bf16.mxu1 %v4724_v5  ;;  %v4843_v53 = vcombine.low %v337_v6, %v341_v7 }
  0x45   :  { %v469_v9 = vld [vmem:[%s7178_s1 + $0xde0] sm:$0xff]  ;;  %3239 = vmatpush2.bf16.msra.mxu1 %v4723_v11 }
  0x46   :  { %v4972_v13 = vcombine.high %v465_v8, %v469_v9  ;;  %v329_v14 = vld [vmem:[%s7178_s1 + $0x980] sm:$0xff]  ;;  %3249 = vmatprep.subr.bf16.mxu0 %v4844_v12  ;;  %v4971_v22 = vcombine.low %v465_v8, %v469_v9  ;;  %3200 = vmatmul.mubr.bf16.vlgmr.msra.gmra.mxu0 %v5531_v16 }
  0x47   :  { %v333_v15 = vld [vmem:[%s7178_s1 + $0x9a0] sm:$0xff]  ;;  %3250 = vmatpush1.bf16.msra.mxu0 %v4843_v53  ;;  %3281 = vmatprep.mubr.bf16.mxu0 %v5561_v26 }
  0x48   :  { %v457_v17 = vld [vmem:[%s7178_s1 + $0xd80] sm:$0xff]  ;;  %v4836_v23 = vcombine.high %v329_v14, %v333_v15  ;;  %3290 = vmatprep.subr.bf16.mxu1 %v4972_v13  ;;  %3241 = vmatmul.mubr.bf16.vlgmr.msra.gmra.mxu1 %v5546_v20  ;;  %v4835_v30 = vcombine.low %v329_v14, %v333_v15 }
  0x49   :  { %v461_v18 = vld [vmem:[%s7178_s1 + $0xda0] sm:$0xff]  ;;  %3291 = vmatpush1.bf16.msra.mxu1 %v4971_v22  ;;  %3322 = vmatprep.mubr.bf16.mxu1 %v5572_v29 }
  0x4a   :  { %v4964_v24 = vcombine.high %v457_v17, %v461_v18  ;;  %v321_v25 = vld [vmem:[%s7178_s1 + $0x940] sm:$0xff]  ;;  %3251 = vmatprep.subr.bf16.mxu0 %v4836_v23  ;;  %v4963_v31 = vcombine.low %v457_v17, %v461_v18 }
  0x4b   :  { %v325_v54 = vld [vmem:[%s7178_s1 + $0x960] sm:$0xff]  ;;  %3252 = vmatpush1.bf16.msra.mxu0 %v4835_v30 }
  0x4c   :  { %v449_v27 = vld [vmem:[%s7178_s1 + $0xd40] sm:$0xff]  ;;  %v4828_v32 = vcombine.high %v321_v25, %v325_v54  ;;  %3292 = vmatprep.subr.bf16.mxu1 %v4964_v24  ;;  %v4827_v38 = vcombine.low %v321_v25, %v325_v54 }
  0x4d   :  { %v453_v28 = vld [vmem:[%s7178_s1 + $0xd60] sm:$0xff]  ;;  %3293 = vmatpush1.bf16.msra.mxu1 %v4963_v31 }
  0x4e   :  { %v4956_v33 = vcombine.high %v449_v27, %v453_v28  ;;  %v313_v34 = vld [vmem:[%s7178_s1 + $0x900] sm:$0xff]  ;;  %3253 = vmatprep.subr.bf16.mxu0 %v4828_v32  ;;  %v4955_v39 = vcombine.low %v449_v27, %v453_v28 }
  0x4f   :  { %v317_v35 = vld [vmem:[%s7178_s1 + $0x920] sm:$0xff]  ;;  %3254 = vmatpush1.bf16.msra.mxu0 %v4827_v38 }
  0x50   :  { %v441_v36 = vld [vmem:[%s7178_s1 + $0xd00] sm:$0xff]  ;;  %v4820_v40 = vcombine.high %v313_v34, %v317_v35  ;;  %3294 = vmatprep.subr.bf16.mxu1 %v4956_v33  ;;  %v4819_v46 = vcombine.low %v313_v34, %v317_v35 }
  0x51   :  { %v445_v37 = vld [vmem:[%s7178_s1 + $0xd20] sm:$0xff]  ;;  %3295 = vmatpush1.bf16.msra.mxu1 %v4955_v39 }
  0x52   :  { %v4948_v41 = vcombine.high %v441_v36, %v445_v37  ;;  %v305_v42 = vld [vmem:[%s7178_s1 + $0x8c0] sm:$0xff]  ;;  %3255 = vmatprep.subr.bf16.mxu0 %v4820_v40  ;;  %v4947_v47 = vcombine.low %v441_v36, %v445_v37 }
  0x53   :  { %v309_v43 = vld [vmem:[%s7178_s1 + $0x8e0] sm:$0xff]  ;;  %3256 = vmatpush1.bf16.msra.mxu0 %v4819_v46 }
  0x54   :  { %v433_v44 = vld [vmem:[%s7178_s1 + $0xcc0] sm:$0xff]  ;;  %v4812_v48 = vcombine.high %v305_v42, %v309_v43  ;;  %3296 = vmatprep.subr.bf16.mxu1 %v4948_v41  ;;  %v4811_v56 = vcombine.low %v305_v42, %v309_v43 }
  0x55   :  { %v437_v45 = vld [vmem:[%s7178_s1 + $0xce0] sm:$0xff]  ;;  %3297 = vmatpush1.bf16.msra.mxu1 %v4947_v47 }
  0x56   :  { %v4940_v49 = vcombine.high %v433_v44, %v437_v45  ;;  %v297_v50 = vld [vmem:[%s7178_s1 + $0x880] sm:$0xff]  ;;  %3257 = vmatprep.subr.bf16.mxu0 %v4812_v48  ;;  %v4939_v57 = vcombine.low %v433_v44, %v437_v45 }
  0x57   :  { %v301_v51 = vld [vmem:[%s7178_s1 + $0x8a0] sm:$0xff]  ;;  %3258 = vmatpush1.bf16.msra.mxu0 %v4811_v56 }
  0x58   :  { %v425_v52 = vld [vmem:[%s7178_s1 + $0xc80] sm:$0xff]  ;;  %v4804_v60 = vcombine.high %v297_v50, %v301_v51  ;;  %3298 = vmatprep.subr.bf16.mxu1 %v4940_v49  ;;  %v4803_v2 = vcombine.low %v297_v50, %v301_v51 }
  0x59   :  { %v429_v55 = vld [vmem:[%s7178_s1 + $0xca0] sm:$0xff]  ;;  %3299 = vmatpush1.bf16.msra.mxu1 %v4939_v57 }
  0x5a   :  { %v4932_v61 = vcombine.high %v425_v52, %v429_v55  ;;  %v289_v62 = vld [vmem:[%s7178_s1 + $0x840] sm:$0xff]  ;;  %3259 = vmatprep.subr.bf16.mxu0 %v4804_v60  ;;  %v4931_v3 = vcombine.low %v425_v52, %v429_v55 }
  0x5b   :  { %v293_v63 = vld [vmem:[%s7178_s1 + $0x860] sm:$0xff]  ;;  %3260 = vmatpush1.bf16.msra.mxu0 %v4803_v2 }
  0x5c   :  { %v417_v0 = vld [vmem:[%s7178_s1 + $0xc40] sm:$0xff]  ;;  %v4796_v4 = vcombine.high %v289_v62, %v293_v63  ;;  %3300 = vmatprep.subr.bf16.mxu1 %v4932_v61  ;;  %v4795_v10 = vcombine.low %v289_v62, %v293_v63 }
  0x5d   :  { %v421_v1 = vld [vmem:[%s7178_s1 + $0xc60] sm:$0xff]  ;;  %3301 = vmatpush1.bf16.msra.mxu1 %v4931_v3 }
  0x5e   :  { %v4924_v5 = vcombine.high %v417_v0, %v421_v1  ;;  %v281_v6 = vld [vmem:[%s7178_s1 + $0x800] sm:$0xff]  ;;  %3261 = vmatprep.subr.bf16.mxu0 %v4796_v4  ;;  %v4923_v11 = vcombine.low %v417_v0, %v421_v1 }
  0x5f   :  { %v285_v7 = vld [vmem:[%s7178_s1 + $0x820] sm:$0xff]  ;;  %3262 = vmatpush1.bf16.msra.mxu0 %v4795_v10 }
  0x60   :  { %v409_v8 = vld [vmem:[%s7178_s1 + $0xc00] sm:$0xff]  ;;  %v4788_v12 = vcombine.high %v281_v6, %v285_v7  ;;  %3302 = vmatprep.subr.bf16.mxu1 %v4924_v5  ;;  %v4787_v53 = vcombine.low %v281_v6, %v285_v7 }
  0x61   :  { %v413_v9 = vld [vmem:[%s7178_s1 + $0xc20] sm:$0xff]  ;;  %3303 = vmatpush1.bf16.msra.mxu1 %v4923_v11 }
  0x62   :  { %v4916_v13 = vcombine.high %v409_v8, %v413_v9  ;;  %v401_v14 = vld [vmem:[%s7178_s1 + $0xbc0] sm:$0xff]  ;;  %3263 = vmatprep.subr.bf16.mxu0 %v4788_v12  ;;  %v4915_v22 = vcombine.low %v409_v8, %v413_v9 }
  0x63   :  { %v405_v15 = vld [vmem:[%s7178_s1 + $0xbe0] sm:$0xff]  ;;  %3264 = vmatpush1.bf16.msra.mxu0 %v4787_v53 }
  0x64   :  { %v529_v17 = vld [vmem:[%s7178_s1 + $0xfc0] sm:$0xff]  ;;  %v4908_v23 = vcombine.high %v401_v14, %v405_v15  ;;  %3304 = vmatprep.subr.bf16.mxu1 %v4916_v13  ;;  %v4907_v30 = vcombine.low %v401_v14, %v405_v15 }
  0x65   :  { %v533_v18 = vld [vmem:[%s7178_s1 + $0xfe0] sm:$0xff]  ;;  %3305 = vmatpush1.bf16.msra.mxu1 %v4915_v22 }
  0x66   :  { %v5036_v24 = vcombine.high %v529_v17, %v533_v18  ;;  %v393_v25 = vld [vmem:[%s7178_s1 + $0xb80] sm:$0xff]  ;;  %3265 = vmatprep.subr.bf16.mxu0 %v4908_v23  ;;  %v5035_v31 = vcombine.low %v529_v17, %v533_v18 }
  0x67   :  { %v397_v54 = vld [vmem:[%s7178_s1 + $0xba0] sm:$0xff]  ;;  %3266 = vmatpush2.bf16.msra.mxu0 %v4907_v30 }
  0x68   :  { %v521_v27 = vld [vmem:[%s7178_s1 + $0xf80] sm:$0xff]  ;;  %v4900_v32 = vcombine.high %v393_v25, %v397_v54  ;;  %3306 = vmatprep.subr.bf16.mxu1 %v5036_v24  ;;  %v4899_v38 = vcombine.low %v393_v25, %v397_v54  ;;  %v82_v25 = vld [vmem:[%s7178_s1 + $0x1c8] sm:$0xff] }
  0x69   :  { %v525_v28 = vld [vmem:[%s7178_s1 + $0xfa0] sm:$0xff]  ;;  %3307 = vmatpush2.bf16.msra.mxu1 %v5035_v31  ;;  %v86_v54 = vld [vmem:[%s7178_s1 + $0x1e8] sm:$0xff] }
  0x6a   :  { %v5028_v33 = vcombine.high %v521_v27, %v525_v28  ;;  %v385_v34 = vld [vmem:[%s7178_s1 + $0xb40] sm:$0xff]  ;;  %3267 = vmatprep.subr.bf16.mxu0 %v4900_v32  ;;  %v5027_v39 = vcombine.low %v521_v27, %v525_v28  ;;  %v210_v27 = vld [vmem:[%s7178_s1 + $0x5c8] sm:$0xff]  ;;  %v4590_v32 = vcombine.high %v82_v25, %v86_v54 }
  0x6b   :  { %v389_v35 = vld [vmem:[%s7178_s1 + $0xb60] sm:$0xff]  ;;  %3268 = vmatpush2.bf16.msra.mxu0 %v4899_v38  ;;  %v214_v28 = vld [vmem:[%s7178_s1 + $0x5e8] sm:$0xff] }
  0x6c   :  { %v513_v36 = vld [vmem:[%s7178_s1 + $0xf40] sm:$0xff]  ;;  %v4892_v40 = vcombine.high %v385_v34, %v389_v35  ;;  %3308 = vmatprep.subr.bf16.mxu1 %v5028_v33  ;;  %v4891_v46 = vcombine.low %v385_v34, %v389_v35  ;;  %v4718_v33 = vcombine.high %v210_v27, %v214_v28  ;;  %v74_v34 = vld [vmem:[%s7178_s1 + $0x188] sm:$0xff] }
  0x6d   :  { %v517_v37 = vld [vmem:[%s7178_s1 + $0xf60] sm:$0xff]  ;;  %3309 = vmatpush2.bf16.msra.mxu1 %v5027_v39  ;;  %v78_v35 = vld [vmem:[%s7178_s1 + $0x1a8] sm:$0xff]  ;;  %v5763_v39 = vcombine.low %v5551_v21, %v5551_v21 }
  0x6e   :  { %v5020_v41 = vcombine.high %v513_v36, %v517_v37  ;;  %v377_v42 = vld [vmem:[%s7178_s1 + $0xb00] sm:$0xff]  ;;  %3269 = vmatprep.subr.bf16.mxu0 %v4892_v40  ;;  %v5019_v47 = vcombine.low %v513_v36, %v517_v37  ;;  %v5753_v36 = vcombine.low %v5542_v19, %v5542_v19  ;;  %v202_v37 = vld [vmem:[%s7178_s1 + $0x588] sm:$0xff]  ;;  %v4589_v40 = vcombine.low %v82_v25, %v86_v54 }
  0x6f   :  { %v381_v43 = vld [vmem:[%s7178_s1 + $0xb20] sm:$0xff]  ;;  %3270 = vmatpush2.bf16.msra.mxu0 %v4891_v46  ;;  %v206_v38 = vld [vmem:[%s7178_s1 + $0x5a8] sm:$0xff]  ;;  %v4581_v46 = vcombine.low %v74_v34, %v78_v35 }
  0x70   :  { %v505_v44 = vld [vmem:[%s7178_s1 + $0xf00] sm:$0xff]  ;;  %v4884_v48 = vcombine.high %v377_v42, %v381_v43  ;;  %3310 = vmatprep.subr.bf16.mxu1 %v5020_v41  ;;  %v4883_v56 = vcombine.low %v377_v42, %v381_v43  ;;  %v4717_v41 = vcombine.low %v210_v27, %v214_v28  ;;  %v4582_v42 = vcombine.high %v74_v34, %v78_v35  ;;  %v66_v43 = vld [vmem:[%s7178_s1 + $0x148] sm:$0xff] }
  0x71   :  { %v509_v45 = vld [vmem:[%s7178_s1 + $0xf20] sm:$0xff]  ;;  %3311 = vmatpush2.bf16.msra.mxu1 %v5019_v47  ;;  %v4710_v19 = vcombine.high %v202_v37, %v206_v38  ;;  %v194_v21 = vld [vmem:[%s7178_s1 + $0x548] sm:$0xff]  ;;  %v4709_v47 = vcombine.low %v202_v37, %v206_v38 }
  0x72   :  { %v5012_v49 = vcombine.high %v505_v44, %v509_v45  ;;  %v369_v50 = vld [vmem:[%s7178_s1 + $0xac0] sm:$0xff]  ;;  %3271 = vmatprep.subr.bf16.mxu0 %v4884_v48  ;;  %v5011_v57 = vcombine.low %v505_v44, %v509_v45  ;;  %v70_v44 = vld [vmem:[%s7178_s1 + $0x168] sm:$0xff] }
  0x73   :  { %v373_v51 = vld [vmem:[%s7178_s1 + $0xae0] sm:$0xff]  ;;  %3272 = vmatpush2.bf16.msra.mxu0 %v4883_v56  ;;  %v198_v45 = vld [vmem:[%s7178_s1 + $0x568] sm:$0xff]  ;;  %v4574_v48 = vcombine.high %v66_v43, %v70_v44  ;;  %v4573_v56 = vcombine.low %v66_v43, %v70_v44 }
  0x74   :  { %v497_v52 = vld [vmem:[%s7178_s1 + $0xec0] sm:$0xff]  ;;  %v4876_v60 = vcombine.high %v369_v50, %v373_v51  ;;  %3312 = vmatprep.subr.bf16.mxu1 %v5012_v49  ;;  %v4875_v2 = vcombine.low %v369_v50, %v373_v51  ;;  %v4702_v49 = vcombine.high %v194_v21, %v198_v45  ;;  %v58_v50 = vld [vmem:[%s7178_s1 + $0x108] sm:$0xff] }
  0x75   :  { %v501_v55 = vld [vmem:[%s7178_s1 + $0xee0] sm:$0xff]  ;;  %3313 = vmatpush2.bf16.msra.mxu1 %v5011_v57  ;;  %v62_v51 = vld [vmem:[%s7178_s1 + $0x128] sm:$0xff]  ;;  %v4701_v57 = vcombine.low %v194_v21, %v198_v45 }
  0x76   :  { %v5004_v61 = vcombine.high %v497_v52, %v501_v55  ;;  %v361_v62 = vld [vmem:[%s7178_s1 + $0xa80] sm:$0xff]  ;;  %3273 = vmatprep.subr.bf16.mxu0 %v4876_v60  ;;  %v5003_v3 = vcombine.low %v497_v52, %v501_v55  ;;  %v186_v52 = vld [vmem:[%s7178_s1 + $0x508] sm:$0xff]  ;;  %v4566_v60 = vcombine.high %v58_v50, %v62_v51 }
  0x77   :  { %v365_v63 = vld [vmem:[%s7178_s1 + $0xaa0] sm:$0xff]  ;;  %3274 = vmatpush2.bf16.msra.mxu0 %v4875_v2  ;;  %v190_v55 = vld [vmem:[%s7178_s1 + $0x528] sm:$0xff]  ;;  %v4565_v2 = vcombine.low %v58_v50, %v62_v51 }
  0x78   :  { %v489_v0 = vld [vmem:[%s7178_s1 + $0xe80] sm:$0xff]  ;;  %v4868_v4 = vcombine.high %v361_v62, %v365_v63  ;;  %3314 = vmatprep.subr.bf16.mxu1 %v5004_v61  ;;  %v4867_v10 = vcombine.low %v361_v62, %v365_v63  ;;  %v4694_v61 = vcombine.high %v186_v52, %v190_v55  ;;  %v50_v62 = vld [vmem:[%s7178_s1 + $0xc8] sm:$0xff] }
  0x79   :  { %v493_v1 = vld [vmem:[%s7178_s1 + $0xea0] sm:$0xff]  ;;  %3315 = vmatpush2.bf16.msra.mxu1 %v5003_v3  ;;  %v54_v63 = vld [vmem:[%s7178_s1 + $0xe8] sm:$0xff]  ;;  %v4693_v3 = vcombine.low %v186_v52, %v190_v55 }
  0x7a   :  { %v4996_v5 = vcombine.high %v489_v0, %v493_v1  ;;  %v353_v6 = vld [vmem:[%s7178_s1 + $0xa40] sm:$0xff]  ;;  %3275 = vmatprep.subr.bf16.mxu0 %v4868_v4  ;;  %v4995_v11 = vcombine.low %v489_v0, %v493_v1  ;;  %v178_v0 = vld [vmem:[%s7178_s1 + $0x4c8] sm:$0xff]  ;;  %v4558_v4 = vcombine.high %v50_v62, %v54_v63 }
  0x7b   :  { %v357_v7 = vld [vmem:[%s7178_s1 + $0xa60] sm:$0xff]  ;;  %3276 = vmatpush2.bf16.msra.mxu0 %v4867_v10  ;;  %v182_v1 = vld [vmem:[%s7178_s1 + $0x4e8] sm:$0xff]  ;;  %v4557_v10 = vcombine.low %v50_v62, %v54_v63 }
  0x7c   :  { %v481_v8 = vld [vmem:[%s7178_s1 + $0xe40] sm:$0xff]  ;;  %v4860_v12 = vcombine.high %v353_v6, %v357_v7  ;;  %3316 = vmatprep.subr.bf16.mxu1 %v4996_v5  ;;  %v4859_v53 = vcombine.low %v353_v6, %v357_v7  ;;  %v4686_v5 = vcombine.high %v178_v0, %v182_v1  ;;  %v42_v6 = vld [vmem:[%s7178_s1 + $0x88] sm:$0xff] }
  0x7d   :  { %v485_v9 = vld [vmem:[%s7178_s1 + $0xe60] sm:$0xff]  ;;  %3317 = vmatpush2.bf16.msra.mxu1 %v4995_v11  ;;  %v46_v7 = vld [vmem:[%s7178_s1 + $0xa8] sm:$0xff]  ;;  %v4685_v11 = vcombine.low %v178_v0, %v182_v1 }
  0x7e   :  { %v4988_v13 = vcombine.high %v481_v8, %v485_v9  ;;  %v345_v14 = vld [vmem:[%s7178_s1 + $0xa00] sm:$0xff]  ;;  %3277 = vmatprep.subr.bf16.mxu0 %v4860_v12  ;;  %v4987_v22 = vcombine.low %v481_v8, %v485_v9  ;;  %v170_v8 = vld [vmem:[%s7178_s1 + $0x488] sm:$0xff]  ;;  %v4550_v12 = vcombine.high %v42_v6, %v46_v7 }
  0x7f   :  { %v349_v15 = vld [vmem:[%s7178_s1 + $0xa20] sm:$0xff]  ;;  %3278 = vmatpush2.bf16.msra.mxu0 %v4859_v53  ;;  %v174_v9 = vld [vmem:[%s7178_s1 + $0x4a8] sm:$0xff]  ;;  %v4549_v53 = vcombine.low %v42_v6, %v46_v7 }
  0x80   :  { %v473_v17 = vld [vmem:[%s7178_s1 + $0xe00] sm:$0xff]  ;;  %v4852_v23 = vcombine.high %v345_v14, %v349_v15  ;;  %3318 = vmatprep.subr.bf16.mxu1 %v4988_v13  ;;  %v4851_v30 = vcombine.low %v345_v14, %v349_v15  ;;  %v4678_v13 = vcombine.high %v170_v8, %v174_v9  ;;  %v34_v14 = vld [vmem:[%s7178_s1 + $0x48] sm:$0xff] }
  0x81   :  { %v477_v18 = vld [vmem:[%s7178_s1 + $0xe20] sm:$0xff]  ;;  %3319 = vmatpush2.bf16.msra.mxu1 %v4987_v22  ;;  %v38_v15 = vld [vmem:[%s7178_s1 + $0x68] sm:$0xff]  ;;  %v4677_v22 = vcombine.low %v170_v8, %v174_v9 }
  0x82   :  { %v4980_v24 = vcombine.high %v473_v17, %v477_v18  ;;  %3279 = vmatprep.subr.bf16.mxu0 %v4852_v23  ;;  %v4979_v31 = vcombine.low %v473_v17, %v477_v18  ;;  %v162_v17 = vld [vmem:[%s7178_s1 + $0x448] sm:$0xff]  ;;  %v4542_v23 = vcombine.high %v34_v14, %v38_v15 }
  0x83   :  { %3280 = vmatpush2.bf16.msra.mxu0 %v4851_v30  ;;  %v166_v18 = vld [vmem:[%s7178_s1 + $0x468] sm:$0xff]  ;;  %v4541_v30 = vcombine.low %v34_v14, %v38_v15 }
  0x84   :  { %3320 = vmatprep.subr.bf16.mxu1 %v4980_v24  ;;  %3331 = vmatprep.subr.bf16.mxu0 %v4590_v32  ;;  %v4670_v24 = vcombine.high %v162_v17, %v166_v18  ;;  %v26_v25 = vld [vmem:[%s7178_s1 + $0x8] sm:$0xff] }
  0x85   :  { %3321 = vmatpush2.bf16.msra.mxu1 %v4979_v31  ;;  %v30_v54 = vld [vmem:[%s7178_s1 + $0x28] sm:$0xff]  ;;  %v4669_v31 = vcombine.low %v162_v17, %v166_v18 }
  0x86   :  { %3372 = vmatprep.subr.bf16.mxu1 %v4718_v33  ;;  %3282 = vmatmul.mubr.bf16.vlgmr.msra.gmra.mxu0 %v5753_v36  ;;  %v154_v27 = vld [vmem:[%s7178_s1 + $0x408] sm:$0xff]  ;;  %v4534_v32 = vcombine.high %v26_v25, %v30_v54 }
  0x87   :  { %3332 = vmatpush1.bf16.msra.mxu0 %v4589_v40  ;;  %3363 = vmatprep.mubr.bf16.mxu0 %v5401_v58  ;;  %v158_v28 = vld [vmem:[%s7178_s1 + $0x428] sm:$0xff]  ;;  %v4533_v40 = vcombine.low %v26_v25, %v30_v54 }
  0x88   :  { %3323 = vmatmul.mubr.bf16.vlgmr.msra.gmra.mxu1 %v5763_v39  ;;  %3333 = vmatprep.subr.bf16.mxu0 %v4582_v42  ;;  %v4662_v33 = vcombine.high %v154_v27, %v158_v28  ;;  %v146_v34 = vld [vmem:[%s7178_s1 + $0x3c8] sm:$0xff] }
  0x89   :  { %3373 = vmatpush1.bf16.msra.mxu1 %v4717_v41  ;;  %3404 = vmatprep.mubr.bf16.mxu1 %v5405_v59  ;;  %v150_v35 = vld [vmem:[%s7178_s1 + $0x3e8] sm:$0xff]  ;;  %v4661_v41 = vcombine.low %v154_v27, %v158_v28 }
  0x8a   :  { %3374 = vmatprep.subr.bf16.mxu1 %v4710_v19  ;;  %v274_v37 = vld [vmem:[%s7178_s1 + $0x7c8] sm:$0xff]  ;;  %v4654_v42 = vcombine.high %v146_v34, %v150_v35 }
  0x8b   :  { %3334 = vmatpush1.bf16.msra.mxu0 %v4581_v46  ;;  %v278_v38 = vld [vmem:[%s7178_s1 + $0x7e8] sm:$0xff]  ;;  %v4653_v46 = vcombine.low %v146_v34, %v150_v35 }
  0x8c   :  { %3335 = vmatprep.subr.bf16.mxu0 %v4574_v48  ;;  %v4782_v19 = vcombine.high %v274_v37, %v278_v38  ;;  %v138_v43 = vld [vmem:[%s7178_s1 + $0x388] sm:$0xff] }
  0x8d   :  { %3375 = vmatpush1.bf16.msra.mxu1 %v4709_v47  ;;  %v142_v44 = vld [vmem:[%s7178_s1 + $0x3a8] sm:$0xff]  ;;  %v4781_v47 = vcombine.low %v274_v37, %v278_v38 }
  0x8e   :  { %3376 = vmatprep.subr.bf16.mxu1 %v4702_v49  ;;  %v266_v21 = vld [vmem:[%s7178_s1 + $0x788] sm:$0xff]  ;;  %v4646_v48 = vcombine.high %v138_v43, %v142_v44 }
  0x8f   :  { %3336 = vmatpush1.bf16.msra.mxu0 %v4573_v56  ;;  %v270_v45 = vld [vmem:[%s7178_s1 + $0x7a8] sm:$0xff]  ;;  %v4645_v56 = vcombine.low %v138_v43, %v142_v44 }
  0x90   :  { %3337 = vmatprep.subr.bf16.mxu0 %v4566_v60  ;;  %v4774_v49 = vcombine.high %v266_v21, %v270_v45  ;;  %v130_v50 = vld [vmem:[%s7178_s1 + $0x348] sm:$0xff] }
  0x91   :  { %3377 = vmatpush1.bf16.msra.mxu1 %v4701_v57  ;;  %v134_v51 = vld [vmem:[%s7178_s1 + $0x368] sm:$0xff]  ;;  %v4773_v57 = vcombine.low %v266_v21, %v270_v45 }
  0x92   :  { %3378 = vmatprep.subr.bf16.mxu1 %v4694_v61  ;;  %v258_v52 = vld [vmem:[%s7178_s1 + $0x748] sm:$0xff]  ;;  %v4638_v60 = vcombine.high %v130_v50, %v134_v51 }
  0x93   :  { %3338 = vmatpush1.bf16.msra.mxu0 %v4565_v2  ;;  %v262_v55 = vld [vmem:[%s7178_s1 + $0x768] sm:$0xff]  ;;  %v4637_v2 = vcombine.low %v130_v50, %v134_v51 }
  0x94   :  { %3339 = vmatprep.subr.bf16.mxu0 %v4558_v4  ;;  %v4766_v61 = vcombine.high %v258_v52, %v262_v55  ;;  %v122_v62 = vld [vmem:[%s7178_s1 + $0x308] sm:$0xff] }
  0x95   :  { %3379 = vmatpush1.bf16.msra.mxu1 %v4693_v3  ;;  %v126_v63 = vld [vmem:[%s7178_s1 + $0x328] sm:$0xff]  ;;  %v4765_v3 = vcombine.low %v258_v52, %v262_v55 }
  0x96   :  { %3380 = vmatprep.subr.bf16.mxu1 %v4686_v5  ;;  %v250_v0 = vld [vmem:[%s7178_s1 + $0x708] sm:$0xff]  ;;  %v4630_v4 = vcombine.high %v122_v62, %v126_v63 }
  0x97   :  { %3340 = vmatpush1.bf16.msra.mxu0 %v4557_v10  ;;  %v254_v1 = vld [vmem:[%s7178_s1 + $0x728] sm:$0xff]  ;;  %v4629_v10 = vcombine.low %v122_v62, %v126_v63 }
  0x98   :  { %3341 = vmatprep.subr.bf16.mxu0 %v4550_v12  ;;  %v4758_v5 = vcombine.high %v250_v0, %v254_v1  ;;  %v114_v6 = vld [vmem:[%s7178_s1 + $0x2c8] sm:$0xff] }
  0x99   :  { %3381 = vmatpush1.bf16.msra.mxu1 %v4685_v11  ;;  %v118_v7 = vld [vmem:[%s7178_s1 + $0x2e8] sm:$0xff]  ;;  %v4757_v11 = vcombine.low %v250_v0, %v254_v1 }
  0x9a   :  { %3382 = vmatprep.subr.bf16.mxu1 %v4678_v13  ;;  %v242_v8 = vld [vmem:[%s7178_s1 + $0x6c8] sm:$0xff]  ;;  %v4622_v12 = vcombine.high %v114_v6, %v118_v7 }
  0x9b   :  { %3342 = vmatpush1.bf16.msra.mxu0 %v4549_v53  ;;  %v246_v9 = vld [vmem:[%s7178_s1 + $0x6e8] sm:$0xff]  ;;  %v4621_v53 = vcombine.low %v114_v6, %v118_v7 }
  0x9c   :  { %3343 = vmatprep.subr.bf16.mxu0 %v4542_v23  ;;  %v4750_v13 = vcombine.high %v242_v8, %v246_v9  ;;  %v106_v14 = vld [vmem:[%s7178_s1 + $0x288] sm:$0xff] }
  0x9d   :  { %3383 = vmatpush1.bf16.msra.mxu1 %v4677_v22  ;;  %v110_v15 = vld [vmem:[%s7178_s1 + $0x2a8] sm:$0xff]  ;;  %v4749_v22 = vcombine.low %v242_v8, %v246_v9 }
  0x9e   :  { %3384 = vmatprep.subr.bf16.mxu1 %v4670_v24  ;;  %v234_v17 = vld [vmem:[%s7178_s1 + $0x688] sm:$0xff]  ;;  %v4614_v23 = vcombine.high %v106_v14, %v110_v15 }
  0x9f   :  { %3344 = vmatpush1.bf16.msra.mxu0 %v4541_v30  ;;  %v238_v18 = vld [vmem:[%s7178_s1 + $0x6a8] sm:$0xff]  ;;  %v4613_v30 = vcombine.low %v106_v14, %v110_v15 }
  0xa0   :  { %3345 = vmatprep.subr.bf16.mxu0 %v4534_v32  ;;  %v4742_v24 = vcombine.high %v234_v17, %v238_v18  ;;  %v98_v25 = vld [vmem:[%s7178_s1 + $0x248] sm:$0xff] }
  0xa1   :  { %3385 = vmatpush1.bf16.msra.mxu1 %v4669_v31  ;;  %v102_v54 = vld [vmem:[%s7178_s1 + $0x268] sm:$0xff]  ;;  %v4741_v31 = vcombine.low %v234_v17, %v238_v18 }
  0xa2   :  { %3386 = vmatprep.subr.bf16.mxu1 %v4662_v33  ;;  %v226_v27 = vld [vmem:[%s7178_s1 + $0x648] sm:$0xff]  ;;  %v4606_v32 = vcombine.high %v98_v25, %v102_v54 }
  0xa3   :  { %3346 = vmatpush1.bf16.msra.mxu0 %v4533_v40  ;;  %v230_v28 = vld [vmem:[%s7178_s1 + $0x668] sm:$0xff]  ;;  %v4605_v40 = vcombine.low %v98_v25, %v102_v54 }
  0xa4   :  { %3347 = vmatprep.subr.bf16.mxu0 %v4654_v42  ;;  %v4734_v33 = vcombine.high %v226_v27, %v230_v28  ;;  %v90_v34 = vld [vmem:[%s7178_s1 + $0x208] sm:$0xff] }
  0xa5   :  { %3387 = vmatpush1.bf16.msra.mxu1 %v4661_v41  ;;  %v94_v35 = vld [vmem:[%s7178_s1 + $0x228] sm:$0xff]  ;;  %v4733_v41 = vcombine.low %v226_v27, %v230_v28 }
  0xa6   :  { %3388 = vmatprep.subr.bf16.mxu1 %v4782_v19  ;;  %v218_v37 = vld [vmem:[%s7178_s1 + $0x608] sm:$0xff]  ;;  %v4598_v42 = vcombine.high %v90_v34, %v94_v35 }
  0xa7   :  { %3348 = vmatpush2.bf16.msra.mxu0 %v4653_v46  ;;  %v222_v38 = vld [vmem:[%s7178_s1 + $0x628] sm:$0xff]  ;;  %v4597_v46 = vcombine.low %v90_v34, %v94_v35 }
  0xa8   :  { %3349 = vmatprep.subr.bf16.mxu0 %v4646_v48  ;;  %v4726_v19 = vcombine.high %v218_v37, %v222_v38  ;;  %v338_v43 = vld [vmem:[%s7178_s1 + $0x9c8] sm:$0xff] }
  0xa9   :  { %3389 = vmatpush2.bf16.msra.mxu1 %v4781_v47  ;;  %v342_v44 = vld [vmem:[%s7178_s1 + $0x9e8] sm:$0xff]  ;;  %v4725_v47 = vcombine.low %v218_v37, %v222_v38 }
  0xaa   :  { %3390 = vmatprep.subr.bf16.mxu1 %v4774_v49  ;;  %v466_v21 = vld [vmem:[%s7178_s1 + $0xdc8] sm:$0xff]  ;;  %v4846_v48 = vcombine.high %v338_v43, %v342_v44 }
  0xab   :  { %3350 = vmatpush2.bf16.msra.mxu0 %v4645_v56  ;;  %v470_v45 = vld [vmem:[%s7178_s1 + $0xde8] sm:$0xff]  ;;  %v4845_v56 = vcombine.low %v338_v43, %v342_v44 }
  0xac   :  { %3351 = vmatprep.subr.bf16.mxu0 %v4638_v60  ;;  %v4974_v49 = vcombine.high %v466_v21, %v470_v45  ;;  %v330_v50 = vld [vmem:[%s7178_s1 + $0x988] sm:$0xff] }
  0xad   :  { %3391 = vmatpush2.bf16.msra.mxu1 %v4773_v57  ;;  %v334_v51 = vld [vmem:[%s7178_s1 + $0x9a8] sm:$0xff]  ;;  %v4973_v57 = vcombine.low %v466_v21, %v470_v45 }
  0xae   :  { %3392 = vmatprep.subr.bf16.mxu1 %v4766_v61  ;;  %v458_v52 = vld [vmem:[%s7178_s1 + $0xd88] sm:$0xff]  ;;  %v4838_v60 = vcombine.high %v330_v50, %v334_v51 }
  0xaf   :  { %3352 = vmatpush2.bf16.msra.mxu0 %v4637_v2  ;;  %v462_v55 = vld [vmem:[%s7178_s1 + $0xda8] sm:$0xff]  ;;  %v4837_v2 = vcombine.low %v330_v50, %v334_v51 }
  0xb0   :  { %3353 = vmatprep.subr.bf16.mxu0 %v4630_v4  ;;  %v4966_v61 = vcombine.high %v458_v52, %v462_v55  ;;  %v322_v62 = vld [vmem:[%s7178_s1 + $0x948] sm:$0xff] }
  0xb1   :  { %3393 = vmatpush2.bf16.msra.mxu1 %v4765_v3  ;;  %v326_v63 = vld [vmem:[%s7178_s1 + $0x968] sm:$0xff]  ;;  %v4965_v3 = vcombine.low %v458_v52, %v462_v55 }
  0xb2   :  { %3394 = vmatprep.subr.bf16.mxu1 %v4758_v5  ;;  %v450_v0 = vld [vmem:[%s7178_s1 + $0xd48] sm:$0xff]  ;;  %v4830_v4 = vcombine.high %v322_v62, %v326_v63 }
  0xb3   :  { %3354 = vmatpush2.bf16.msra.mxu0 %v4629_v10  ;;  %v454_v1 = vld [vmem:[%s7178_s1 + $0xd68] sm:$0xff]  ;;  %v4829_v10 = vcombine.low %v322_v62, %v326_v63 }
  0xb4   :  { %3355 = vmatprep.subr.bf16.mxu0 %v4622_v12  ;;  %v4958_v5 = vcombine.high %v450_v0, %v454_v1  ;;  %v314_v6 = vld [vmem:[%s7178_s1 + $0x908] sm:$0xff] }
  0xb5   :  { %3395 = vmatpush2.bf16.msra.mxu1 %v4757_v11  ;;  %v318_v7 = vld [vmem:[%s7178_s1 + $0x928] sm:$0xff]  ;;  %v4957_v11 = vcombine.low %v450_v0, %v454_v1 }
  0xb6   :  { %3396 = vmatprep.subr.bf16.mxu1 %v4750_v13  ;;  %v442_v8 = vld [vmem:[%s7178_s1 + $0xd08] sm:$0xff]  ;;  %v4822_v12 = vcombine.high %v314_v6, %v318_v7 }
  0xb7   :  { %3356 = vmatpush2.bf16.msra.mxu0 %v4621_v53  ;;  %v446_v9 = vld [vmem:[%s7178_s1 + $0xd28] sm:$0xff]  ;;  %v4821_v53 = vcombine.low %v314_v6, %v318_v7 }
  0xb8   :  { %3357 = vmatprep.subr.bf16.mxu0 %v4614_v23  ;;  %v4950_v13 = vcombine.high %v442_v8, %v446_v9  ;;  %v306_v14 = vld [vmem:[%s7178_s1 + $0x8c8] sm:$0xff] }
  0xb9   :  { %3397 = vmatpush2.bf16.msra.mxu1 %v4749_v22  ;;  %v310_v15 = vld [vmem:[%s7178_s1 + $0x8e8] sm:$0xff]  ;;  %v4949_v22 = vcombine.low %v442_v8, %v446_v9 }
  0xba   :  { %3398 = vmatprep.subr.bf16.mxu1 %v4742_v24  ;;  %v434_v17 = vld [vmem:[%s7178_s1 + $0xcc8] sm:$0xff]  ;;  %v4814_v23 = vcombine.high %v306_v14, %v310_v15 }
  0xbb   :  { %3358 = vmatpush2.bf16.msra.mxu0 %v4613_v30  ;;  %v438_v18 = vld [vmem:[%s7178_s1 + $0xce8] sm:$0xff]  ;;  %v4813_v30 = vcombine.low %v306_v14, %v310_v15 }
  0xbc   :  { %3359 = vmatprep.subr.bf16.mxu0 %v4606_v32  ;;  %v4942_v24 = vcombine.high %v434_v17, %v438_v18  ;;  %v298_v25 = vld [vmem:[%s7178_s1 + $0x888] sm:$0xff] }
  0xbd   :  { %3399 = vmatpush2.bf16.msra.mxu1 %v4741_v31  ;;  %v302_v54 = vld [vmem:[%s7178_s1 + $0x8a8] sm:$0xff]  ;;  %v4941_v31 = vcombine.low %v434_v17, %v438_v18 }
  0xbe   :  { %3400 = vmatprep.subr.bf16.mxu1 %v4734_v33  ;;  %v426_v27 = vld [vmem:[%s7178_s1 + $0xc88] sm:$0xff]  ;;  %v4806_v32 = vcombine.high %v298_v25, %v302_v54 }
  0xbf   :  { %3360 = vmatpush2.bf16.msra.mxu0 %v4605_v40  ;;  %v430_v28 = vld [vmem:[%s7178_s1 + $0xca8] sm:$0xff]  ;;  %v4805_v40 = vcombine.low %v298_v25, %v302_v54 }
  0xc0   :  { %3361 = vmatprep.subr.bf16.mxu0 %v4598_v42  ;;  %v4934_v33 = vcombine.high %v426_v27, %v430_v28  ;;  %v290_v34 = vld [vmem:[%s7178_s1 + $0x848] sm:$0xff] }
  0xc1   :  { %3401 = vmatpush2.bf16.msra.mxu1 %v4733_v41  ;;  %v294_v35 = vld [vmem:[%s7178_s1 + $0x868] sm:$0xff]  ;;  %v4933_v41 = vcombine.low %v426_v27, %v430_v28 }
  0xc2   :  { %3402 = vmatprep.subr.bf16.mxu1 %v4726_v19  ;;  %v418_v37 = vld [vmem:[%s7178_s1 + $0xc48] sm:$0xff]  ;;  %v4798_v42 = vcombine.high %v290_v34, %v294_v35 }
  0xc3   :  { %3362 = vmatpush2.bf16.msra.mxu0 %v4597_v46  ;;  %v422_v38 = vld [vmem:[%s7178_s1 + $0xc68] sm:$0xff]  ;;  %v4797_v46 = vcombine.low %v290_v34, %v294_v35 }
  0xc4   :  { %3413 = vmatprep.subr.bf16.mxu0 %v4846_v48  ;;  %v4926_v19 = vcombine.high %v418_v37, %v422_v38  ;;  %v282_v43 = vld [vmem:[%s7178_s1 + $0x808] sm:$0xff] }
  0xc5   :  { %3403 = vmatpush2.bf16.msra.mxu1 %v4725_v47  ;;  %v286_v44 = vld [vmem:[%s7178_s1 + $0x828] sm:$0xff]  ;;  %v4925_v47 = vcombine.low %v418_v37, %v422_v38 }
  0xc6   :  { %3454 = vmatprep.subr.bf16.mxu1 %v4974_v49  ;;  %3364 = vmatmul.mubr.bf16.vlgmr.msra.gmra.mxu0 %v5531_v16  ;;  %v410_v21 = vld [vmem:[%s7178_s1 + $0xc08] sm:$0xff]  ;;  %v4790_v48 = vcombine.high %v282_v43, %v286_v44 }
  0xc7   :  { %3414 = vmatpush1.bf16.msra.mxu0 %v4845_v56  ;;  %3445 = vmatprep.mubr.bf16.mxu0 %v5561_v26  ;;  %v414_v45 = vld [vmem:[%s7178_s1 + $0xc28] sm:$0xff]  ;;  %v4789_v56 = vcombine.low %v282_v43, %v286_v44 }
  0xc8   :  { %3405 = vmatmul.mubr.bf16.vlgmr.msra.gmra.mxu1 %v5546_v20  ;;  %3415 = vmatprep.subr.bf16.mxu0 %v4838_v60  ;;  %v4918_v49 = vcombine.high %v410_v21, %v414_v45  ;;  %v402_v50 = vld [vmem:[%s7178_s1 + $0xbc8] sm:$0xff] }
  0xc9   :  { %3455 = vmatpush1.bf16.msra.mxu1 %v4973_v57  ;;  %3486 = vmatprep.mubr.bf16.mxu1 %v5572_v29  ;;  %v406_v51 = vld [vmem:[%s7178_s1 + $0xbe8] sm:$0xff]  ;;  %v4917_v57 = vcombine.low %v410_v21, %v414_v45 }
  0xca   :  { %3456 = vmatprep.subr.bf16.mxu1 %v4966_v61  ;;  %v530_v52 = vld [vmem:[%s7178_s1 + $0xfc8] sm:$0xff]  ;;  %v4910_v60 = vcombine.high %v402_v50, %v406_v51 }
  0xcb   :  { %3416 = vmatpush1.bf16.msra.mxu0 %v4837_v2  ;;  %v534_v55 = vld [vmem:[%s7178_s1 + $0xfe8] sm:$0xff]  ;;  %v4909_v2 = vcombine.low %v402_v50, %v406_v51 }
  0xcc   :  { %3417 = vmatprep.subr.bf16.mxu0 %v4830_v4  ;;  %v5038_v61 = vcombine.high %v530_v52, %v534_v55  ;;  %v394_v62 = vld [vmem:[%s7178_s1 + $0xb88] sm:$0xff] }
  0xcd   :  { %3457 = vmatpush1.bf16.msra.mxu1 %v4965_v3  ;;  %v398_v63 = vld [vmem:[%s7178_s1 + $0xba8] sm:$0xff]  ;;  %v5037_v3 = vcombine.low %v530_v52, %v534_v55 }
  0xce   :  { %3458 = vmatprep.subr.bf16.mxu1 %v4958_v5  ;;  %v522_v0 = vld [vmem:[%s7178_s1 + $0xf88] sm:$0xff]  ;;  %v4902_v4 = vcombine.high %v394_v62, %v398_v63 }
  0xcf   :  { %3418 = vmatpush1.bf16.msra.mxu0 %v4829_v10  ;;  %v526_v1 = vld [vmem:[%s7178_s1 + $0xfa8] sm:$0xff]  ;;  %v4901_v10 = vcombine.low %v394_v62, %v398_v63 }
  0xd0   :  { %3419 = vmatprep.subr.bf16.mxu0 %v4822_v12  ;;  %v5030_v5 = vcombine.high %v522_v0, %v526_v1  ;;  %v386_v6 = vld [vmem:[%s7178_s1 + $0xb48] sm:$0xff] }
  0xd1   :  { %3459 = vmatpush1.bf16.msra.mxu1 %v4957_v11  ;;  %v390_v7 = vld [vmem:[%s7178_s1 + $0xb68] sm:$0xff]  ;;  %v5029_v11 = vcombine.low %v522_v0, %v526_v1  ;;  %v83_v0 = vld [vmem:[%s7178_s1 + $0x1d0] sm:$0xff] }
  0xd2   :  { %3460 = vmatprep.subr.bf16.mxu1 %v4950_v13  ;;  %v514_v8 = vld [vmem:[%s7178_s1 + $0xf48] sm:$0xff]  ;;  %v4894_v12 = vcombine.high %v386_v6, %v390_v7  ;;  %v87_v1 = vld [vmem:[%s7178_s1 + $0x1f0] sm:$0xff] }
  0xd3   :  { %3420 = vmatpush1.bf16.msra.mxu0 %v4821_v53  ;;  %v518_v9 = vld [vmem:[%s7178_s1 + $0xf68] sm:$0xff]  ;;  %v4893_v53 = vcombine.low %v386_v6, %v390_v7  ;;  %v6151_v7 = vld [vmem:[%s7180_s2] sm:$0xff] }
  0xd4   :  { %3421 = vmatprep.subr.bf16.mxu0 %v4814_v23  ;;  %v5022_v13 = vcombine.high %v514_v8, %v518_v9  ;;  %v378_v14 = vld [vmem:[%s7178_s1 + $0xb08] sm:$0xff] }
  0xd5   :  { %3461 = vmatpush1.bf16.msra.mxu1 %v4949_v22  ;;  %v382_v15 = vld [vmem:[%s7178_s1 + $0xb28] sm:$0xff]  ;;  %v5021_v22 = vcombine.low %v514_v8, %v518_v9  ;;  %v4592_v8 = vcombine.high %v83_v0, %v87_v1 }
  0xd6   :  { %3462 = vmatprep.subr.bf16.mxu1 %v4942_v24  ;;  %v506_v17 = vld [vmem:[%s7178_s1 + $0xf08] sm:$0xff]  ;;  %v4886_v23 = vcombine.high %v378_v14, %v382_v15 }
  0xd7   :  { %3422 = vmatpush1.bf16.msra.mxu0 %v4813_v30  ;;  %v510_v18 = vld [vmem:[%s7178_s1 + $0xf28] sm:$0xff]  ;;  %v4885_v30 = vcombine.low %v378_v14, %v382_v15  ;;  %v207_v14 = vld [vmem:[%s7178_s1 + $0x5b0] sm:$0xff] }
  0xd8   :  { %3423 = vmatprep.subr.bf16.mxu0 %v4806_v32  ;;  %v5014_v24 = vcombine.high %v506_v17, %v510_v18  ;;  %v370_v25 = vld [vmem:[%s7178_s1 + $0xac8] sm:$0xff] }
  0xd9   :  { %3463 = vmatpush1.bf16.msra.mxu1 %v4941_v31  ;;  %v374_v54 = vld [vmem:[%s7178_s1 + $0xae8] sm:$0xff]  ;;  %v5013_v31 = vcombine.low %v506_v17, %v510_v18  ;;  %v4591_v17 = vcombine.low %v83_v0, %v87_v1 }
  0xda   :  { %3464 = vmatprep.subr.bf16.mxu1 %v4934_v33  ;;  %v498_v27 = vld [vmem:[%s7178_s1 + $0xec8] sm:$0xff]  ;;  %v4878_v32 = vcombine.high %v370_v25, %v374_v54 }
  0xdb   :  { %3424 = vmatpush1.bf16.msra.mxu0 %v4805_v40  ;;  %v502_v28 = vld [vmem:[%s7178_s1 + $0xee8] sm:$0xff]  ;;  %v4877_v40 = vcombine.low %v370_v25, %v374_v54  ;;  %v71_v25 = vld [vmem:[%s7178_s1 + $0x170] sm:$0xff] }
  0xdc   :  { %3425 = vmatprep.subr.bf16.mxu0 %v4798_v42  ;;  %v5006_v33 = vcombine.high %v498_v27, %v502_v28  ;;  %v362_v34 = vld [vmem:[%s7178_s1 + $0xa88] sm:$0xff] }
  0xdd   :  { %3465 = vmatpush1.bf16.msra.mxu1 %v4933_v41  ;;  %v366_v35 = vld [vmem:[%s7178_s1 + $0xaa8] sm:$0xff]  ;;  %v5005_v41 = vcombine.low %v498_v27, %v502_v28  ;;  %v195_v27 = vld [vmem:[%s7178_s1 + $0x550] sm:$0xff] }
  0xde   :  { %3466 = vmatprep.subr.bf16.mxu1 %v4926_v19  ;;  %v490_v37 = vld [vmem:[%s7178_s1 + $0xe88] sm:$0xff]  ;;  %v4870_v42 = vcombine.high %v362_v34, %v366_v35  ;;  %v199_v28 = vld [vmem:[%s7178_s1 + $0x570] sm:$0xff] }
  0xdf   :  { %3426 = vmatpush1.bf16.msra.mxu0 %v4797_v46  ;;  %v494_v38 = vld [vmem:[%s7178_s1 + $0xea8] sm:$0xff]  ;;  %v4869_v46 = vcombine.low %v362_v34, %v366_v35 }
  0xe0   :  { %3427 = vmatprep.subr.bf16.mxu0 %v4790_v48  ;;  %v4998_v19 = vcombine.high %v490_v37, %v494_v38  ;;  %v354_v43 = vld [vmem:[%s7178_s1 + $0xa48] sm:$0xff]  ;;  %v4997_v48 = vcombine.low %v490_v37, %v494_v38 }
  0xe1   :  { %3467 = vmatpush1.bf16.msra.mxu1 %v4925_v47  ;;  %v358_v44 = vld [vmem:[%s7178_s1 + $0xa68] sm:$0xff]  ;;  %v539_v47 = vlaneseq }
  0xe2   :  { %3468 = vmatprep.subr.bf16.mxu1 %v4918_v49  ;;  %v482_v21 = vld [vmem:[%s7178_s1 + $0xe48] sm:$0xff]  ;;  %v4862_v49 = vcombine.high %v354_v43, %v358_v44 }
  0xe3   :  { %3428 = vmatpush1.bf16.msra.mxu0 %v4789_v56  ;;  %v486_v45 = vld [vmem:[%s7178_s1 + $0xe68] sm:$0xff] }
  0xe4   :  { %3429 = vmatprep.subr.bf16.mxu0 %v4910_v60  ;;  %v4990_v50 = vcombine.high %v482_v21, %v486_v45  ;;  %v346_v51 = vld [vmem:[%s7178_s1 + $0xa08] sm:$0xff]  ;;  %v6133_v60 = vshrl.u32 %v539_v47, 7 }
  0xe5   :  { %3469 = vmatpush1.bf16.msra.mxu1 %v4917_v57  ;;  %v350_v52 = vld [vmem:[%s7178_s1 + $0xa28] sm:$0xff]  ;;  %v4861_v57 = vcombine.low %v354_v43, %v358_v44  ;;  %v187_v44 = vld [vmem:[%s7178_s1 + $0x510] sm:$0xff] }
  0xe6   :  { %3470 = vmatprep.subr.bf16.mxu1 %v5038_v61  ;;  %v474_v55 = vld [vmem:[%s7178_s1 + $0xe08] sm:$0xff]  ;;  %v4989_v61 = vcombine.low %v482_v21, %v486_v45  ;;  %v4854_v62 = vcombine.high %v346_v51, %v350_v52  ;;  %v191_v21 = vld [vmem:[%s7178_s1 + $0x530] sm:$0xff] }
  0xe7   :  { %3430 = vmatpush2.bf16.msra.mxu0 %v4909_v2  ;;  %v478_v56 = vld [vmem:[%s7178_s1 + $0xe28] sm:$0xff]  ;;  %v211_v2 = vld [vmem:[%s7178_s1 + $0x5d0] sm:$0xff] }
  0xe8   :  { %3431 = vmatprep.subr.bf16.mxu0 %v4902_v4  ;;  %v4982_v63 = vcombine.high %v474_v55, %v478_v56  ;;  %v4853_v4 = vcombine.low %v346_v51, %v350_v52  ;;  %v4981_v6 = vcombine.low %v474_v55, %v478_v56  ;;  %v4696_v52 = vcombine.high %v187_v44, %v191_v21  ;;  %v51_v55 = vld [vmem:[%s7178_s1 + $0xd0] sm:$0xff] }
  0xe9   :  { %3471 = vmatpush2.bf16.msra.mxu1 %v5037_v3  ;;  %v215_v3 = vld [vmem:[%s7178_s1 + $0x5f0] sm:$0xff] }
  0xea   :  { %3472 = vmatprep.subr.bf16.mxu1 %v5030_v5  ;;  %v541_v5 = vsub.s32 0, %v6133_v60  ;;  %v4720_v9 = vcombine.high %v211_v2, %v215_v3  ;;  %v4719_v18 = vcombine.low %v211_v2, %v215_v3  ;;  %v55_v56 = vld [vmem:[%s7178_s1 + $0xf0] sm:$0xff] }
  0xeb   :  { %3432 = vmatpush2.bf16.msra.mxu0 %v4901_v10  ;;  %v545_v10 = vsub.s32 1, %v6133_v60  ;;  %v4560_v0 = vcombine.high %v51_v55, %v55_v56  ;;  %v43_v2 = vld [vmem:[%s7178_s1 + $0x90] sm:$0xff] }
  0xec   :  { %3433 = vmatprep.subr.bf16.mxu0 %v4894_v12  ;;  %v79_v12 = vld [vmem:[%s7178_s1 + $0x1b0] sm:$0xff]  ;;  %v542_v15 = vrot.slane %v6151_v7, %v541_v5 }
  0xed   :  { %3473 = vmatpush2.bf16.msra.mxu1 %v5029_v11  ;;  %v75_v11 = vld [vmem:[%s7178_s1 + $0x190] sm:$0xff] }
  0xee   :  { %3474 = vmatprep.subr.bf16.mxu1 %v5022_v13  ;;  %v203_v13 = vld [vmem:[%s7178_s1 + $0x590] sm:$0xff] }
  0xef   :  { %3434 = vmatpush2.bf16.msra.mxu0 %v4893_v53  ;;  %v4584_v53 = vcombine.high %v75_v11, %v79_v12  ;;  %v4711_v34 = vcombine.low %v203_v13, %v207_v14  ;;  %v47_v3 = vld [vmem:[%s7178_s1 + $0xb0] sm:$0xff] }
  0xf0   :  { %3435 = vmatprep.subr.bf16.mxu0 %v4886_v23  ;;  %v4712_v23 = vcombine.high %v203_v13, %v207_v14  ;;  %v175_v5 = vld [vmem:[%s7178_s1 + $0x4b0] sm:$0xff] }
  0xf1   :  { %3475 = vmatpush2.bf16.msra.mxu1 %v5021_v22  ;;  %v546_v22 = vrot.slane %v6151_v7, %v545_v10  ;;  %v163_v13 = vld [vmem:[%s7178_s1 + $0x450] sm:$0xff] }
  0xf2   :  { %3476 = vmatprep.subr.bf16.mxu1 %v5014_v24  ;;  %v67_v24 = vld [vmem:[%s7178_s1 + $0x150] sm:$0xff] }
  0xf3   :  { %3436 = vmatpush2.bf16.msra.mxu0 %v4885_v30  ;;  %v4576_v35 = vcombine.high %v67_v24, %v71_v25  ;;  %v4575_v47 = vcombine.low %v67_v24, %v71_v25  ;;  %v167_v14 = vld [vmem:[%s7178_s1 + $0x470] sm:$0xff] }
  0xf4   :  { %3437 = vmatprep.subr.bf16.mxu0 %v4878_v32  ;;  %v4583_v32 = vcombine.low %v75_v11, %v79_v12  ;;  %v35_v11 = vld [vmem:[%s7178_s1 + $0x50] sm:$0xff] }
  0xf5   :  { %3477 = vmatpush2.bf16.msra.mxu1 %v5013_v31  ;;  %v39_v12 = vld [vmem:[%s7178_s1 + $0x70] sm:$0xff] }
  0xf6   :  { %3478 = vmatprep.subr.bf16.mxu1 %v5006_v33  ;;  %v155_v24 = vld [vmem:[%s7178_s1 + $0x410] sm:$0xff] }
  0xf7   :  { %3438 = vmatpush2.bf16.msra.mxu0 %v4877_v40  ;;  %v159_v25 = vld [vmem:[%s7178_s1 + $0x430] sm:$0xff] }
  0xf8   :  { %3439 = vmatprep.subr.bf16.mxu0 %v4870_v42  ;;  %v59_v42 = vld [vmem:[%s7178_s1 + $0x110] sm:$0xff] }
  0xf9   :  { %3479 = vmatpush2.bf16.msra.mxu1 %v5005_v41  ;;  %v4704_v41 = vcombine.high %v195_v27, %v199_v28 }
  0xfa   :  { %3480 = vmatprep.subr.bf16.mxu1 %v4998_v19  ;;  %v63_v19 = vld [vmem:[%s7178_s1 + $0x130] sm:$0xff] }
  0xfb   :  { %3440 = vmatpush2.bf16.msra.mxu0 %v4869_v46 }
  0xfc   :  { %3441 = vmatprep.subr.bf16.mxu0 %v4862_v49  ;;  %v4703_v49 = vcombine.low %v195_v27, %v199_v28  ;;  %v4671_v27 = vcombine.low %v163_v13, %v167_v14 }
  0xfd   :  { %3481 = vmatpush2.bf16.msra.mxu1 %v4997_v48 }
  0xfe   :  { %3482 = vmatprep.subr.bf16.mxu1 %v4990_v50  ;;  %v4568_v50 = vcombine.high %v59_v42, %v63_v19 }
  0xff   :  { %3442 = vmatpush2.bf16.msra.mxu0 %v4861_v57  ;;  %v179_v57 = vld [vmem:[%s7178_s1 + $0x4d0] sm:$0xff] }
 0x100   :  { %3443 = vmatprep.subr.bf16.mxu0 %v4854_v62  ;;  %v4567_v62 = vcombine.low %v59_v42, %v63_v19  ;;  %v139_v42 = vld [vmem:[%s7178_s1 + $0x390] sm:$0xff] }
 0x101   :  { %3483 = vmatpush2.bf16.msra.mxu1 %v4989_v61  ;;  %v183_v61 = vld [vmem:[%s7178_s1 + $0x4f0] sm:$0xff] }
 0x102   :  { %3484 = vmatprep.subr.bf16.mxu1 %v4982_v63  ;;  %v4695_v63 = vcombine.low %v187_v44, %v191_v21  ;;  %v4688_v1 = vcombine.high %v179_v57, %v183_v61  ;;  %v143_v19 = vld [vmem:[%s7178_s1 + $0x3b0] sm:$0xff] }
 0x103   :  { %3444 = vmatpush2.bf16.msra.mxu0 %v4853_v4  ;;  %v171_v4 = vld [vmem:[%s7178_s1 + $0x490] sm:$0xff] }
 0x104   :  { %3495 = vmatprep.subr.bf16.mxu0 %v4592_v8  ;;  %v4687_v8 = vcombine.low %v179_v57, %v183_v61  ;;  %v4680_v10 = vcombine.high %v171_v4, %v175_v5  ;;  %v271_v44 = vld [vmem:[%s7178_s1 + $0x7b0] sm:$0xff] }
 0x105   :  { %3485 = vmatpush2.bf16.msra.mxu1 %v4981_v6  ;;  %v4559_v6 = vcombine.low %v51_v55, %v55_v56  ;;  %v4647_v55 = vcombine.low %v139_v42, %v143_v19 }
 0x106   :  { %3536 = vmatprep.subr.bf16.mxu1 %v4720_v9  ;;  %v3201_v54 = vpop.f32.mrf.mxu0  ;;  %3446 = vmatmul.mubr.bf16.vlgmr.msra.gmra.mxu0 %v5753_v36  ;;  %v4552_v9 = vcombine.high %v43_v2, %v47_v3 }
 0x107   :  { %v3202_v30 = vadd.f32 %v3201_v54, %v542_v15  ;;  %3496 = vmatpush1.bf16.msra.mxu0 %v4591_v17  ;;  %3527 = vmatprep.mubr.bf16.mxu0 %v5401_v58  ;;  %v4551_v15 = vcombine.low %v43_v2, %v47_v3  ;;  %v4679_v17 = vcombine.low %v171_v4, %v175_v5 }
 0x108   :  { %v3242_v31 = vpop.f32.mrf.mxu1  ;;  %3487 = vmatmul.mubr.bf16.vlgmr.msra.gmra.mxu1 %v5763_v39  ;;  %v3203_v33 = vpop.f32.mrf.mxu0  ;;  %3497 = vmatprep.subr.bf16.mxu0 %v4584_v53  ;;  %v4672_v53 = vcombine.high %v163_v13, %v167_v14  ;;  %v4543_v54 = vcombine.low %v35_v11, %v39_v12 }
 0x109   :  { %3537 = vmatpush1.bf16.msra.mxu1 %v4719_v18  ;;  %v6182_v37 = vadd.f32 %v3242_v31, %v3202_v30  ;;  %v3204_v38 = vadd.f32 %v3203_v33, %v546_v22  ;;  %3568 = vmatprep.mubr.bf16.mxu1 %v5405_v59  ;;  %v4544_v18 = vcombine.high %v35_v11, %v39_v12  ;;  %v27_v22 = vld [vmem:[%s7178_s1 + $0x10] sm:$0xff] }
 0x10a   :  { %v3244_v40 = vpop.f32.mrf.mxu1  ;;  %3538 = vmatprep.subr.bf16.mxu1 %v4712_v23  ;;  %v3205_v43 = vpop.f32.mrf.mxu0  ;;  %v31_v23 = vld [vmem:[%s7178_s1 + $0x30] sm:$0xff]  ;;  %v4664_v30 = vcombine.high %v155_v24, %v159_v25 }
 0x10b   :  { %v6198_v45 = vadd.f32 %v3244_v40, %v3204_v38  ;;  %3498 = vmatpush1.bf16.msra.mxu0 %v4583_v32  ;;  %v4536_v28 = vcombine.high %v27_v22, %v31_v23  ;;  %v147_v31 = vld [vmem:[%s7178_s1 + $0x3d0] sm:$0xff]  ;;  %v4663_v38 = vcombine.low %v155_v24, %v159_v25 }
 0x10c   :  { %v3246_v46 = vpop.f32.mrf.mxu1  ;;  %v3206_v48 = vpop.f32.mrf.mxu0  ;;  %3499 = vmatprep.subr.bf16.mxu0 %v4576_v35  ;;  %v151_v32 = vld [vmem:[%s7178_s1 + $0x3f0] sm:$0xff]  ;;  %v4535_v35 = vcombine.low %v27_v22, %v31_v23 }
 0x10d   :  { %3539 = vmatpush1.bf16.msra.mxu1 %v4711_v34  ;;  %v275_v33 = vld [vmem:[%s7178_s1 + $0x7d0] sm:$0xff]  ;;  %v4656_v40 = vcombine.high %v147_v31, %v151_v32  ;;  %v4655_v21 = vcombine.low %v147_v31, %v151_v32 }
 0x10e   :  { %v3247_v51 = vpop.f32.mrf.mxu1  ;;  %3540 = vmatprep.subr.bf16.mxu1 %v4704_v41  ;;  %v279_v34 = vld [vmem:[%s7178_s1 + $0x7f0] sm:$0xff] }
 0x10f   :  { %3500 = vmatpush1.bf16.msra.mxu0 %v4575_v47  ;;  %v4784_v41 = vcombine.high %v275_v33, %v279_v34  ;;  %v267_v43 = vld [vmem:[%s7178_s1 + $0x790] sm:$0xff]  ;;  %v4783_v46 = vcombine.low %v275_v33, %v279_v34  ;;  %v4648_v47 = vcombine.high %v139_v42, %v143_v19 }
 0x110   :  { %3501 = vmatprep.subr.bf16.mxu0 %v4568_v50  ;;  %v4776_v48 = vcombine.high %v267_v43, %v271_v44  ;;  %v135_v50 = vld [vmem:[%s7178_s1 + $0x370] sm:$0xff]  ;;  %v4775_v56 = vcombine.low %v267_v43, %v271_v44 }
 0x111   :  { %3541 = vmatpush1.bf16.msra.mxu1 %v4703_v49  ;;  %v131_v49 = vld [vmem:[%s7178_s1 + $0x350] sm:$0xff] }
 0x112   :  { %3542 = vmatprep.subr.bf16.mxu1 %v4696_v52  ;;  %v259_v51 = vld [vmem:[%s7178_s1 + $0x750] sm:$0xff]  ;;  %v4640_v57 = vcombine.high %v131_v49, %v135_v50  ;;  %v4639_v2 = vcombine.low %v131_v49, %v135_v50 }
 0x113   :  { %3502 = vmatpush1.bf16.msra.mxu0 %v4567_v62  ;;  %v263_v52 = vld [vmem:[%s7178_s1 + $0x770] sm:$0xff] }
 0x114   :  { %3503 = vmatprep.subr.bf16.mxu0 %v4560_v0  ;;  %v4768_v61 = vcombine.high %v259_v51, %v263_v52  ;;  %v123_v62 = vld [vmem:[%s7178_s1 + $0x310] sm:$0xff]  ;;  %v4767_v3 = vcombine.low %v259_v51, %v263_v52 }
 0x115   :  { %3543 = vmatpush1.bf16.msra.mxu1 %v4695_v63  ;;  %v127_v63 = vld [vmem:[%s7178_s1 + $0x330] sm:$0xff] }
 0x116   :  { %3544 = vmatprep.subr.bf16.mxu1 %v4688_v1  ;;  %v251_v0 = vld [vmem:[%s7178_s1 + $0x710] sm:$0xff]  ;;  %v4632_v4 = vcombine.high %v123_v62, %v127_v63  ;;  %v4631_v11 = vcombine.low %v123_v62, %v127_v63 }
 0x117   :  { %3504 = vmatpush1.bf16.msra.mxu0 %v4559_v6  ;;  %v255_v1 = vld [vmem:[%s7178_s1 + $0x730] sm:$0xff] }
 0x118   :  { %3505 = vmatprep.subr.bf16.mxu0 %v4552_v9  ;;  %v4760_v5 = vcombine.high %v251_v0, %v255_v1  ;;  %v115_v6 = vld [vmem:[%s7178_s1 + $0x2d0] sm:$0xff]  ;;  %v4759_v12 = vcombine.low %v251_v0, %v255_v1 }
 0x119   :  { %3545 = vmatpush1.bf16.msra.mxu1 %v4687_v8  ;;  %v119_v8 = vld [vmem:[%s7178_s1 + $0x2f0] sm:$0xff] }
 0x11a   :  { %3546 = vmatprep.subr.bf16.mxu1 %v4680_v10  ;;  %v243_v9 = vld [vmem:[%s7178_s1 + $0x6d0] sm:$0xff]  ;;  %v4624_v13 = vcombine.high %v115_v6, %v119_v8  ;;  %v4623_v22 = vcombine.low %v115_v6, %v119_v8 }
 0x11b   :  { %3506 = vmatpush1.bf16.msra.mxu0 %v4551_v15  ;;  %v247_v10 = vld [vmem:[%s7178_s1 + $0x6f0] sm:$0xff] }
 0x11c   :  { %3507 = vmatprep.subr.bf16.mxu0 %v4544_v18  ;;  %v4752_v14 = vcombine.high %v243_v9, %v247_v10  ;;  %v107_v15 = vld [vmem:[%s7178_s1 + $0x290] sm:$0xff]  ;;  %v4751_v23 = vcombine.low %v243_v9, %v247_v10 }
 0x11d   :  { %3547 = vmatpush1.bf16.msra.mxu1 %v4679_v17  ;;  %v111_v17 = vld [vmem:[%s7178_s1 + $0x2b0] sm:$0xff] }
 0x11e   :  { %3548 = vmatprep.subr.bf16.mxu1 %v4672_v53  ;;  %v235_v18 = vld [vmem:[%s7178_s1 + $0x690] sm:$0xff]  ;;  %v4616_v24 = vcombine.high %v107_v15, %v111_v17  ;;  %v4615_v31 = vcombine.low %v107_v15, %v111_v17 }
 0x11f   :  { %3508 = vmatpush1.bf16.msra.mxu0 %v4543_v54  ;;  %v239_v53 = vld [vmem:[%s7178_s1 + $0x6b0] sm:$0xff] }
 0x120   :  { %3509 = vmatprep.subr.bf16.mxu0 %v4536_v28  ;;  %v4744_v25 = vcombine.high %v235_v18, %v239_v53  ;;  %v99_v54 = vld [vmem:[%s7178_s1 + $0x250] sm:$0xff]  ;;  %v4743_v32 = vcombine.low %v235_v18, %v239_v53 }
 0x121   :  { %3549 = vmatpush1.bf16.msra.mxu1 %v4671_v27  ;;  %v103_v27 = vld [vmem:[%s7178_s1 + $0x270] sm:$0xff] }
 0x122   :  { %3550 = vmatprep.subr.bf16.mxu1 %v4664_v30  ;;  %v227_v28 = vld [vmem:[%s7178_s1 + $0x650] sm:$0xff]  ;;  %v4608_v33 = vcombine.high %v99_v54, %v103_v27  ;;  %v4607_v42 = vcombine.low %v99_v54, %v103_v27 }
 0x123   :  { %3510 = vmatpush1.bf16.msra.mxu0 %v4535_v35  ;;  %v231_v30 = vld [vmem:[%s7178_s1 + $0x670] sm:$0xff] }
 0x124   :  { %3511 = vmatprep.subr.bf16.mxu0 %v4656_v40  ;;  %v4736_v34 = vcombine.high %v227_v28, %v231_v30  ;;  %v91_v35 = vld [vmem:[%s7178_s1 + $0x210] sm:$0xff]  ;;  %v4735_v19 = vcombine.low %v227_v28, %v231_v30 }
 0x125   :  { %3551 = vmatpush1.bf16.msra.mxu1 %v4663_v38  ;;  %v95_v38 = vld [vmem:[%s7178_s1 + $0x230] sm:$0xff] }
 0x126   :  { %3552 = vmatprep.subr.bf16.mxu1 %v4784_v41  ;;  %v219_v40 = vld [vmem:[%s7178_s1 + $0x610] sm:$0xff]  ;;  %v4600_v43 = vcombine.high %v91_v35, %v95_v38  ;;  %v4599_v49 = vcombine.low %v91_v35, %v95_v38 }
 0x127   :  { %3512 = vmatpush2.bf16.msra.mxu0 %v4655_v21  ;;  %v223_v41 = vld [vmem:[%s7178_s1 + $0x630] sm:$0xff] }
 0x128   :  { %3513 = vmatprep.subr.bf16.mxu0 %v4648_v47  ;;  %v4728_v44 = vcombine.high %v219_v40, %v223_v41  ;;  %v339_v21 = vld [vmem:[%s7178_s1 + $0x9d0] sm:$0xff]  ;;  %v4727_v50 = vcombine.low %v219_v40, %v223_v41 }
 0x129   :  { %3553 = vmatpush2.bf16.msra.mxu1 %v4783_v46  ;;  %v343_v46 = vld [vmem:[%s7178_s1 + $0x9f0] sm:$0xff] }
 0x12a   :  { %3554 = vmatprep.subr.bf16.mxu1 %v4776_v48  ;;  %v467_v47 = vld [vmem:[%s7178_s1 + $0xdd0] sm:$0xff]  ;;  %v4848_v51 = vcombine.high %v339_v21, %v343_v46  ;;  %v4847_v62 = vcombine.low %v339_v21, %v343_v46 }
 0x12b   :  { %3514 = vmatpush2.bf16.msra.mxu0 %v4647_v55  ;;  %v471_v48 = vld [vmem:[%s7178_s1 + $0xdf0] sm:$0xff] }
 0x12c   :  { %3515 = vmatprep.subr.bf16.mxu0 %v4640_v57  ;;  %v4976_v52 = vcombine.high %v467_v47, %v471_v48  ;;  %v331_v55 = vld [vmem:[%s7178_s1 + $0x990] sm:$0xff]  ;;  %v4975_v63 = vcombine.low %v467_v47, %v471_v48 }
 0x12d   :  { %3555 = vmatpush2.bf16.msra.mxu1 %v4775_v56  ;;  %v335_v56 = vld [vmem:[%s7178_s1 + $0x9b0] sm:$0xff] }
 0x12e   :  { %3556 = vmatprep.subr.bf16.mxu1 %v4768_v61  ;;  %v459_v57 = vld [vmem:[%s7178_s1 + $0xd90] sm:$0xff]  ;;  %v4840_v0 = vcombine.high %v331_v55, %v335_v56  ;;  %v4839_v10 = vcombine.low %v331_v55, %v335_v56 }
 0x12f   :  { %3516 = vmatpush2.bf16.msra.mxu0 %v4639_v2  ;;  %v463_v61 = vld [vmem:[%s7178_s1 + $0xdb0] sm:$0xff] }
 0x130   :  { %3517 = vmatprep.subr.bf16.mxu0 %v4632_v4  ;;  %v4968_v1 = vcombine.high %v459_v57, %v463_v61  ;;  %v323_v2 = vld [vmem:[%s7178_s1 + $0x950] sm:$0xff] }
 0x131   :  { %3557 = vmatpush2.bf16.msra.mxu1 %v4767_v3  ;;  %v327_v3 = vld [vmem:[%s7178_s1 + $0x970] sm:$0xff] }
 0x132   :  { %3558 = vmatprep.subr.bf16.mxu1 %v4760_v5  ;;  %v451_v5 = vld [vmem:[%s7178_s1 + $0xd50] sm:$0xff]  ;;  %v4831_v54 = vcombine.low %v323_v2, %v327_v3 }
 0x133   :  { %3518 = vmatpush2.bf16.msra.mxu0 %v4631_v11  ;;  %v455_v6 = vld [vmem:[%s7178_s1 + $0xd70] sm:$0xff] }
 0x134   :  { %3519 = vmatprep.subr.bf16.mxu0 %v4624_v13  ;;  %v4832_v13 = vcombine.high %v323_v2, %v327_v3  ;;  %v4960_v18 = vcombine.high %v451_v5, %v455_v6  ;;  %v319_v53 = vld [vmem:[%s7178_s1 + $0x930] sm:$0xff]  ;;  %v4959_v28 = vcombine.low %v451_v5, %v455_v6 }
 0x135   :  { %3559 = vmatpush2.bf16.msra.mxu1 %v4759_v12  ;;  %v4967_v12 = vcombine.low %v459_v57, %v463_v61  ;;  %v435_v35 = vld [vmem:[%s7178_s1 + $0xcd0] sm:$0xff] }
 0x136   :  { %3560 = vmatprep.subr.bf16.mxu1 %v4752_v14  ;;  %v439_v38 = vld [vmem:[%s7178_s1 + $0xcf0] sm:$0xff] }
 0x137   :  { %3520 = vmatpush2.bf16.msra.mxu0 %v4623_v22  ;;  %v427_v21 = vld [vmem:[%s7178_s1 + $0xc90] sm:$0xff]  ;;  %v4943_v48 = vcombine.low %v435_v35, %v439_v38 }
 0x138   :  { %3521 = vmatprep.subr.bf16.mxu0 %v4616_v24  ;;  %v431_v46 = vld [vmem:[%s7178_s1 + $0xcb0] sm:$0xff] }
 0x139   :  { %3561 = vmatpush2.bf16.msra.mxu1 %v4751_v23  ;;  %v443_v23 = vld [vmem:[%s7178_s1 + $0xd10] sm:$0xff]  ;;  %v4935_v61 = vcombine.low %v427_v21, %v431_v46 }
 0x13a   :  { %3562 = vmatprep.subr.bf16.mxu1 %v4744_v25  ;;  %v419_v55 = vld [vmem:[%s7178_s1 + $0xc50] sm:$0xff] }
 0x13b   :  { %3522 = vmatpush2.bf16.msra.mxu0 %v4615_v31  ;;  %v423_v56 = vld [vmem:[%s7178_s1 + $0xc70] sm:$0xff] }
 0x13c   :  { %3523 = vmatprep.subr.bf16.mxu0 %v4608_v33  ;;  %v307_v33 = vld [vmem:[%s7178_s1 + $0x8d0] sm:$0xff]  ;;  %v4927_v5 = vcombine.low %v419_v55, %v423_v56 }
 0x13d   :  { %3563 = vmatpush2.bf16.msra.mxu1 %v4743_v32  ;;  %v411_v2 = vld [vmem:[%s7178_s1 + $0xc10] sm:$0xff] }
 0x13e   :  { %3564 = vmatprep.subr.bf16.mxu1 %v4736_v34  ;;  %v311_v34 = vld [vmem:[%s7178_s1 + $0x8f0] sm:$0xff] }
 0x13f   :  { %3524 = vmatpush2.bf16.msra.mxu0 %v4607_v42  ;;  %v4816_v42 = vcombine.high %v307_v33, %v311_v34  ;;  %v4815_v47 = vcombine.low %v307_v33, %v311_v34  ;;  %v415_v3 = vld [vmem:[%s7178_s1 + $0xc30] sm:$0xff] }
 0x140   :  { %3525 = vmatprep.subr.bf16.mxu0 %v4600_v43  ;;  %v299_v43 = vld [vmem:[%s7178_s1 + $0x890] sm:$0xff] }
 0x141   :  { %3565 = vmatpush2.bf16.msra.mxu1 %v4735_v19  ;;  %v4944_v19 = vcombine.high %v435_v35, %v439_v38 }
 0x142   :  { %3566 = vmatprep.subr.bf16.mxu1 %v4728_v44  ;;  %v303_v44 = vld [vmem:[%s7178_s1 + $0x8b0] sm:$0xff] }
 0x143   :  { %3526 = vmatpush2.bf16.msra.mxu0 %v4599_v49  ;;  %v4808_v49 = vcombine.high %v299_v43, %v303_v44  ;;  %v4807_v57 = vcombine.low %v299_v43, %v303_v44 }
 0x144   :  { %3577 = vmatprep.subr.bf16.mxu0 %v4848_v51  ;;  %v291_v51 = vld [vmem:[%s7178_s1 + $0x850] sm:$0xff] }
 0x145   :  { %3567 = vmatpush2.bf16.msra.mxu1 %v4727_v50  ;;  %v4936_v50 = vcombine.high %v427_v21, %v431_v46 }
 0x146   :  { %3618 = vmatprep.subr.bf16.mxu1 %v4976_v52  ;;  %v3283_v4 = vpop.f32.mrf.mxu0  ;;  %3528 = vmatmul.mubr.bf16.vlgmr.msra.gmra.mxu0 %v5531_v16  ;;  %v295_v52 = vld [vmem:[%s7178_s1 + $0x870] sm:$0xff] }
 0x147   :  { %v3284_v8 = vadd.f32 %v3283_v4, %v6182_v37  ;;  %3578 = vmatpush1.bf16.msra.mxu0 %v4847_v62  ;;  %v315_v37 = vld [vmem:[%s7178_s1 + $0x910] sm:$0xff]  ;;  %3609 = vmatprep.mubr.bf16.mxu0 %v5561_v26  ;;  %v4800_v62 = vcombine.high %v291_v51, %v295_v52  ;;  %v4799_v4 = vcombine.low %v291_v51, %v295_v52 }
 0x148   :  { %v3324_v9 = vpop.f32.mrf.mxu1  ;;  %3569 = vmatmul.mubr.bf16.vlgmr.msra.gmra.mxu1 %v5546_v20  ;;  %v3285_v11 = vpop.f32.mrf.mxu0  ;;  %3579 = vmatprep.subr.bf16.mxu0 %v4840_v0  ;;  %v4824_v30 = vcombine.high %v315_v37, %v319_v53  ;;  %v4823_v40 = vcombine.low %v315_v37, %v319_v53  ;;  %v283_v0 = vld [vmem:[%s7178_s1 + $0x810] sm:$0xff] }
 0x149   :  { %3619 = vmatpush1.bf16.msra.mxu1 %v4975_v63  ;;  %v6383_v14 = vadd.f32 %v3324_v9, %v3284_v8  ;;  %v3286_v15 = vadd.f32 %v3285_v11, %v6198_v45  ;;  %v447_v45 = vld [vmem:[%s7178_s1 + $0xd30] sm:$0xff]  ;;  %3650 = vmatprep.mubr.bf16.mxu1 %v5572_v29  ;;  %v4928_v63 = vcombine.high %v419_v55, %v423_v56 }
 0x14a   :  { %v3326_v17 = vpop.f32.mrf.mxu1  ;;  %3620 = vmatprep.subr.bf16.mxu1 %v4968_v1  ;;  %v3287_v22 = vpop.f32.mrf.mxu0  ;;  %v4952_v32 = vcombine.high %v443_v23, %v447_v45  ;;  %v4951_v41 = vcombine.low %v443_v23, %v447_v45  ;;  %v287_v1 = vld [vmem:[%s7178_s1 + $0x830] sm:$0xff]  ;;  %v4920_v8 = vcombine.high %v411_v2, %v415_v3 }
 0x14b   :  { %v6400_v24 = vadd.f32 %v3326_v17, %v3286_v15  ;;  %3580 = vmatpush1.bf16.msra.mxu0 %v4839_v10  ;;  %v4792_v6 = vcombine.high %v283_v0, %v287_v1  ;;  %v403_v9 = vld [vmem:[%s7178_s1 + $0xbd0] sm:$0xff]  ;;  %v4919_v15 = vcombine.low %v411_v2, %v415_v3 }
 0x14c   :  { %v3328_v25 = vpop.f32.mrf.mxu1  ;;  %v3288_v27 = vpop.f32.mrf.mxu0  ;;  %3581 = vmatprep.subr.bf16.mxu0 %v4832_v13  ;;  %v407_v10 = vld [vmem:[%s7178_s1 + $0xbf0] sm:$0xff]  ;;  %v4791_v13 = vcombine.low %v283_v0, %v287_v1 }
 0x14d   :  { %3621 = vmatpush1.bf16.msra.mxu1 %v4967_v12  ;;  %v531_v11 = vld [vmem:[%s7178_s1 + $0xfd0] sm:$0xff]  ;;  %v4912_v17 = vcombine.high %v403_v9, %v407_v10  ;;  %v4911_v45 = vcombine.low %v403_v9, %v407_v10 }
 0x14e   :  { %v3329_v31 = vpop.f32.mrf.mxu1  ;;  %3622 = vmatprep.subr.bf16.mxu1 %v4960_v18  ;;  %v535_v12 = vld [vmem:[%s7178_s1 + $0xff0] sm:$0xff] }
 0x14f   :  { %3582 = vmatpush1.bf16.msra.mxu0 %v4831_v54  ;;  %v5040_v18 = vcombine.high %v531_v11, %v535_v12  ;;  %v395_v37 = vld [vmem:[%s7178_s1 + $0xb90] sm:$0xff]  ;;  %v5039_v25 = vcombine.low %v531_v11, %v535_v12 }
 0x150   :  { %3583 = vmatprep.subr.bf16.mxu0 %v4824_v30  ;;  %v399_v53 = vld [vmem:[%s7178_s1 + $0xbb0] sm:$0xff] }
 0x151   :  { %3623 = vmatpush1.bf16.msra.mxu1 %v4959_v28  ;;  %v523_v22 = vld [vmem:[%s7178_s1 + $0xf90] sm:$0xff]  ;;  %v4904_v54 = vcombine.high %v395_v37, %v399_v53  ;;  %v4903_v33 = vcombine.low %v395_v37, %v399_v53 }
 0x152   :  { %3624 = vmatprep.subr.bf16.mxu1 %v4952_v32  ;;  %v527_v23 = vld [vmem:[%s7178_s1 + $0xfb0] sm:$0xff] }
 0x153   :  { %3584 = vmatpush1.bf16.msra.mxu0 %v4823_v40  ;;  %v5032_v27 = vcombine.high %v523_v22, %v527_v23  ;;  %v387_v28 = vld [vmem:[%s7178_s1 + $0xb50] sm:$0xff]  ;;  %v5031_v34 = vcombine.low %v523_v22, %v527_v23 }
 0x154   :  { %3585 = vmatprep.subr.bf16.mxu0 %v4816_v42  ;;  %v391_v30 = vld [vmem:[%s7178_s1 + $0xb70] sm:$0xff] }
 0x155   :  { %3625 = vmatpush1.bf16.msra.mxu1 %v4951_v41  ;;  %v515_v31 = vld [vmem:[%s7178_s1 + $0xf50] sm:$0xff]  ;;  %v4896_v35 = vcombine.high %v387_v28, %v391_v30  ;;  %v4895_v43 = vcombine.low %v387_v28, %v391_v30  ;;  %v549_v30 = vsub.s32 2, %v6133_v60 }
 0x156   :  { %3626 = vmatprep.subr.bf16.mxu1 %v4944_v19  ;;  %v519_v32 = vld [vmem:[%s7178_s1 + $0xf70] sm:$0xff] }
 0x157   :  { %3586 = vmatpush1.bf16.msra.mxu0 %v4815_v47  ;;  %v5024_v38 = vcombine.high %v515_v31, %v519_v32  ;;  %v379_v40 = vld [vmem:[%s7178_s1 + $0xb10] sm:$0xff]  ;;  %v5023_v44 = vcombine.low %v515_v31, %v519_v32 }
 0x158   :  { %3587 = vmatprep.subr.bf16.mxu0 %v4808_v49  ;;  %v383_v41 = vld [vmem:[%s7178_s1 + $0xb30] sm:$0xff] }
 0x159   :  { %3627 = vmatpush1.bf16.msra.mxu1 %v4943_v48  ;;  %v507_v42 = vld [vmem:[%s7178_s1 + $0xf10] sm:$0xff]  ;;  %v4888_v21 = vcombine.high %v379_v40, %v383_v41  ;;  %v4887_v51 = vcombine.low %v379_v40, %v383_v41  ;;  %v204_v40 = vld [vmem:[%s7178_s1 + $0x598] sm:$0xff] }
 0x15a   :  { %3628 = vmatprep.subr.bf16.mxu1 %v4936_v50  ;;  %v511_v19 = vld [vmem:[%s7178_s1 + $0xf30] sm:$0xff]  ;;  %v208_v41 = vld [vmem:[%s7178_s1 + $0x5b8] sm:$0xff] }
 0x15b   :  { %3588 = vmatpush1.bf16.msra.mxu0 %v4807_v57  ;;  %v5016_v46 = vcombine.high %v507_v42, %v511_v19  ;;  %v371_v47 = vld [vmem:[%s7178_s1 + $0xad0] sm:$0xff]  ;;  %v5015_v52 = vcombine.low %v507_v42, %v511_v19  ;;  %v550_v42 = vrot.slane %v6151_v7, %v549_v30 }
 0x15c   :  { %3589 = vmatprep.subr.bf16.mxu0 %v4800_v62  ;;  %v375_v48 = vld [vmem:[%s7178_s1 + $0xaf0] sm:$0xff] }
 0x15d   :  { %3629 = vmatpush1.bf16.msra.mxu1 %v4935_v61  ;;  %v499_v49 = vld [vmem:[%s7178_s1 + $0xed0] sm:$0xff]  ;;  %v4880_v55 = vcombine.high %v371_v47, %v375_v48  ;;  %v4879_v0 = vcombine.low %v371_v47, %v375_v48  ;;  %v4714_v48 = vcombine.high %v204_v40, %v208_v41 }
 0x15e   :  { %3630 = vmatprep.subr.bf16.mxu1 %v4928_v63  ;;  %v503_v50 = vld [vmem:[%s7178_s1 + $0xef0] sm:$0xff] }
 0x15f   :  { %3590 = vmatpush1.bf16.msra.mxu0 %v4799_v4  ;;  %v5008_v56 = vcombine.high %v499_v49, %v503_v50  ;;  %v363_v57 = vld [vmem:[%s7178_s1 + $0xa90] sm:$0xff]  ;;  %v5007_v1 = vcombine.low %v499_v49, %v503_v50  ;;  %v196_v49 = vld [vmem:[%s7178_s1 + $0x558] sm:$0xff] }
 0x160   :  { %3591 = vmatprep.subr.bf16.mxu0 %v4792_v6  ;;  %v367_v61 = vld [vmem:[%s7178_s1 + $0xab0] sm:$0xff] }
 0x161   :  { %3631 = vmatpush1.bf16.msra.mxu1 %v4927_v5  ;;  %v491_v62 = vld [vmem:[%s7178_s1 + $0xe90] sm:$0xff]  ;;  %v4872_v2 = vcombine.high %v363_v57, %v367_v61  ;;  %v4871_v9 = vcombine.low %v363_v57, %v367_v61  ;;  %v4713_v61 = vcombine.low %v204_v40, %v208_v41  ;;  %v168_v40 = vld [vmem:[%s7178_s1 + $0x478] sm:$0xff] }
 0x162   :  { %3632 = vmatprep.subr.bf16.mxu1 %v4920_v8  ;;  %v495_v63 = vld [vmem:[%s7178_s1 + $0xeb0] sm:$0xff] }
 0x163   :  { %3592 = vmatpush1.bf16.msra.mxu0 %v4791_v13  ;;  %v5000_v3 = vcombine.high %v491_v62, %v495_v63  ;;  %v355_v4 = vld [vmem:[%s7178_s1 + $0xa50] sm:$0xff]  ;;  %v4999_v10 = vcombine.low %v491_v62, %v495_v63  ;;  %v64_v63 = vld [vmem:[%s7178_s1 + $0x138] sm:$0xff] }
 0x164   :  { %3593 = vmatprep.subr.bf16.mxu0 %v4912_v17  ;;  %v359_v5 = vld [vmem:[%s7178_s1 + $0xa70] sm:$0xff] }
 0x165   :  { %3633 = vmatpush1.bf16.msra.mxu1 %v4919_v15  ;;  %v483_v6 = vld [vmem:[%s7178_s1 + $0xe50] sm:$0xff]  ;;  %v4864_v11 = vcombine.high %v355_v4, %v359_v5  ;;  %v4863_v37 = vcombine.low %v355_v4, %v359_v5  ;;  %v188_v5 = vld [vmem:[%s7178_s1 + $0x518] sm:$0xff] }
 0x166   :  { %3634 = vmatprep.subr.bf16.mxu1 %v5040_v18  ;;  %v487_v8 = vld [vmem:[%s7178_s1 + $0xe70] sm:$0xff] }
 0x167   :  { %3594 = vmatpush2.bf16.msra.mxu0 %v4911_v45  ;;  %v4992_v12 = vcombine.high %v483_v6, %v487_v8  ;;  %v347_v13 = vld [vmem:[%s7178_s1 + $0xa10] sm:$0xff]  ;;  %v4991_v53 = vcombine.low %v483_v6, %v487_v8  ;;  %v84_v45 = vld [vmem:[%s7178_s1 + $0x1d8] sm:$0xff] }
 0x168   :  { %3595 = vmatprep.subr.bf16.mxu0 %v4904_v54  ;;  %v351_v15 = vld [vmem:[%s7178_s1 + $0xa30] sm:$0xff]  ;;  %v212_v54 = vld [vmem:[%s7178_s1 + $0x5d8] sm:$0xff] }
 0x169   :  { %3635 = vmatpush2.bf16.msra.mxu1 %v5039_v25  ;;  %v475_v17 = vld [vmem:[%s7178_s1 + $0xe10] sm:$0xff]  ;;  %v4856_v22 = vcombine.high %v347_v13, %v351_v15  ;;  %v88_v25 = vld [vmem:[%s7178_s1 + $0x1f8] sm:$0xff]  ;;  %v4855_v28 = vcombine.low %v347_v13, %v351_v15 }
 0x16a   :  { %3636 = vmatprep.subr.bf16.mxu1 %v5032_v27  ;;  %v479_v18 = vld [vmem:[%s7178_s1 + $0xe30] sm:$0xff]  ;;  %v216_v27 = vld [vmem:[%s7178_s1 + $0x5f8] sm:$0xff]  ;;  %v4594_v32 = vcombine.high %v84_v45, %v88_v25  ;;  %v4593_v19 = vcombine.low %v84_v45, %v88_v25 }
 0x16b   :  { %3596 = vmatpush2.bf16.msra.mxu0 %v4903_v33  ;;  %v4984_v23 = vcombine.high %v475_v17, %v479_v18  ;;  %v4983_v31 = vcombine.low %v475_v17, %v479_v18  ;;  %v4722_v33 = vcombine.high %v212_v54, %v216_v27  ;;  %v192_v6 = vld [vmem:[%s7178_s1 + $0x538] sm:$0xff] }
 0x16c   :  { %3597 = vmatprep.subr.bf16.mxu0 %v4896_v35  ;;  %v76_v35 = vld [vmem:[%s7178_s1 + $0x198] sm:$0xff] }
 0x16d   :  { %3637 = vmatpush2.bf16.msra.mxu1 %v5031_v34  ;;  %v553_v34 = vsub.s32 3, %v6133_v60  ;;  %v56_v15 = vld [vmem:[%s7178_s1 + $0xf8] sm:$0xff] }
 0x16e   :  { %3638 = vmatprep.subr.bf16.mxu1 %v5024_v38  ;;  %v80_v38 = vld [vmem:[%s7178_s1 + $0x1b8] sm:$0xff] }
 0x16f   :  { %3598 = vmatpush2.bf16.msra.mxu0 %v4895_v43  ;;  %v4721_v43 = vcombine.low %v212_v54, %v216_v27  ;;  %v554_v47 = vrot.slane %v6151_v7, %v553_v34  ;;  %v60_v7 = vld [vmem:[%s7178_s1 + $0x118] sm:$0xff] }
 0x170   :  { %3599 = vmatprep.subr.bf16.mxu0 %v4888_v21  ;;  %v68_v21 = vld [vmem:[%s7178_s1 + $0x158] sm:$0xff]  ;;  %v4570_v13 = vcombine.high %v60_v7, %v64_v63 }
 0x171   :  { %3639 = vmatpush2.bf16.msra.mxu1 %v5023_v44  ;;  %v4586_v44 = vcombine.high %v76_v35, %v80_v38  ;;  %v180_v18 = vld [vmem:[%s7178_s1 + $0x4d8] sm:$0xff] }
 0x172   :  { %3640 = vmatprep.subr.bf16.mxu1 %v5016_v46  ;;  %v72_v46 = vld [vmem:[%s7178_s1 + $0x178] sm:$0xff] }
 0x173   :  { %3600 = vmatpush2.bf16.msra.mxu0 %v4887_v51  ;;  %v200_v51 = vld [vmem:[%s7178_s1 + $0x578] sm:$0xff]  ;;  %v4578_v62 = vcombine.high %v68_v21, %v72_v46 }
 0x174   :  { %3601 = vmatprep.subr.bf16.mxu0 %v4880_v55  ;;  %v48_v25 = vld [vmem:[%s7178_s1 + $0xb8] sm:$0xff] }
 0x175   :  { %3641 = vmatpush2.bf16.msra.mxu1 %v5015_v52  ;;  %v172_v27 = vld [vmem:[%s7178_s1 + $0x498] sm:$0xff] }
 0x176   :  { %3642 = vmatprep.subr.bf16.mxu1 %v5008_v56  ;;  %v4585_v56 = vcombine.low %v76_v35, %v80_v38  ;;  %v40_v34 = vld [vmem:[%s7178_s1 + $0x78] sm:$0xff] }
 0x177   :  { %3602 = vmatpush2.bf16.msra.mxu0 %v4879_v0  ;;  %v164_v38 = vld [vmem:[%s7178_s1 + $0x458] sm:$0xff] }
 0x178   :  { %3603 = vmatprep.subr.bf16.mxu0 %v4872_v2 }
 0x179   :  { %3643 = vmatpush2.bf16.msra.mxu1 %v5007_v1 }
 0x17a   :  { %3644 = vmatprep.subr.bf16.mxu1 %v5000_v3  ;;  %v4706_v3 = vcombine.high %v196_v49, %v200_v51 }
 0x17b   :  { %3604 = vmatpush2.bf16.msra.mxu0 %v4871_v9 }
 0x17c   :  { %3605 = vmatprep.subr.bf16.mxu0 %v4864_v11 }
 0x17d   :  { %3645 = vmatpush2.bf16.msra.mxu1 %v4999_v10  ;;  %v4577_v10 = vcombine.low %v68_v21, %v72_v46  ;;  %v4674_v21 = vcombine.high %v164_v38, %v168_v40  ;;  %v156_v46 = vld [vmem:[%s7178_s1 + $0x418] sm:$0xff] }
 0x17e   :  { %3646 = vmatprep.subr.bf16.mxu1 %v4992_v12  ;;  %v4705_v12 = vcombine.low %v196_v49, %v200_v51  ;;  %v148_v49 = vld [vmem:[%s7178_s1 + $0x3d8] sm:$0xff] }
 0x17f   :  { %3606 = vmatpush2.bf16.msra.mxu0 %v4863_v37  ;;  %v184_v37 = vld [vmem:[%s7178_s1 + $0x4f8] sm:$0xff] }
 0x180   :  { %3607 = vmatprep.subr.bf16.mxu0 %v4856_v22  ;;  %v44_v22 = vld [vmem:[%s7178_s1 + $0x98] sm:$0xff]  ;;  %v4690_v54 = vcombine.high %v180_v18, %v184_v37 }
 0x181   :  { %3647 = vmatpush2.bf16.msra.mxu1 %v4991_v53  ;;  %v4569_v53 = vcombine.low %v60_v7, %v64_v63  ;;  %v4553_v41 = vcombine.low %v44_v22, %v48_v25  ;;  %v280_v7 = vld [vmem:[%s7178_s1 + $0x7f8] sm:$0xff] }
 0x182   :  { %3648 = vmatprep.subr.bf16.mxu1 %v4984_v23  ;;  %v4697_v23 = vcombine.low %v188_v5, %v192_v6 }
 0x183   :  { %3608 = vmatpush2.bf16.msra.mxu0 %v4855_v28  ;;  %v176_v28 = vld [vmem:[%s7178_s1 + $0x4b8] sm:$0xff] }
 0x184   :  { %3659 = vmatprep.subr.bf16.mxu0 %v4594_v32  ;;  %v4689_v32 = vcombine.low %v180_v18, %v184_v37  ;;  %v4682_v35 = vcombine.high %v172_v27, %v176_v28 }
 0x185   :  { %3649 = vmatpush2.bf16.msra.mxu1 %v4983_v31  ;;  %v36_v31 = vld [vmem:[%s7178_s1 + $0x58] sm:$0xff] }
 0x186   :  { %3700 = vmatprep.subr.bf16.mxu1 %v4722_v33  ;;  %v3365_v50 = vpop.f32.mrf.mxu0  ;;  %3610 = vmatmul.mubr.bf16.vlgmr.msra.gmra.mxu0 %v5753_v36  ;;  %v4554_v33 = vcombine.high %v44_v22, %v48_v25  ;;  %v256_v22 = vld [vmem:[%s7178_s1 + $0x738] sm:$0xff] }
 0x187   :  { %v3366_v52 = vadd.f32 %v3365_v50, %v550_v42  ;;  %3660 = vmatpush1.bf16.msra.mxu0 %v4593_v19  ;;  %3691 = vmatprep.mubr.bf16.mxu0 %v5401_v58  ;;  %v52_v58 = vld [vmem:[%s7178_s1 + $0xd8] sm:$0xff]  ;;  %v4681_v19 = vcombine.low %v172_v27, %v176_v28  ;;  %v4673_v50 = vcombine.low %v164_v38, %v168_v40 }
 0x188   :  { %v3406_v55 = vpop.f32.mrf.mxu1  ;;  %3651 = vmatmul.mubr.bf16.vlgmr.msra.gmra.mxu1 %v5763_v39  ;;  %v3367_v57 = vpop.f32.mrf.mxu0  ;;  %3661 = vmatprep.subr.bf16.mxu0 %v4586_v44  ;;  %v4562_v45 = vcombine.high %v52_v58, %v56_v15  ;;  %v4561_v30 = vcombine.low %v52_v58, %v56_v15  ;;  %v28_v42 = vld [vmem:[%s7178_s1 + $0x18] sm:$0xff] }
 0x189   :  { %3701 = vmatpush1.bf16.msra.mxu1 %v4721_v43  ;;  %v6594_v0 = vadd.f32 %v3406_v55, %v3366_v52  ;;  %v3368_v1 = vadd.f32 %v3367_v57, %v554_v47  ;;  %3732 = vmatprep.mubr.bf16.mxu1 %v5405_v59  ;;  %v4698_v59 = vcombine.high %v188_v5, %v192_v6  ;;  %v32_v44 = vld [vmem:[%s7178_s1 + $0x38] sm:$0xff] }
 0x18a   :  { %v3408_v2 = vpop.f32.mrf.mxu1  ;;  %3702 = vmatprep.subr.bf16.mxu1 %v4714_v48  ;;  %v3369_v4 = vpop.f32.mrf.mxu0  ;;  %v4546_v43 = vcombine.high %v36_v31, %v40_v34  ;;  %v160_v47 = vld [vmem:[%s7178_s1 + $0x438] sm:$0xff]  ;;  %v4545_v48 = vcombine.low %v36_v31, %v40_v34  ;;  %v4538_v51 = vcombine.high %v28_v42, %v32_v44  ;;  %v4537_v57 = vcombine.low %v28_v42, %v32_v44 }
 0x18b   :  { %v6604_v8 = vadd.f32 %v3408_v2, %v3368_v1  ;;  %3662 = vmatpush1.bf16.msra.mxu0 %v4585_v56  ;;  %v152_v52 = vld [vmem:[%s7178_s1 + $0x3f8] sm:$0xff]  ;;  %v4666_v55 = vcombine.high %v156_v46, %v160_v47 }
 0x18c   :  { %v3410_v9 = vpop.f32.mrf.mxu1  ;;  %v3370_v11 = vpop.f32.mrf.mxu0  ;;  %3663 = vmatprep.subr.bf16.mxu0 %v4578_v62  ;;  %v276_v56 = vld [vmem:[%s7178_s1 + $0x7d8] sm:$0xff]  ;;  %v4665_v62 = vcombine.low %v156_v46, %v160_v47  ;;  %v4658_v63 = vcombine.high %v148_v49, %v152_v52  ;;  %v4657_v5 = vcombine.low %v148_v49, %v152_v52 }
 0x18d   :  { %3703 = vmatpush1.bf16.msra.mxu1 %v4713_v61  ;;  %v140_v61 = vld [vmem:[%s7178_s1 + $0x398] sm:$0xff]  ;;  %v4786_v2 = vcombine.high %v276_v56, %v280_v7 }
 0x18e   :  { %v3411_v17 = vpop.f32.mrf.mxu1  ;;  %3704 = vmatprep.subr.bf16.mxu1 %v4706_v3  ;;  %v144_v1 = vld [vmem:[%s7178_s1 + $0x3b8] sm:$0xff] }
 0x18f   :  { %3664 = vmatpush1.bf16.msra.mxu0 %v4577_v10  ;;  %v268_v3 = vld [vmem:[%s7178_s1 + $0x798] sm:$0xff]  ;;  %v4785_v10 = vcombine.low %v276_v56, %v280_v7  ;;  %v4650_v58 = vcombine.high %v140_v61, %v144_v1  ;;  %v4649_v15 = vcombine.low %v140_v61, %v144_v1 }
 0x190   :  { %3665 = vmatprep.subr.bf16.mxu0 %v4570_v13  ;;  %v272_v4 = vld [vmem:[%s7178_s1 + $0x7b8] sm:$0xff] }
 0x191   :  { %3705 = vmatpush1.bf16.msra.mxu1 %v4705_v12  ;;  %v132_v6 = vld [vmem:[%s7178_s1 + $0x358] sm:$0xff]  ;;  %v4778_v13 = vcombine.high %v268_v3, %v272_v4  ;;  %v4777_v18 = vcombine.low %v268_v3, %v272_v4 }
 0x192   :  { %3706 = vmatprep.subr.bf16.mxu1 %v4698_v59  ;;  %v136_v9 = vld [vmem:[%s7178_s1 + $0x378] sm:$0xff] }
 0x193   :  { %3666 = vmatpush1.bf16.msra.mxu0 %v4569_v53  ;;  %v260_v11 = vld [vmem:[%s7178_s1 + $0x758] sm:$0xff]  ;;  %v4642_v37 = vcombine.high %v132_v6, %v136_v9 }
 0x194   :  { %3667 = vmatprep.subr.bf16.mxu0 %v4562_v45  ;;  %v264_v12 = vld [vmem:[%s7178_s1 + $0x778] sm:$0xff]  ;;  %v4641_v45 = vcombine.low %v132_v6, %v136_v9 }
 0x195   :  { %3707 = vmatpush1.bf16.msra.mxu1 %v4697_v23  ;;  %v124_v17 = vld [vmem:[%s7178_s1 + $0x318] sm:$0xff]  ;;  %v4770_v23 = vcombine.high %v260_v11, %v264_v12  ;;  %v4769_v27 = vcombine.low %v260_v11, %v264_v12 }
 0x196   :  { %3708 = vmatprep.subr.bf16.mxu1 %v4690_v54  ;;  %v128_v59 = vld [vmem:[%s7178_s1 + $0x338] sm:$0xff] }
 0x197   :  { %3668 = vmatpush1.bf16.msra.mxu0 %v4561_v30  ;;  %v252_v53 = vld [vmem:[%s7178_s1 + $0x718] sm:$0xff]  ;;  %v4634_v28 = vcombine.high %v124_v17, %v128_v59 }
 0x198   :  { %3669 = vmatprep.subr.bf16.mxu0 %v4554_v33  ;;  %v116_v25 = vld [vmem:[%s7178_s1 + $0x2d8] sm:$0xff]  ;;  %v4633_v33 = vcombine.low %v124_v17, %v128_v59  ;;  %v4761_v38 = vcombine.low %v252_v53, %v256_v22 }
 0x199   :  { %3709 = vmatpush1.bf16.msra.mxu1 %v4689_v32  ;;  %v120_v54 = vld [vmem:[%s7178_s1 + $0x2f8] sm:$0xff]  ;;  %v4762_v32 = vcombine.high %v252_v53, %v256_v22 }
 0x19a   :  { %3710 = vmatprep.subr.bf16.mxu1 %v4682_v35  ;;  %v244_v30 = vld [vmem:[%s7178_s1 + $0x6d8] sm:$0xff]  ;;  %v4626_v40 = vcombine.high %v116_v25, %v120_v54 }
 0x19b   :  { %3670 = vmatpush1.bf16.msra.mxu0 %v4553_v41  ;;  %v248_v31 = vld [vmem:[%s7178_s1 + $0x6f8] sm:$0xff] }
 0x19c   :  { %3671 = vmatprep.subr.bf16.mxu0 %v4546_v43  ;;  %v108_v34 = vld [vmem:[%s7178_s1 + $0x298] sm:$0xff]  ;;  %v4625_v43 = vcombine.low %v116_v25, %v120_v54  ;;  %v4753_v46 = vcombine.low %v244_v30, %v248_v31 }
 0x19d   :  { %3711 = vmatpush1.bf16.msra.mxu1 %v4681_v19  ;;  %v112_v35 = vld [vmem:[%s7178_s1 + $0x2b8] sm:$0xff]  ;;  %v4754_v19 = vcombine.high %v244_v30, %v248_v31 }
 0x19e   :  { %3712 = vmatprep.subr.bf16.mxu1 %v4674_v21  ;;  %v236_v41 = vld [vmem:[%s7178_s1 + $0x698] sm:$0xff]  ;;  %v4618_v47 = vcombine.high %v108_v34, %v112_v35 }
 0x19f   :  { %3672 = vmatpush1.bf16.msra.mxu0 %v4545_v48  ;;  %v240_v42 = vld [vmem:[%s7178_s1 + $0x6b8] sm:$0xff] }
 0x1a0   :  { %3673 = vmatprep.subr.bf16.mxu0 %v4538_v51  ;;  %v100_v44 = vld [vmem:[%s7178_s1 + $0x258] sm:$0xff]  ;;  %v4617_v51 = vcombine.low %v108_v34, %v112_v35  ;;  %v4745_v56 = vcombine.low %v236_v41, %v240_v42 }
 0x1a1   :  { %3713 = vmatpush1.bf16.msra.mxu1 %v4673_v50  ;;  %v104_v21 = vld [vmem:[%s7178_s1 + $0x278] sm:$0xff]  ;;  %v4746_v50 = vcombine.high %v236_v41, %v240_v42 }
 0x1a2   :  { %3714 = vmatprep.subr.bf16.mxu1 %v4666_v55  ;;  %v228_v48 = vld [vmem:[%s7178_s1 + $0x658] sm:$0xff]  ;;  %v4610_v7 = vcombine.high %v100_v44, %v104_v21 }
 0x1a3   :  { %3674 = vmatpush1.bf16.msra.mxu0 %v4537_v57  ;;  %v232_v49 = vld [vmem:[%s7178_s1 + $0x678] sm:$0xff] }
 0x1a4   :  { %3675 = vmatprep.subr.bf16.mxu0 %v4658_v63  ;;  %v92_v52 = vld [vmem:[%s7178_s1 + $0x218] sm:$0xff]  ;;  %v4609_v63 = vcombine.low %v100_v44, %v104_v21 }
 0x1a5   :  { %3715 = vmatpush1.bf16.msra.mxu1 %v4665_v62  ;;  %v96_v55 = vld [vmem:[%s7178_s1 + $0x238] sm:$0xff]  ;;  %v4738_v62 = vcombine.high %v228_v48, %v232_v49 }
 0x1a6   :  { %3716 = vmatprep.subr.bf16.mxu1 %v4786_v2  ;;  %v220_v57 = vld [vmem:[%s7178_s1 + $0x618] sm:$0xff]  ;;  %v4737_v2 = vcombine.low %v228_v48, %v232_v49  ;;  %v4602_v3 = vcombine.high %v92_v52, %v96_v55 }
 0x1a7   :  { %3676 = vmatpush2.bf16.msra.mxu0 %v4657_v5  ;;  %v224_v61 = vld [vmem:[%s7178_s1 + $0x638] sm:$0xff] }
 0x1a8   :  { %3677 = vmatprep.subr.bf16.mxu0 %v4650_v58  ;;  %v340_v1 = vld [vmem:[%s7178_s1 + $0x9d8] sm:$0xff]  ;;  %v4730_v4 = vcombine.high %v220_v57, %v224_v61  ;;  %v4729_v58 = vcombine.low %v220_v57, %v224_v61 }
 0x1a9   :  { %3717 = vmatpush2.bf16.msra.mxu1 %v4785_v10  ;;  %v344_v5 = vld [vmem:[%s7178_s1 + $0x9f8] sm:$0xff]  ;;  %v4601_v10 = vcombine.low %v92_v52, %v96_v55 }
 0x1aa   :  { %3718 = vmatprep.subr.bf16.mxu1 %v4778_v13  ;;  %v468_v6 = vld [vmem:[%s7178_s1 + $0xdd8] sm:$0xff]  ;;  %v4850_v11 = vcombine.high %v340_v1, %v344_v5 }
 0x1ab   :  { %3678 = vmatpush2.bf16.msra.mxu0 %v4649_v15  ;;  %v472_v9 = vld [vmem:[%s7178_s1 + $0xdf8] sm:$0xff] }
 0x1ac   :  { %3679 = vmatprep.subr.bf16.mxu0 %v4642_v37  ;;  %v4978_v12 = vcombine.high %v468_v6, %v472_v9  ;;  %v332_v13 = vld [vmem:[%s7178_s1 + $0x998] sm:$0xff]  ;;  %v4977_v37 = vcombine.low %v468_v6, %v472_v9 }
 0x1ad   :  { %3719 = vmatpush2.bf16.msra.mxu1 %v4777_v18  ;;  %v336_v15 = vld [vmem:[%s7178_s1 + $0x9b8] sm:$0xff]  ;;  %v4849_v18 = vcombine.low %v340_v1, %v344_v5 }
 0x1ae   :  { %3720 = vmatprep.subr.bf16.mxu1 %v4770_v23  ;;  %v460_v17 = vld [vmem:[%s7178_s1 + $0xd98] sm:$0xff]  ;;  %v4842_v53 = vcombine.high %v332_v13, %v336_v15  ;;  %v4841_v31 = vcombine.low %v332_v13, %v336_v15 }
 0x1af   :  { %3680 = vmatpush2.bf16.msra.mxu0 %v4641_v45  ;;  %v464_v59 = vld [vmem:[%s7178_s1 + $0xdb8] sm:$0xff] }
 0x1b0   :  { %3681 = vmatprep.subr.bf16.mxu0 %v4634_v28  ;;  %v4970_v22 = vcombine.high %v460_v17, %v464_v59  ;;  %v324_v23 = vld [vmem:[%s7178_s1 + $0x958] sm:$0xff] }
 0x1b1   :  { %3721 = vmatpush2.bf16.msra.mxu1 %v4769_v27  ;;  %v328_v45 = vld [vmem:[%s7178_s1 + $0x978] sm:$0xff] }
 0x1b2   :  { %3722 = vmatprep.subr.bf16.mxu1 %v4762_v32  ;;  %v452_v54 = vld [vmem:[%s7178_s1 + $0xd58] sm:$0xff] }
 0x1b3   :  { %3682 = vmatpush2.bf16.msra.mxu0 %v4633_v33  ;;  %v456_v27 = vld [vmem:[%s7178_s1 + $0xd78] sm:$0xff]  ;;  %v4834_v33 = vcombine.high %v324_v23, %v328_v45 }
 0x1b4   :  { %3683 = vmatprep.subr.bf16.mxu0 %v4626_v40  ;;  %v444_v41 = vld [vmem:[%s7178_s1 + $0xd18] sm:$0xff]  ;;  %v4961_v21 = vcombine.low %v452_v54, %v456_v27 }
 0x1b5   :  { %3723 = vmatpush2.bf16.msra.mxu1 %v4761_v38  ;;  %v4962_v38 = vcombine.high %v452_v54, %v456_v27  ;;  %v448_v42 = vld [vmem:[%s7178_s1 + $0xd38] sm:$0xff] }
 0x1b6   :  { %3724 = vmatprep.subr.bf16.mxu1 %v4754_v19  ;;  %v308_v48 = vld [vmem:[%s7178_s1 + $0x8d8] sm:$0xff]  ;;  %v4953_v52 = vcombine.low %v444_v41, %v448_v42 }
 0x1b7   :  { %3684 = vmatpush2.bf16.msra.mxu0 %v4625_v43  ;;  %v4833_v43 = vcombine.low %v324_v23, %v328_v45  ;;  %v312_v49 = vld [vmem:[%s7178_s1 + $0x8f8] sm:$0xff] }
 0x1b8   :  { %3685 = vmatprep.subr.bf16.mxu0 %v4618_v47  ;;  %v4954_v47 = vcombine.high %v444_v41, %v448_v42  ;;  %v4818_v55 = vcombine.high %v308_v48, %v312_v49  ;;  %v304_v57 = vld [vmem:[%s7178_s1 + $0x8b8] sm:$0xff] }
 0x1b9   :  { %3725 = vmatpush2.bf16.msra.mxu1 %v4753_v46  ;;  %v428_v61 = vld [vmem:[%s7178_s1 + $0xc98] sm:$0xff] }
 0x1ba   :  { %3726 = vmatprep.subr.bf16.mxu1 %v4746_v50  ;;  %v440_v50 = vld [vmem:[%s7178_s1 + $0xcf8] sm:$0xff] }
 0x1bb   :  { %3686 = vmatpush2.bf16.msra.mxu0 %v4617_v51  ;;  %v296_v5 = vld [vmem:[%s7178_s1 + $0x878] sm:$0xff] }
 0x1bc   :  { %3687 = vmatprep.subr.bf16.mxu0 %v4610_v7  ;;  %v300_v7 = vld [vmem:[%s7178_s1 + $0x898] sm:$0xff] }
 0x1bd   :  { %3727 = vmatpush2.bf16.msra.mxu1 %v4745_v56  ;;  %v420_v6 = vld [vmem:[%s7178_s1 + $0xc58] sm:$0xff] }
 0x1be   :  { %3728 = vmatprep.subr.bf16.mxu1 %v4738_v62  ;;  %v432_v62 = vld [vmem:[%s7178_s1 + $0xcb8] sm:$0xff] }
 0x1bf   :  { %3688 = vmatpush2.bf16.msra.mxu0 %v4609_v63  ;;  %v4817_v63 = vcombine.low %v308_v48, %v312_v49  ;;  %v424_v9 = vld [vmem:[%s7178_s1 + $0xc78] sm:$0xff] }
 0x1c0   :  { %3689 = vmatprep.subr.bf16.mxu0 %v4602_v3  ;;  %v4938_v3 = vcombine.high %v428_v61, %v432_v62  ;;  %v284_v13 = vld [vmem:[%s7178_s1 + $0x818] sm:$0xff] }
 0x1c1   :  { %3729 = vmatpush2.bf16.msra.mxu1 %v4737_v2  ;;  %v4810_v2 = vcombine.high %v300_v7, %v304_v57  ;;  %v288_v15 = vld [vmem:[%s7178_s1 + $0x838] sm:$0xff] }
 0x1c2   :  { %3730 = vmatprep.subr.bf16.mxu1 %v4730_v4  ;;  %v292_v4 = vld [vmem:[%s7178_s1 + $0x858] sm:$0xff]  ;;  %v4793_v27 = vcombine.low %v284_v13, %v288_v15 }
 0x1c3   :  { %3690 = vmatpush2.bf16.msra.mxu0 %v4601_v10  ;;  %v4809_v10 = vcombine.low %v300_v7, %v304_v57  ;;  %v404_v23 = vld [vmem:[%s7178_s1 + $0xbd8] sm:$0xff] }
 0x1c4   :  { %3741 = vmatprep.subr.bf16.mxu0 %v4850_v11  ;;  %v4802_v11 = vcombine.high %v292_v4, %v296_v5  ;;  %v408_v45 = vld [vmem:[%s7178_s1 + $0xbf8] sm:$0xff] }
 0x1c5   :  { %3731 = vmatpush2.bf16.msra.mxu1 %v4729_v58  ;;  %v4937_v58 = vcombine.low %v428_v61, %v432_v62  ;;  %v536_v54 = vld [vmem:[%s7178_s1 + $0xff8] sm:$0xff] }
 0x1c6   :  { %3782 = vmatprep.subr.bf16.mxu1 %v4978_v12  ;;  %v3447_v25 = vpop.f32.mrf.mxu0  ;;  %3692 = vmatmul.mubr.bf16.vlgmr.msra.gmra.mxu0 %v5531_v16  ;;  %v4969_v16 = vcombine.low %v460_v17, %v464_v59  ;;  %v4930_v12 = vcombine.high %v420_v6, %v424_v9  ;;  %v412_v17 = vld [vmem:[%s7178_s1 + $0xc18] sm:$0xff] }
 0x1c7   :  { %v3448_v28 = vadd.f32 %v3447_v25, %v6594_v0  ;;  %3742 = vmatpush1.bf16.msra.mxu0 %v4849_v18  ;;  %v316_v0 = vld [vmem:[%s7178_s1 + $0x918] sm:$0xff]  ;;  %3773 = vmatprep.mubr.bf16.mxu0 %v5561_v26  ;;  %v4801_v18 = vcombine.low %v292_v4, %v296_v5 }
 0x1c8   :  { %v3488_v30 = vpop.f32.mrf.mxu1  ;;  %3733 = vmatmul.mubr.bf16.vlgmr.msra.gmra.mxu1 %v5546_v20  ;;  %v6789_v32 = vpop.f32.mrf.mxu0  ;;  %3743 = vmatprep.subr.bf16.mxu0 %v4842_v53  ;;  %v320_v20 = vld [vmem:[%s7178_s1 + $0x938] sm:$0xff]  ;;  %v4794_v53 = vcombine.high %v284_v13, %v288_v15 }
 0x1c9   :  { %3783 = vmatpush1.bf16.msra.mxu1 %v4977_v37  ;;  %v6791_v34 = vadd.f32 %v3488_v30, %v3448_v28  ;;  %3814 = vmatprep.mubr.bf16.mxu1 %v5572_v29  ;;  %v4826_v46 = vcombine.high %v316_v0, %v320_v20  ;;  %v436_v29 = vld [vmem:[%s7178_s1 + $0xcd8] sm:$0xff]  ;;  %v4825_v51 = vcombine.low %v316_v0, %v320_v20 }
 0x1ca   :  { %v6793_v35 = vpop.f32.mrf.mxu1  ;;  %3784 = vmatprep.subr.bf16.mxu1 %v4970_v22  ;;  %v3451_v40 = vpop.f32.mrf.mxu0  ;;  %v4946_v56 = vcombine.high %v436_v29, %v440_v50  ;;  %v4945_v1 = vcombine.low %v436_v29, %v440_v50  ;;  %v416_v59 = vld [vmem:[%s7178_s1 + $0xc38] sm:$0xff]  ;;  %v4929_v37 = vcombine.low %v420_v6, %v424_v9  ;;  %v4914_v30 = vcombine.high %v404_v23, %v408_v45 }
 0x1cb   :  { %3744 = vmatpush1.bf16.msra.mxu0 %v4841_v31  ;;  %v4922_v22 = vcombine.high %v412_v17, %v416_v59  ;;  %v532_v25 = vld [vmem:[%s7178_s1 + $0xfd8] sm:$0xff]  ;;  %v4921_v28 = vcombine.low %v412_v17, %v416_v59  ;;  %v4913_v20 = vcombine.low %v404_v23, %v408_v45 }
 0x1cc   :  { %v3492_v19 = vpop.f32.mrf.mxu1  ;;  %v3452_v44 = vpop.f32.mrf.mxu0  ;;  %3745 = vmatprep.subr.bf16.mxu0 %v4834_v33  ;;  %v5042_v31 = vcombine.high %v532_v25, %v536_v54  ;;  %v400_v33 = vld [vmem:[%s7178_s1 + $0xbb8] sm:$0xff]  ;;  %v5041_v40 = vcombine.low %v532_v25, %v536_v54 }
 0x1cd   :  { %3785 = vmatpush1.bf16.msra.mxu1 %v4969_v16  ;;  %v396_v16 = vld [vmem:[%s7178_s1 + $0xb98] sm:$0xff] }
 0x1ce   :  { %v3493_v26 = vpop.f32.mrf.mxu1  ;;  %3786 = vmatprep.subr.bf16.mxu1 %v4962_v38  ;;  %v524_v38 = vld [vmem:[%s7178_s1 + $0xf98] sm:$0xff]  ;;  %v4906_v41 = vcombine.high %v396_v16, %v400_v33 }
 0x1cf   :  { %3746 = vmatpush1.bf16.msra.mxu0 %v4833_v43  ;;  %v528_v0 = vld [vmem:[%s7178_s1 + $0xfb8] sm:$0xff] }
 0x1d0   :  { %3747 = vmatprep.subr.bf16.mxu0 %v4826_v46  ;;  %v5034_v42 = vcombine.high %v524_v38, %v528_v0  ;;  %v388_v19 = vld [vmem:[%s7178_s1 + $0xb58] sm:$0xff]  ;;  %v4905_v46 = vcombine.low %v396_v16, %v400_v33  ;;  %v5033_v26 = vcombine.low %v524_v38, %v528_v0 }
 0x1d1   :  { %3787 = vmatpush1.bf16.msra.mxu1 %v4961_v21  ;;  %v392_v43 = vld [vmem:[%s7178_s1 + $0xb78] sm:$0xff] }
 0x1d2   :  { %3788 = vmatprep.subr.bf16.mxu1 %v4954_v47  ;;  %v516_v44 = vld [vmem:[%s7178_s1 + $0xf58] sm:$0xff]  ;;  %v4898_v47 = vcombine.high %v388_v19, %v392_v43 }
 0x1d3   :  { %3748 = vmatpush1.bf16.msra.mxu0 %v4825_v51  ;;  %v520_v21 = vld [vmem:[%s7178_s1 + $0xf78] sm:$0xff] }
 0x1d4   :  { %3749 = vmatprep.subr.bf16.mxu0 %v4818_v55  ;;  %v5026_v48 = vcombine.high %v516_v44, %v520_v21  ;;  %v380_v49 = vld [vmem:[%s7178_s1 + $0xb18] sm:$0xff]  ;;  %v5025_v55 = vcombine.low %v516_v44, %v520_v21 }
 0x1d5   :  { %3789 = vmatpush1.bf16.msra.mxu1 %v4953_v52  ;;  %v384_v29 = vld [vmem:[%s7178_s1 + $0xb38] sm:$0xff]  ;;  %v4897_v52 = vcombine.low %v388_v19, %v392_v43  ;;  %v5208_v19 = vld [vmem:[%s7181_s3 + $0x70] sm:$0xff]  }
 0x1d6   :  { %3790 = vmatprep.subr.bf16.mxu1 %v4946_v56  ;;  %v508_v50 = vld [vmem:[%s7178_s1 + $0xf18] sm:$0xff]  ;;  %v4890_v56 = vcombine.high %v380_v49, %v384_v29 }
 0x1d7   :  { %3750 = vmatpush1.bf16.msra.mxu0 %v4817_v63  ;;  %v512_v51 = vld [vmem:[%s7178_s1 + $0xf38] sm:$0xff] }
 0x1d8   :  { %3751 = vmatprep.subr.bf16.mxu0 %v4810_v2  ;;  %v5018_v7 = vcombine.high %v508_v50, %v512_v51  ;;  %v372_v57 = vld [vmem:[%s7178_s1 + $0xad8] sm:$0xff]  ;;  %v5017_v2 = vcombine.low %v508_v50, %v512_v51  ;;  %v5214_v51 = vld [vmem:[%s7181_s3 + $0x28] sm:$0xff]  }
 0x1d9   :  { %3791 = vmatpush1.bf16.msra.mxu1 %v4945_v1  ;;  %v376_v61 = vld [vmem:[%s7178_s1 + $0xaf8] sm:$0xff]  ;;  %v4889_v1 = vcombine.low %v380_v49, %v384_v29 }
 0x1da   :  { %3792 = vmatprep.subr.bf16.mxu1 %v4938_v3  ;;  %v500_v62 = vld [vmem:[%s7178_s1 + $0xed8] sm:$0xff]  ;;  %v4882_v3 = vcombine.high %v372_v57, %v376_v61 }
 0x1db   :  { %3752 = vmatpush1.bf16.msra.mxu0 %v4809_v10  ;;  %v504_v63 = vld [vmem:[%s7178_s1 + $0xef8] sm:$0xff] }
 0x1dc   :  { %3753 = vmatprep.subr.bf16.mxu0 %v4802_v11  ;;  %v5010_v4 = vcombine.high %v500_v62, %v504_v63  ;;  %v364_v5 = vld [vmem:[%s7178_s1 + $0xa98] sm:$0xff]  ;;  %v5009_v11 = vcombine.low %v500_v62, %v504_v63  ;;  %v5219_v62 = vld [vmem:[%s7181_s3 + $0xa0] sm:$0xff]  }
 0x1dd   :  { %3793 = vmatpush1.bf16.msra.mxu1 %v4937_v58  ;;  %v368_v6 = vld [vmem:[%s7178_s1 + $0xab8] sm:$0xff]  ;;  %v4881_v58 = vcombine.low %v372_v57, %v376_v61  ;;  %v5217_v57 = vld [vmem:[%s7181_s3 + $0xe0] sm:$0xff]  }
 0x1de   :  { %3794 = vmatprep.subr.bf16.mxu1 %v4930_v12  ;;  %v492_v9 = vld [vmem:[%s7178_s1 + $0xe98] sm:$0xff]  ;;  %v4874_v12 = vcombine.high %v364_v5, %v368_v6  ;;  %v5218_v61 = vld [vmem:[%s7181_s3 + $0x20] sm:$0xff]  }
 0x1df   :  { %3754 = vmatpush1.bf16.msra.mxu0 %v4801_v18  ;;  %v496_v10 = vld [vmem:[%s7178_s1 + $0xeb8] sm:$0xff] }
 0x1e0   :  { %3755 = vmatprep.subr.bf16.mxu0 %v4794_v53  ;;  %v5002_v13 = vcombine.high %v492_v9, %v496_v10  ;;  %v356_v15 = vld [vmem:[%s7178_s1 + $0xa58] sm:$0xff]  ;;  %v5001_v53 = vcombine.low %v492_v9, %v496_v10  ;;  %v5227_v9 = vld [vmem:[%s7181_s3 + $0x90] sm:$0xff]   ;;  %v5228_v10 = vld [vmem:[%s7181_s3 + $0x48] sm:$0xff]  }
 0x1e1   :  { %3795 = vmatpush1.bf16.msra.mxu1 %v4929_v37  ;;  %v360_v17 = vld [vmem:[%s7178_s1 + $0xa78] sm:$0xff]  ;;  %v4873_v37 = vcombine.low %v364_v5, %v368_v6  ;;  %v5225_v5 = vld [vmem:[%s7181_s3 + $0xd0] sm:$0xff]  }
 0x1e2   :  { %3796 = vmatprep.subr.bf16.mxu1 %v4922_v22  ;;  %v484_v59 = vld [vmem:[%s7178_s1 + $0xe58] sm:$0xff]  ;;  %v4866_v22 = vcombine.high %v356_v15, %v360_v17  ;;  %v5226_v6 = vld [vmem:[%s7181_s3 + $0x10] sm:$0xff]  }
 0x1e3   :  { %3756 = vmatpush1.bf16.msra.mxu0 %v4793_v27  ;;  %v488_v18 = vld [vmem:[%s7178_s1 + $0xe78] sm:$0xff] }
 0x1e4   :  { %3757 = vmatprep.subr.bf16.mxu0 %v4914_v30  ;;  %v4994_v23 = vcombine.high %v484_v59, %v488_v18  ;;  %v348_v45 = vld [vmem:[%s7178_s1 + $0xa18] sm:$0xff]  ;;  %v4865_v30 = vcombine.low %v356_v15, %v360_v17  ;;  %v5233_v15 = vld [vmem:[%s7181_s3 + $0xc0] sm:$0xff]  }
 0x1e5   :  { %3797 = vmatpush1.bf16.msra.mxu1 %v4921_v28  ;;  %v352_v25 = vld [vmem:[%s7178_s1 + $0xa38] sm:$0xff]  ;;  %v3450_v28 = vadd.f32 %v6789_v32, %v6604_v8  ;;  %v3824_v32 = vmax.f32 %v6400_v24, 0.0  ;;  %v5209_v24 = vld [vmem:[%s7181_s3 + $0xf0] sm:$0xff]   ;;  %v5234_v17 = vld [vmem:[%s7181_s3] sm:$0xff]  }
 0x1e6   :  { %3798 = vmatprep.subr.bf16.mxu1 %v5042_v31  ;;  %v476_v54 = vld [vmem:[%s7178_s1 + $0xe18] sm:$0xff]  ;;  %v4993_v31 = vcombine.low %v484_v59, %v488_v18  ;;  %v4858_v16 = vcombine.high %v348_v45, %v352_v25  ;;  %v4857_v0 = vcombine.low %v348_v45, %v352_v25  ;;  %v3823_v59 = vmax.f32 %v6383_v14, 0.0  ;;  %v5235_v18 = vld [vmem:[%s7181_s3 + $0x80] sm:$0xff]   ;;  %v5238_v45 = vld [vmem:[%s7181_s3 + $0x170] sm:$0xff]  }
 0x1e7   :  { %3758 = vmatpush2.bf16.msra.mxu0 %v4913_v20  ;;  %v480_v27 = vld [vmem:[%s7178_s1 + $0xe38] sm:$0xff]  ;;  %v3491_v38 = vadd.f32 %v6793_v35, %v3450_v28  ;;  %v3832_v43 = vpack.c.bf16 %v3824_v32, %v3824_v32  ;;  %v5240_v28 = vld [vmem:[%s7181_s3 + $0x168] sm:$0xff]  }
 0x1e8   :  { %3759 = vmatprep.subr.bf16.mxu0 %v4906_v41  ;;  %v4986_v33 = vcombine.high %v476_v54, %v480_v27  ;;  %v4985_v20 = vcombine.low %v476_v54, %v480_v27  ;;  %v5205_v8 = vld [vmem:[%s7181_s3 + $0xf8] sm:$0xff]   ;;  %v5254_v54 = vld [vmem:[%s7181_s3 + $0x1f0] sm:$0xff]  }
 0x1e9   :  { %3799 = vmatpush2.bf16.msra.mxu1 %v5041_v40  ;;  %v5204_v40 = vld [vmem:[%s7181_s3 + $0x78] sm:$0xff]   ;;  %v3826_v41 = vmax.f32 %v3491_v38, 0.0  ;;  %v5239_v27 = vld [vmem:[%s7181_s3 + $0x130] sm:$0xff]   ;;  %v5257_v38 = vld [vmem:[%s7181_s3 + $0x1a8] sm:$0xff]  }
 0x1ea   :  { %3800 = vmatprep.subr.bf16.mxu1 %v5034_v42  ;;  %v5206_v35 = vld [vmem:[%s7181_s3 + $0x38] sm:$0xff]  }
 0x1eb   :  { %3760 = vmatpush2.bf16.msra.mxu0 %v4905_v46  ;;  %v5207_v42 = vld [vmem:[%s7181_s3 + $0xb8] sm:$0xff]   ;;  %v3834_v21 = vpack.c.bf16 %v3826_v41, %v3826_v41 }
 0x1ec   :  { %3761 = vmatprep.subr.bf16.mxu0 %v4898_v47  ;;  %v5220_v63 = vld [vmem:[%s7181_s3 + $0x58] sm:$0xff]  }
 0x1ed   :  { %3801 = vmatpush2.bf16.msra.mxu1 %v5033_v26  ;;  %v5210_v26 = vld [vmem:[%s7181_s3 + $0x30] sm:$0xff]   ;;  %v5237_v14 = vld [vmem:[%s7181_s3 + $0x138] sm:$0xff]  }
 0x1ee   :  { %3802 = vmatprep.subr.bf16.mxu1 %v5026_v48  ;;  %v5212_v48 = vld [vmem:[%s7181_s3 + $0x68] sm:$0xff]   ;;  %v5260_v32 = vld [vmem:[%s7181_s3 + $0x1d8] sm:$0xff]  }
 0x1ef   :  { %3762 = vmatpush2.bf16.msra.mxu0 %v4897_v52  ;;  %v5245_v41 = vld [vmem:[%s7181_s3 + $0x118] sm:$0xff]  }
 0x1f0   :  { %3763 = vmatprep.subr.bf16.mxu0 %v4890_v56  ;;  %v5216_v56 = vld [vmem:[%s7181_s3 + $0x60] sm:$0xff]  }
 0x1f1   :  { %3803 = vmatpush2.bf16.msra.mxu1 %v5025_v55  ;;  %v5215_v55 = vld [vmem:[%s7181_s3 + $0xa8] sm:$0xff]  }
 0x1f2   :  { %3804 = vmatprep.subr.bf16.mxu1 %v5018_v7 }
 0x1f3   :  { %3764 = vmatpush2.bf16.msra.mxu0 %v4889_v1  ;;  %v5221_v1 = vld [vmem:[%s7181_s3 + $0xd8] sm:$0xff]  }
 0x1f4   :  { %3765 = vmatprep.subr.bf16.mxu0 %v4882_v3  ;;  %v5223_v3 = vld [vmem:[%s7181_s3 + $0x98] sm:$0xff]  }
 0x1f5   :  { %3805 = vmatpush2.bf16.msra.mxu1 %v5017_v2  ;;  %v5222_v2 = vld [vmem:[%s7181_s3 + $0x18] sm:$0xff]  }
 0x1f6   :  { %3806 = vmatprep.subr.bf16.mxu1 %v5010_v4  ;;  %v5224_v4 = vld [vmem:[%s7181_s3 + $0x50] sm:$0xff]  }
 0x1f7   :  { %3766 = vmatpush2.bf16.msra.mxu0 %v4881_v58  ;;  %v5229_v58 = vld [vmem:[%s7181_s3 + $0xc8] sm:$0xff]  }
 0x1f8   :  { %3767 = vmatprep.subr.bf16.mxu0 %v4874_v12  ;;  %v5231_v12 = vld [vmem:[%s7181_s3 + $0x88] sm:$0xff]  }
 0x1f9   :  { %3807 = vmatpush2.bf16.msra.mxu1 %v5009_v11  ;;  %v5230_v11 = vld [vmem:[%s7181_s3 + $0x8] sm:$0xff]  }
 0x1fa   :  { %3808 = vmatprep.subr.bf16.mxu1 %v5002_v13  ;;  %v5232_v13 = vld [vmem:[%s7181_s3 + $0x40] sm:$0xff]  }
 0x1fb   :  { %3768 = vmatpush2.bf16.msra.mxu0 %v4873_v37  ;;  %v5236_v37 = vld [vmem:[%s7181_s3 + $0x178] sm:$0xff]  }
 0x1fc   :  { %3769 = vmatprep.subr.bf16.mxu0 %v4866_v22  ;;  %v5252_v22 = vld [vmem:[%s7181_s3 + $0x1f8] sm:$0xff]  }
 0x1fd   :  { %3809 = vmatpush2.bf16.msra.mxu1 %v5001_v53  ;;  %v3825_v53 = vmax.f32 %v6791_v34, 0.0  ;;  %v5253_v34 = vld [vmem:[%s7181_s3 + $0x1b8] sm:$0xff]  }
 0x1fe   :  { %3810 = vmatprep.subr.bf16.mxu1 %v4994_v23  ;;  %v3831_v23 = vpack.c.bf16 %v3823_v59, %v3823_v59 }
 0x1ff   :  { %3770 = vmatpush2.bf16.msra.mxu0 %v4865_v30  ;;  %v3833_v25 = vpack.c.bf16 %v3825_v53, %v3825_v53  ;;  %v5255_v30 = vld [vmem:[%s7181_s3 + $0x1b0] sm:$0xff]  }
 0x200   :  { %3771 = vmatprep.subr.bf16.mxu0 %v4858_v16  ;;  %v5241_v16 = vld [vmem:[%s7181_s3 + $0x128] sm:$0xff]  }
 0x201   :  { %3811 = vmatpush2.bf16.msra.mxu1 %v4993_v31  ;;  %v5256_v31 = vld [vmem:[%s7181_s3 + $0x1e8] sm:$0xff]  }
 0x202   :  { %3812 = vmatprep.subr.bf16.mxu1 %v4986_v33  ;;  %v5242_v33 = vld [vmem:[%s7181_s3 + $0x160] sm:$0xff]  }
 0x203   :  { %3772 = vmatpush2.bf16.msra.mxu0 %v4857_v0  ;;  %v5258_v0 = vld [vmem:[%s7181_s3 + $0x1e0] sm:$0xff]  }
 0x204   :  { %5108 = vmatprep.subr.bf16.mxu0 %v5204_v40  ;;  %v5244_v40 = vld [vmem:[%s7181_s3 + $0x158] sm:$0xff]  }
 0x205   :  { %3813 = vmatpush2.bf16.msra.mxu1 %v4985_v20  ;;  %v5243_v20 = vld [vmem:[%s7181_s3 + $0x120] sm:$0xff]  }
 0x206   :  { %5130 = vmatprep.subr.bf16.mxu1 %v5205_v8  ;;  %v6972_v44 = vpop.f32.mrf.mxu0  ;;  %3774 = vmatmul.mubr.bf16.vlgmr.msra.gmra.mxu0 %v5753_v36  ;;  %v5211_v36 = vld [vmem:[%s7181_s3 + $0xb0] sm:$0xff]   ;;  %v5259_v8 = vld [vmem:[%s7181_s3 + $0x1a0] sm:$0xff]  }
 0x207   :  { %5109 = vmatpush3.bf16.msra.mxu0 %v5206_v35  ;;  %4390 = vmatprep.mubr.bf16.mxu0 %v3832_v43  ;;  %v5246_v35 = vld [vmem:[%s7181_s3 + $0x150] sm:$0xff]   ;;  %v5248_v43 = vld [vmem:[%s7181_s3 + $0x148] sm:$0xff]  }
 0x208   :  { %v6978_v46 = vpop.f32.mrf.mxu1  ;;  %3815 = vmatmul.mubr.bf16.vlgmr.msra.gmra.mxu1 %v5763_v39  ;;  %v6984_v47 = vpop.f32.mrf.mxu0  ;;  %5110 = vmatprep.subr.bf16.mxu0 %v5208_v19  ;;  %v5213_v39 = vld [vmem:[%s7181_s3 + $0xe8] sm:$0xff]   ;;  %v5247_v19 = vld [vmem:[%s7181_s3 + $0x110] sm:$0xff]  }
 0x209   :  { %5131 = vmatpush3.bf16.msra.mxu1 %v5207_v42  ;;  %4430 = vmatprep.mubr.bf16.mxu1 %v3834_v21  ;;  %v5261_v42 = vld [vmem:[%s7181_s3 + $0x198] sm:$0xff]   ;;  %v561_v21 = vsub.s32 5, %v6133_v60 }
 0x20a   :  { %v6992_v49 = vpop.f32.mrf.mxu1  ;;  %v3533_v29 = vpop.f32.mrf.mxu0  ;;  %5132 = vmatprep.subr.bf16.mxu1 %v5209_v24  ;;  %v557_v24 = vsub.s32 4, %v6133_v60 }
 0x20b   :  { %5111 = vmatpush3.bf16.msra.mxu0 %v5210_v26  ;;  %v5249_v26 = vld [vmem:[%s7181_s3 + $0x108] sm:$0xff]  }
 0x20c   :  { %v3574_v50 = vpop.f32.mrf.mxu1  ;;  %v3534_v52 = vpop.f32.mrf.mxu0  ;;  %5112 = vmatprep.subr.bf16.mxu0 %v5212_v48  ;;  %v5268_v48 = vld [vmem:[%s7180_s2] sm:$0xff] }
 0x20d   :  { %5133 = vmatpush3.bf16.msra.mxu1 %v5211_v36  ;;  %v5250_v36 = vld [vmem:[%s7181_s3 + $0x140] sm:$0xff]   ;;  %v562_v29 = vrot.slane %v5268_v48, %v561_v21 }
 0x20e   :  { %v3575_v7 = vpop.f32.mrf.mxu1  ;;  %5134 = vmatprep.subr.bf16.mxu1 %v5213_v39  ;;  %v558_v39 = vrot.slane %v5268_v48, %v557_v24  ;;  %v5251_v50 = vld [vmem:[%s7181_s3 + $0x100] sm:$0xff]  }
 0x20f   :  { %5113 = vmatpush3.bf16.msra.mxu0 %v5214_v51  ;;  %v3532_v52 = vadd.f32 %v6984_v47, %v562_v29  ;;  %v5262_v7 = vld [vmem:[%s7181_s3 + $0x1d0] sm:$0xff]  }
 0x210   :  { %5114 = vmatprep.subr.bf16.mxu0 %v5216_v56  ;;  %v3530_v51 = vadd.f32 %v6972_v44, %v558_v39 }
 0x211   :  { %5135 = vmatpush3.bf16.msra.mxu1 %v5215_v55 }
 0x212   :  { %5136 = vmatprep.subr.bf16.mxu1 %v5217_v57  ;;  %v3571_v55 = vadd.f32 %v6978_v46, %v3530_v51  ;;  %v3573_v57 = vadd.f32 %v6992_v49, %v3532_v52  ;;  %v5265_v49 = vld [vmem:[%s7181_s3 + $0x188] sm:$0xff]  }
 0x213   :  { %5115 = vmatpush3.bf16.msra.mxu0 %v5218_v61 }
 0x214   :  { %5116 = vmatprep.subr.bf16.mxu0 %v5220_v63  ;;  %v5263_v63 = vld [vmem:[%s7181_s3 + $0x190] sm:$0xff]  }
 0x215   :  { %5137 = vmatpush3.bf16.msra.mxu1 %v5219_v62 }
 0x216   :  { %5138 = vmatprep.subr.bf16.mxu1 %v5221_v1 }
 0x217   :  { %5117 = vmatpush3.bf16.msra.mxu0 %v5222_v2 }
 0x218   :  { %5118 = vmatprep.subr.bf16.mxu0 %v5224_v4 }
 0x219   :  { %5139 = vmatpush3.bf16.msra.mxu1 %v5223_v3  ;;  %v5264_v3 = vld [vmem:[%s7181_s3 + $0x1c8] sm:$0xff]  }
 0x21a   :  { %5140 = vmatprep.subr.bf16.mxu1 %v5225_v5 }
 0x21b   :  { %5119 = vmatpush3.bf16.msra.mxu0 %v5226_v6 }
 0x21c   :  { %5120 = vmatprep.subr.bf16.mxu0 %v5228_v10 }
 0x21d   :  { %5141 = vmatpush3.bf16.msra.mxu1 %v5227_v9 }
 0x21e   :  { %5142 = vmatprep.subr.bf16.mxu1 %v5229_v58 }
 0x21f   :  { %5121 = vmatpush3.bf16.msra.mxu0 %v5230_v11  ;;  %v5266_v11 = vld [vmem:[%s7181_s3 + $0x1c0] sm:$0xff]  }
 0x220   :  { %5122 = vmatprep.subr.bf16.mxu0 %v5232_v13  ;;  %v5267_v13 = vld [vmem:[%s7181_s3 + $0x180] sm:$0xff]  }
 0x221   :  { %5143 = vmatpush3.bf16.msra.mxu1 %v5231_v12 }
 0x222   :  { %5144 = vmatprep.subr.bf16.mxu1 %v5233_v15 }
 0x223   :  { %5123 = vmatpush3.bf16.msra.mxu0 %v5234_v17 }
 0x224   :  { %5152 = vmatprep.subr.bf16.mxu0 %v5236_v37 }
 0x225   :  { %5145 = vmatpush3.bf16.msra.mxu1 %v5235_v18 }
 0x226   :  { %5174 = vmatprep.subr.bf16.mxu1 %v5252_v22  ;;  %4391 = vmatmul.mubr.bf16.vlgmr.msra.gmra.mxu0 %v3831_v23 }
 0x227   :  { %5153 = vmatpush3.bf16.msra.mxu0 %v5237_v14 }
 0x228   :  { %4431 = vmatmul.mubr.bf16.vlgmr.msra.gmra.mxu1 %v3833_v25  ;;  %5154 = vmatprep.subr.bf16.mxu0 %v5238_v45  ;;  %v565_v45 = vsub.s32 6, %v6133_v60 }
 0x229   :  { %5175 = vmatpush3.bf16.msra.mxu1 %v5253_v34  ;;  %v569_v34 = vsub.s32 7, %v6133_v60 }
 0x22a   :  { %5176 = vmatprep.subr.bf16.mxu1 %v5254_v54  ;;  %v566_v25 = vrot.slane %v5268_v48, %v565_v45 }
 0x22b   :  { %5155 = vmatpush3.bf16.msra.mxu0 %v5239_v27  ;;  %v570_v54 = vrot.slane %v5268_v48, %v569_v34  ;;  %v5043_v48 = vld [vmem:[%s7182_s4] ss:$0 sm:$0xff] }
 0x22c   :  { %5156 = vmatprep.subr.bf16.mxu0 %v5240_v28 }
 0x22d   :  { %5177 = vmatpush3.bf16.msra.mxu1 %v5255_v30 }
 0x22e   :  { %5178 = vmatprep.subr.bf16.mxu1 %v5256_v31 }
 0x22f   :  { %5157 = vmatpush3.bf16.msra.mxu0 %v5241_v16 }
 0x230   :  { %5158 = vmatprep.subr.bf16.mxu0 %v5242_v33 }
 0x231   :  { %5179 = vmatpush3.bf16.msra.mxu1 %v5257_v38 }
 0x232   :  { %5180 = vmatprep.subr.bf16.mxu1 %v5258_v0 }
 0x233   :  { %5159 = vmatpush3.bf16.msra.mxu0 %v5243_v20 }
 0x234   :  { %5160 = vmatprep.subr.bf16.mxu0 %v5244_v40 }
 0x235   :  { %5181 = vmatpush3.bf16.msra.mxu1 %v5259_v8 }
 0x236   :  { %5182 = vmatprep.subr.bf16.mxu1 %v5260_v32 }
 0x237   :  { %5161 = vmatpush3.bf16.msra.mxu0 %v5245_v41 }
 0x238   :  { %5162 = vmatprep.subr.bf16.mxu0 %v5246_v35 }
 0x239   :  { %5183 = vmatpush3.bf16.msra.mxu1 %v5261_v42 }
 0x23a   :  { %5184 = vmatprep.subr.bf16.mxu1 %v5262_v7 }
 0x23b   :  { %5163 = vmatpush3.bf16.msra.mxu0 %v5247_v19 }
 0x23c   :  { %5164 = vmatprep.subr.bf16.mxu0 %v5248_v43 }
 0x23d   :  { %5185 = vmatpush3.bf16.msra.mxu1 %v5263_v63 }
 0x23e   :  { %5186 = vmatprep.subr.bf16.mxu1 %v5264_v3 }
 0x23f   :  { %5165 = vmatpush3.bf16.msra.mxu0 %v5249_v26 }
 0x240   :  { %5166 = vmatprep.subr.bf16.mxu0 %v5250_v36 }
 0x241   :  { %5187 = vmatpush3.bf16.msra.mxu1 %v5265_v49 }
 0x242   :  { %5188 = vmatprep.subr.bf16.mxu1 %v5266_v11 }
 0x243   :  { %5167 = vmatpush3.bf16.msra.mxu0 %v5251_v50 }
 0x245   :  { %5189 = vmatpush3.bf16.msra.mxu1 %v5267_v13 }
 0x246   :  { %v3611_v56 = vpop.f32.mrf.mxu0 }
 0x247   :  { %v3612_v61 = vadd.f32 %v3611_v56, %v3571_v55 }
 0x248   :  { %v3652_v62 = vpop.f32.mrf.mxu1  ;;  %v3613_v1 = vpop.f32.mrf.mxu0 }
 0x249   :  { %v3653_v44 = vadd.f32 %v3652_v62, %v3612_v61  ;;  %v3614_v47 = vadd.f32 %v3613_v1, %v3573_v57 }
 0x24a   :  { %v3654_v2 = vpop.f32.mrf.mxu1  ;;  %v3615_v46 = vpop.f32.mrf.mxu0 }
 0x24b   :  { %v3655_v4 = vadd.f32 %v3654_v2, %v3614_v47  ;;  %v3827_v6 = vmax.f32 %v3653_v44, 0.0 }
 0x24c   :  { %v3656_v5 = vpop.f32.mrf.mxu1  ;;  %v3616_v9 = vpop.f32.mrf.mxu0 }
 0x24d   :  { %v3828_v10 = vmax.f32 %v3655_v4, 0.0  ;;  %v3835_v15 = vpack.c.bf16 %v3827_v6, %v3827_v6 }
 0x24e   :  { %v3657_v58 = vpop.f32.mrf.mxu1 }
 0x24f   :  { %v3836_v12 = vpack.c.bf16 %v3828_v10, %v3828_v10 }
 0x251   :  { %4470 = vmatprep.mubr.bf16.mxu0 %v3836_v12 }
 0x252   :  { %4471 = vmatmul.mubr.bf16.vlgmr.msra.gmra.mxu0 %v3835_v15 }
 0x286   :  { %v3693_v17 = vpop.f32.mrf.mxu0 }
 0x287   :  { %v3694_v27 = vadd.f32 %v3693_v17, %v566_v25 }
 0x288   :  { %v3734_v59 = vpop.f32.mrf.mxu1  ;;  %v3695_v18 = vpop.f32.mrf.mxu0 }
 0x289   :  { %v3696_v28 = vadd.f32 %v3695_v18, %v570_v54  ;;  %v3735_v30 = vadd.f32 %v3734_v59, %v3694_v27 }
 0x28a   :  { %v3736_v37 = vpop.f32.mrf.mxu1  ;;  %v3697_v53 = vpop.f32.mrf.mxu0 }
 0x28b   :  { %v3737_v16 = vadd.f32 %v3736_v37, %v3696_v28 }
 0x28c   :  { %v3738_v22 = vpop.f32.mrf.mxu1  ;;  %v3698_v14 = vpop.f32.mrf.mxu0 }
 0x28e   :  { %v3739_v23 = vpop.f32.mrf.mxu1 }
 0x2c6   :  { %v3775_v31 = vpop.f32.mrf.mxu0 }
 0x2c7   :  { %v3776_v33 = vadd.f32 %v3775_v31, %v3735_v30 }
 0x2c8   :  { %v3816_v38 = vpop.f32.mrf.mxu1  ;;  %v3777_v0 = vpop.f32.mrf.mxu0 }
 0x2c9   :  { %v3817_v20 = vadd.f32 %v3816_v38, %v3776_v33  ;;  %v3778_v40 = vadd.f32 %v3777_v0, %v3737_v16 }
 0x2ca   :  { %v3818_v8 = vpop.f32.mrf.mxu1  ;;  %v3779_v32 = vpop.f32.mrf.mxu0 }
 0x2cb   :  { %v3819_v41 = vadd.f32 %v3818_v8, %v3778_v40  ;;  %v3829_v42 = vmax.f32 %v3817_v20, 0.0 }
 0x2cc   :  { %v3820_v35 = vpop.f32.mrf.mxu1  ;;  %v3780_v19 = vpop.f32.mrf.mxu0 }
 0x2cd   :  { %v3830_v43 = vmax.f32 %v3819_v41, 0.0  ;;  %v3837_v21 = vpack.c.bf16 %v3829_v42, %v3829_v42 }
 0x2ce   :  { %v3821_v60 = vpop.f32.mrf.mxu1 }
 0x2cf   :  { %v3838_v24 = vpack.c.bf16 %v3830_v43, %v3830_v43 }
 0x2d1   :  { %4510 = vmatprep.mubr.bf16.mxu1 %v3838_v24 }
 0x2d2   :  { %4511 = vmatmul.mubr.bf16.vlgmr.msra.gmra.mxu1 %v3837_v21 }
 0x2e6   :  { %v5124_v26 = vpop.f32.mrf.mxu0 }
 0x2e8   :  { %v5146_v36 = vpop.f32.mrf.mxu1  ;;  %v5125_v39 = vpop.f32.mrf.mxu0 }
 0x2e9   :  { %v5126_v29 = vadd.f32 %v5125_v39, %v5124_v26 }
 0x2ea   :  { %v5147_v50 = vpop.f32.mrf.mxu1  ;;  %v5127_v52 = vpop.f32.mrf.mxu0 }
 0x2eb   :  { %v5148_v51 = vadd.f32 %v5147_v50, %v5146_v36  ;;  %v4393_v55 = vadd.f32 %v5126_v29, %v5043_v48 }
 0x2ec   :  { %v5149_v56 = vpop.f32.mrf.mxu1  ;;  %v5128_v7 = vpop.f32.mrf.mxu0 }
 0x2ed   :  { %v4433_v57 = vadd.f32 %v5148_v51, %v4393_v55 }
 0x2ee   :  { %v5150_v61 = vpop.f32.mrf.mxu1 }
 0x312   :  { %v5168_v62 = vpop.f32.mrf.mxu0 }
 0x314   :  { %v5169_v63 = vpop.f32.mrf.mxu0 }
 0x315   :  { %v5170_v1 = vadd.f32 %v5169_v63, %v5168_v62 }
 0x316   :  { %v5171_v44 = vpop.f32.mrf.mxu0 }
 0x317   :  { %v4473_v47 = vadd.f32 %v5170_v1, %v4433_v57 }
 0x318   :  { %v5172_v2 = vpop.f32.mrf.mxu0 }
 0x392   :  { %v5190_v46 = vpop.f32.mrf.mxu1 }
 0x394   :  { %v5191_v3 = vpop.f32.mrf.mxu1 }
 0x395   :  { %v5192_v4 = vadd.f32 %v5191_v3, %v5190_v46 }
 0x396   :  { %v5193_v5 = vpop.f32.mrf.mxu1 }
 0x397   :  { %v4513_v49 = vadd.f32 %v5192_v4, %v4473_v47 }
 0x398   :  { %v5194_v6 = vpop.f32.mrf.mxu1 }
 0x399   :  { %4518 = vst [vmem:[%s7183_s5] sm:$0xff] %v4513_v49 }

</bundles_post_ra>
